<compile_context>
chip_gen: v7x
topology: tpu7x:2x2x1
jax: 0.10.0
libtpu: 0.0.40
codegen_flags: <defaults>
</compile_context>

<pallas_src>
import functools

import jax
import jax.numpy as jnp
from jax.experimental import pallas as pl
from jax.experimental.pallas import tpu as pltpu


def _round_up(x, m):
    return ((x + m - 1) // m) * m


def _largest_divisor_leq(n, cap):
    best = 1
    for c in range(1, min(n, cap) + 1):
        if n % c == 0:
            best = c
    return best


# ---------------- input projection: big, time-parallel matmul ----------------
def _input_proj_kernel(x_ref, w_ref, b_ref, out_ref):
    tb, bb, d = x_ref.shape
    g = out_ref.shape[-1]
    x2d = x_ref[...].reshape(tb * bb, d)
    y = jnp.dot(x2d, w_ref[...], preferred_element_type=jnp.float32) + b_ref[...]
    out_ref[...] = y.reshape(tb, bb, g)


def _input_projection(x_tmajor, w_in_pad, bias_pad, *, t_block):
    T, b_pad, d_pad = x_tmajor.shape
    g = w_in_pad.shape[1]
    nt = T // t_block
    return pl.pallas_call(
        _input_proj_kernel,
        out_shape=jax.ShapeDtypeStruct((T, b_pad, g), jnp.float32),
        grid_spec=pltpu.PrefetchScalarGridSpec(
            num_scalar_prefetch=0,
            grid=(nt,),
            in_specs=[
                pl.BlockSpec((t_block, b_pad, d_pad), lambda t: (t, 0, 0)),
                pl.BlockSpec((d_pad, g), lambda t: (0, 0)),
                pl.BlockSpec((1, g), lambda t: (0, 0)),
            ],
            out_specs=pl.BlockSpec((t_block, b_pad, g), lambda t: (t, 0, 0)),
        ),
        compiler_params=pltpu.CompilerParams(
            dimension_semantics=("parallel",),
        ),
    )(x_tmajor, w_in_pad, bias_pad)


# --------------------------- recurrent LSTM kernels ---------------------------
def _recurrent_steps(xp_ref, whh_scr, out_ref, h_scr, c_scr, h_pad):
    """Run t_block LSTM steps; x-projection (incl. bias) is precomputed."""
    t_block = xp_ref.shape[0]

    def step(tt, carry):
        h_prev = h_scr[...]
        c_prev = c_scr[...]
        gates = xp_ref[tt] + jnp.dot(
            h_prev, whh_scr[...], preferred_element_type=jnp.float32)
        # lane-aligned slices: h_pad is a multiple of 128
        i_g = jax.nn.sigmoid(gates[:, 0 * h_pad:1 * h_pad])
        f_g = jax.nn.sigmoid(gates[:, 1 * h_pad:2 * h_pad])
        g_g = jnp.tanh(gates[:, 2 * h_pad:3 * h_pad])
        o_g = jax.nn.sigmoid(gates[:, 3 * h_pad:4 * h_pad])
        c_new = f_g * c_prev + i_g * g_g
        h_new = o_g * jnp.tanh(c_new)
        c_scr[...] = c_new
        h_scr[...] = h_new
        if out_ref is not None:
            out_ref[tt] = h_new
        return carry

    jax.lax.fori_loop(0, t_block, step, 0, unroll=True)


def _load_weight_and_init(whh_hbm_ref, whh_scr, h_scr, c_scr, dma_sem):
    cp = pltpu.make_async_copy(whh_hbm_ref, whh_scr, dma_sem)
    cp.start()
    cp.wait()
    h_scr[...] = jnp.zeros_like(h_scr)
    c_scr[...] = jnp.zeros_like(c_scr)


def _lstm_seq_kernel(xp_ref, whh_hbm_ref, out_ref,
                     whh_scr, h_scr, c_scr, dma_sem, *, h_pad):
    t = pl.program_id(1)

    @pl.when(t == 0)
    def _():
        _load_weight_and_init(whh_hbm_ref, whh_scr, h_scr, c_scr, dma_sem)

    _recurrent_steps(xp_ref, whh_scr, out_ref, h_scr, c_scr, h_pad)


def _lstm_seq_head_kernel(xp_ref, whh_hbm_ref, wfc_ref, bfc_ref, y_ref,
                          whh_scr, h_scr, c_scr, dma_sem, *, h_pad):
    t = pl.program_id(1)

    @pl.when(t == 0)
    def _():
        _load_weight_and_init(whh_hbm_ref, whh_scr, h_scr, c_scr, dma_sem)

    # Last layer: no full-sequence HBM writeback, only the fused head output.
    _recurrent_steps(xp_ref, whh_scr, None, h_scr, c_scr, h_pad)

    @pl.when(t == pl.num_programs(1) - 1)
    def _():
        y = jnp.dot(h_scr[...], wfc_ref[...],
                    preferred_element_type=jnp.float32) + bfc_ref[...]
        y_ref[...] = jax.nn.sigmoid(y)


def _lstm_recurrence(xproj, w_hh_pad, *, h_pad, t_block, b_block):
    T, b_pad, g = xproj.shape
    nb = b_pad // b_block
    nt = T // t_block
    kernel = functools.partial(_lstm_seq_kernel, h_pad=h_pad)
    return pl.pallas_call(
        kernel,
        out_shape=jax.ShapeDtypeStruct((T, b_pad, h_pad), jnp.float32),
        grid_spec=pltpu.PrefetchScalarGridSpec(
            num_scalar_prefetch=0,
            grid=(nb, nt),
            in_specs=[
                pl.BlockSpec((t_block, b_block, g), lambda b, t: (t, b, 0)),
                pl.BlockSpec(memory_space=pl.ANY),   # W_hh stays in HBM
            ],
            out_specs=pl.BlockSpec((t_block, b_block, h_pad),
                                   lambda b, t: (t, b, 0)),
            scratch_shapes=[
                pltpu.VMEM((h_pad, 4 * h_pad), jnp.float32),  # resident W_hh
                pltpu.VMEM((b_block, h_pad), jnp.float32),    # h state
                pltpu.VMEM((b_block, h_pad), jnp.float32),    # c state
                pltpu.SemaphoreType.DMA(()),
            ],
        ),
        compiler_params=pltpu.CompilerParams(
            dimension_semantics=("parallel", "arbitrary"),
        ),
    )(xproj, w_hh_pad)


def _lstm_recurrence_with_head(xproj, w_hh_pad, w_fc_pad, b_fc_pad,
                               *, h_pad, o_pad, t_block, b_block):
    T, b_pad, g = xproj.shape
    nb = b_pad // b_block
    nt = T // t_block
    kernel = functools.partial(_lstm_seq_head_kernel, h_pad=h_pad)
    return pl.pallas_call(
        kernel,
        out_shape=jax.ShapeDtypeStruct((b_pad, o_pad), jnp.float32),
        grid_spec=pltpu.PrefetchScalarGridSpec(
            num_scalar_prefetch=0,
            grid=(nb, nt),
            in_specs=[
                pl.BlockSpec((t_block, b_block, g), lambda b, t: (t, b, 0)),
                pl.BlockSpec(memory_space=pl.ANY),   # W_hh stays in HBM
                pl.BlockSpec((h_pad, o_pad), lambda b, t: (0, 0)),
                pl.BlockSpec((1, o_pad), lambda b, t: (0, 0)),
            ],
            out_specs=pl.BlockSpec((b_block, o_pad), lambda b, t: (b, 0)),
            scratch_shapes=[
                pltpu.VMEM((h_pad, 4 * h_pad), jnp.float32),
                pltpu.VMEM((b_block, h_pad), jnp.float32),
                pltpu.VMEM((b_block, h_pad), jnp.float32),
                pltpu.SemaphoreType.DMA(()),
            ],
        ),
        compiler_params=pltpu.CompilerParams(
            dimension_semantics=("parallel", "arbitrary"),
        ),
    )(xproj, w_hh_pad, w_fc_pad, b_fc_pad)


# --------------------------- weight padding helpers ---------------------------
def _pad_gate_weight_t(w, in_dim_pad, h, h_pad):
    """PyTorch (4H, in_dim) weight -> (in_dim_pad, 4*h_pad), gate-blocked, transposed."""
    in_dim = w.shape[1]
    out = jnp.zeros((in_dim_pad, 4 * h_pad), jnp.float32)
    for k in range(4):
        out = out.at[:in_dim, k * h_pad:k * h_pad + h].set(
            jnp.transpose(w[k * h:(k + 1) * h, :]).astype(jnp.float32))
    return out


def _pad_gate_bias(b_ih, b_hh, h, h_pad):
    b = (b_ih + b_hh).astype(jnp.float32)
    out = jnp.zeros((1, 4 * h_pad), jnp.float32)
    for k in range(4):
        out = out.at[0, k * h_pad:k * h_pad + h].set(b[k * h:(k + 1) * h])
    return out


# --------------------------------- full model ---------------------------------
def init_params(key, input_size, hidden_size, num_layers, output_size):
    """PyTorch-shaped params, uniform(-1/sqrt(H), 1/sqrt(H))."""
    params = {"lstm": []}
    bound = 1.0 / jnp.sqrt(jnp.float32(hidden_size))
    for layer in range(num_layers):
        d_in = input_size if layer == 0 else hidden_size
        key, k1, k2, k3, k4 = jax.random.split(key, 5)
        params["lstm"].append({
            "w_ih": jax.random.uniform(k1, (4 * hidden_size, d_in), jnp.float32, -bound, bound),
            "w_hh": jax.random.uniform(k2, (4 * hidden_size, hidden_size), jnp.float32, -bound, bound),
            "b_ih": jax.random.uniform(k3, (4 * hidden_size,), jnp.float32, -bound, bound),
            "b_hh": jax.random.uniform(k4, (4 * hidden_size,), jnp.float32, -bound, bound),
        })
    key, k5, k6 = jax.random.split(key, 3)
    params["fc_w"] = jax.random.uniform(k5, (output_size, hidden_size), jnp.float32, -bound, bound)
    params["fc_b"] = jax.random.uniform(k6, (output_size,), jnp.float32, -bound, bound)
    return params


def lstm_model_forward(params, x):
    """x: (B, T, input_size) batch_first.  Returns sigmoid(fc(lstm(x)[:, -1, :]))."""
    B, T, D = x.shape
    lstm_params = params["lstm"]
    num_layers = len(lstm_params)
    H = lstm_params[0]["w_hh"].shape[1]
    O = params["fc_w"].shape[0]

    b_pad = _round_up(max(B, 8), 8)
    d_pad = _round_up(max(D, 128), 128)
    h_pad = _round_up(max(H, 128), 128)     # per-gate width lane-aligned
    o_pad = _round_up(max(O, 128), 128)

    t_block = _largest_divisor_leq(T, 16)
    # two batch blocks when possible -> 2-TC sharding on v7x
    b_block = b_pad // 2 if (b_pad % 16 == 0) else b_pad

    # batch_first -> time-major, zero-padded to (T, b_pad, d_pad)
    x_tm = jnp.zeros((T, b_pad, d_pad), jnp.float32)
    x_tm = x_tm.at[:, :B, :D].set(jnp.transpose(x.astype(jnp.float32), (1, 0, 2)))

    h_seq = x_tm
    in_pad = d_pad
    y_pad = None
    for li, lp in enumerate(lstm_params):
        w_ih_pad = _pad_gate_weight_t(lp["w_ih"], in_pad, H, h_pad)
        w_hh_pad = _pad_gate_weight_t(lp["w_hh"], h_pad, H, h_pad)
        bias_pad = _pad_gate_bias(lp["b_ih"], lp["b_hh"], H, h_pad)

        # Hoisted input projection: one big, time-parallel matmul (bias folded in).
        xproj = _input_projection(h_seq, w_ih_pad, bias_pad, t_block=t_block)

        if li < num_layers - 1:
            h_seq = _lstm_recurrence(xproj, w_hh_pad, h_pad=h_pad,
                                     t_block=t_block, b_block=b_block)
            in_pad = h_pad
        else:
            # Dropout(p=0.0) is identity; FC + sigmoid fused into last layer.
            w_fc_pad = jnp.zeros((h_pad, o_pad), jnp.float32)
            w_fc_pad = w_fc_pad.at[:H, :O].set(
                jnp.transpose(params["fc_w"]).astype(jnp.float32))
            b_fc_pad = jnp.zeros((1, o_pad), jnp.float32)
            b_fc_pad = b_fc_pad.at[0, :O].set(params["fc_b"].astype(jnp.float32))
            y_pad = _lstm_recurrence_with_head(
                xproj, w_hh_pad, w_fc_pad, b_fc_pad,
                h_pad=h_pad, o_pad=o_pad, t_block=t_block, b_block=b_block)

    return y_pad[:B, :O]


# ----------------------------- pure-JAX reference -----------------------------
def _reference_forward(params, x):
    B = x.shape[0]
    h_seq = jnp.transpose(x.astype(jnp.float32), (1, 0, 2))  # (T, B, D)
    for lp in params["lstm"]:
        H = lp["w_hh"].shape[1]

        def step(carry, x_t, w_ih=lp["w_ih"], w_hh=lp["w_hh"],
                 b=lp["b_ih"] + lp["b_hh"]):
            h, c = carry
            gates = x_t @ w_ih.T + h @ w_hh.T + b
            i, f, g, o = jnp.split(gates, 4, axis=-1)
            i = jax.nn.sigmoid(i)
            f = jax.nn.sigmoid(f)
            g = jnp.tanh(g)
            o = jax.nn.sigmoid(o)
            c = f * c + i * g
            h = o * jnp.tanh(c)
            return (h, c), h

        init = (jnp.zeros((B, H), jnp.float32), jnp.zeros((B, H), jnp.float32))
        _, h_seq = jax.lax.scan(step, init, h_seq)
    y = h_seq[-1] @ params["fc_w"].T + params["fc_b"]
    return jax.nn.sigmoid(y)


if __name__ == "__main__":
    batch, seq, input_size = 2, 8, 16
    hidden_size, num_layers, output_size = 32, 2, 4

    key = jax.random.PRNGKey(0)
    key, kx = jax.random.split(key)
    x = jax.random.normal(kx, (batch, seq, input_size), dtype=jnp.float32)
    params = init_params(key, input_size, hidden_size, num_layers, output_size)

    out = jax.jit(lstm_model_forward)(params, x)
    jax.block_until_ready(out)
    assert out.shape == (batch, output_size)

    ref = _reference_forward(params, x)
    assert float(jnp.max(jnp.abs(out - ref))) < 2e-2

    print("KERNEL_OK")
</pallas_src>

<mosaic_0001>
module attributes {stable_mosaic.version = 11 : i64} {
  func.func @_input_proj_kernel(%arg0: i32, %arg1: memref<8x8x128xf32, #tpu.memory_space<vmem>>, %arg2: memref<128x512xf32, #tpu.memory_space<vmem>>, %arg3: memref<1x512xf32, #tpu.memory_space<vmem>>, %arg4: memref<8x8x512xf32, #tpu.memory_space<vmem>>) attributes {dimension_semantics = [#tpu.dimension_semantics<parallel>], iteration_bounds = array<i64: 1>, scalar_prefetch = 0 : i64, scratch_operands = 0 : i64, tpu.core_type = #tpu.core_type<tc>, window_params = [{transform_indices = @transform_0, window_bounds = array<i64: 8, 8, 128>}, {pipeline_mode = #tpu.pipeline_mode<synchronous>, transform_indices = @transform_1, window_bounds = array<i64: 128, 512>}, {pipeline_mode = #tpu.pipeline_mode<synchronous>, transform_indices = @transform_2, window_bounds = array<i64: 1, 512>}, {transform_indices = @transform_3, window_bounds = array<i64: 8, 8, 512>}]} {
    %c0 = arith.constant 0 : index
    %c0_0 = arith.constant 0 : index
    %c0_1 = arith.constant 0 : index
    %0 = vector.load %arg1[%c0, %c0_0, %c0_1] : memref<8x8x128xf32, #tpu.memory_space<vmem>>, vector<8x8x128xf32>
    %1 = vector.shape_cast %0 : vector<8x8x128xf32> to vector<64x128xf32>
    %c0_2 = arith.constant 0 : index
    %c0_3 = arith.constant 0 : index
    %2 = vector.load %arg2[%c0_2, %c0_3] : memref<128x512xf32, #tpu.memory_space<vmem>>, vector<128x512xf32>
    %cst = arith.constant dense<0.000000e+00> : vector<64x512xf32>
    %3 = tpu.matmul %1, %2, %cst {dimension_numbers = #tpu.dot_dimension_numbers<[1], [0], [0], [1], [0, 0, 1, 1], [], []>} : vector<64x128xf32>, vector<128x512xf32>, vector<64x512xf32> -> vector<64x512xf32>
    %c0_4 = arith.constant 0 : index
    %c0_5 = arith.constant 0 : index
    %4 = vector.load %arg3[%c0_4, %c0_5] : memref<1x512xf32, #tpu.memory_space<vmem>>, vector<1x512xf32>
    %5 = vector.broadcast %4 : vector<1x512xf32> to vector<64x512xf32>
    %6 = arith.addf %3, %5 : vector<64x512xf32>
    %7 = vector.shape_cast %6 : vector<64x512xf32> to vector<8x8x512xf32>
    %c0_6 = arith.constant 0 : index
    %c0_7 = arith.constant 0 : index
    %c0_8 = arith.constant 0 : index
    %8 = vector.load %arg4[%c0_6, %c0_7, %c0_8] : memref<8x8x512xf32, #tpu.memory_space<vmem>>, vector<8x8x512xf32>
    tpu.vector_store %arg4[%c0_6, %c0_7, %c0_8], %7 {strides = array<i32>} : memref<8x8x512xf32, #tpu.memory_space<vmem>>, vector<8x8x512xf32>,
    return
  }
  func.func @transform_0(%arg0: i32) -> (i32, i32, i32) {
    %c0_i32 = arith.constant 0 : i32
    %c0_i32_0 = arith.constant 0 : i32
    %c0_i32_1 = arith.constant 0 : i32
    return %arg0, %c0_i32, %c0_i32_0 : i32, i32, i32
  }
  func.func @transform_1(%arg0: i32) -> (i32, i32) {
    %c0_i32 = arith.constant 0 : i32
    %c0_i32_0 = arith.constant 0 : i32
    %c0_i32_1 = arith.constant 0 : i32
    return %c0_i32, %c0_i32_0 : i32, i32
  }
  func.func @transform_2(%arg0: i32) -> (i32, i32) {
    %c0_i32 = arith.constant 0 : i32
    %c0_i32_0 = arith.constant 0 : i32
    %c0_i32_1 = arith.constant 0 : i32
    return %c0_i32, %c0_i32_0 : i32, i32
  }
  func.func @transform_3(%arg0: i32) -> (i32, i32, i32) {
    %c0_i32 = arith.constant 0 : i32
    %c0_i32_0 = arith.constant 0 : i32
    %c0_i32_1 = arith.constant 0 : i32
    return %arg0, %c0_i32, %c0_i32_0 : i32, i32, i32
  }
}

module attributes {stable_mosaic.version = 11 : i64} {
  func.func @_lstm_seq_kernel(%arg0: i32, %arg1: i32, %arg2: memref<8x8x512xf32, #tpu.memory_space<vmem>>, %arg3: memref<128x512xf32, #tpu.memory_space<any>>, %arg4: memref<8x8x128xf32, #tpu.memory_space<vmem>>, %arg5: memref<128x512xf32, #tpu.memory_space<vmem>>, %arg6: memref<8x128xf32, #tpu.memory_space<vmem>>, %arg7: memref<8x128xf32, #tpu.memory_space<vmem>>, %arg8: memref<!tpu.dma_semaphore, #tpu.memory_space<semaphore_mem>>) attributes {dimension_semantics = [#tpu.dimension_semantics<parallel>, #tpu.dimension_semantics<arbitrary>], iteration_bounds = array<i64: 1, 1>, scalar_prefetch = 0 : i64, scratch_operands = 4 : i64, tpu.core_type = #tpu.core_type<tc>, window_params = [{transform_indices = @transform_0, window_bounds = array<i64: 8, 8, 512>}, {}, {transform_indices = @transform_2, window_bounds = array<i64: 8, 8, 128>}]} {
    %c0_i32 = arith.constant 0 : i32
    %0 = arith.cmpi eq, %arg1, %c0_i32 : i32
    %1 = arith.extui %0 : i1 to i32
    %c0_i32_0 = arith.constant 0 : i32
    %2 = arith.cmpi ne, %1, %c0_i32_0 : i32
    scf.if %2 {
      tpu.enqueue_dma source(%arg3 : memref<128x512xf32, #tpu.memory_space<any>>) target(%arg5 : memref<128x512xf32, #tpu.memory_space<vmem>>) target_semaphore(%arg8 : memref<!tpu.dma_semaphore, #tpu.memory_space<semaphore_mem>>)
      tpu.wait_dma2 semaphore(%arg8 : memref<!tpu.dma_semaphore, #tpu.memory_space<semaphore_mem>>) src(%arg3 : memref<128x512xf32, #tpu.memory_space<any>>) dst(%arg5 : memref<128x512xf32, #tpu.memory_space<vmem>>)
      %cst_144 = arith.constant 0.000000e+00 : f32
      %315 = vector.broadcast %cst_144 : f32 to vector<8x128xf32>
      %c0_145 = arith.constant 0 : index
      %c0_146 = arith.constant 0 : index
      %316 = vector.load %arg6[%c0_145, %c0_146] : memref<8x128xf32, #tpu.memory_space<vmem>>, vector<8x128xf32>
      tpu.vector_store %arg6[%c0_145, %c0_146], %315 {strides = array<i32>} : memref<8x128xf32, #tpu.memory_space<vmem>>, vector<8x128xf32>,
      %cst_147 = arith.constant 0.000000e+00 : f32
      %317 = vector.broadcast %cst_147 : f32 to vector<8x128xf32>
      %c0_148 = arith.constant 0 : index
      %c0_149 = arith.constant 0 : index
      %318 = vector.load %arg7[%c0_148, %c0_149] : memref<8x128xf32, #tpu.memory_space<vmem>>, vector<8x128xf32>
      tpu.vector_store %arg7[%c0_148, %c0_149], %317 {strides = array<i32>} : memref<8x128xf32, #tpu.memory_space<vmem>>, vector<8x128xf32>,
    } else {
    }
    %c0_i32_1 = arith.constant 0 : i32
    %c0 = arith.constant 0 : index
    %c0_2 = arith.constant 0 : index
    %3 = vector.load %arg6[%c0, %c0_2] : memref<8x128xf32, #tpu.memory_space<vmem>>, vector<8x128xf32>
    %c0_3 = arith.constant 0 : index
    %c0_4 = arith.constant 0 : index
    %4 = vector.load %arg7[%c0_3, %c0_4] : memref<8x128xf32, #tpu.memory_space<vmem>>, vector<8x128xf32>
    %5 = arith.index_cast %c0_i32_1 : i32 to index
    %c0_5 = arith.constant 0 : index
    %c0_6 = arith.constant 0 : index
    %6 = vector.load %arg2[%5, %c0_5, %c0_6] : memref<8x8x512xf32, #tpu.memory_space<vmem>>, vector<1x8x512xf32>
    %7 = vector.shape_cast %6 : vector<1x8x512xf32> to vector<8x512xf32>
    %c0_7 = arith.constant 0 : index
    %c0_8 = arith.constant 0 : index
    %8 = vector.load %arg5[%c0_7, %c0_8] : memref<128x512xf32, #tpu.memory_space<vmem>>, vector<128x512xf32>
    %cst = arith.constant dense<0.000000e+00> : vector<8x512xf32>
    %9 = tpu.matmul %3, %8, %cst {dimension_numbers = #tpu.dot_dimension_numbers<[1], [0], [0], [1], [0, 0, 1, 1], [], []>} : vector<8x128xf32>, vector<128x512xf32>, vector<8x512xf32> -> vector<8x512xf32>
    %10 = arith.addf %7, %9 : vector<8x512xf32>
    %11 = vector.extract_strided_slice %10 {offsets = [0, 0], sizes = [8, 128], strides = [1, 1]} : vector<8x512xf32> to vector<8x128xf32>
    %12 = arith.negf %11 : vector<8x128xf32>
    %13 = math.exp %12 : vector<8x128xf32>
    %cst_9 = arith.constant 1.000000e+00 : f32
    %14 = vector.broadcast %cst_9 : f32 to vector<8x128xf32>
    %15 = arith.addf %14, %13 : vector<8x128xf32>
    %16 = arith.divf %14, %15 : vector<8x128xf32>
    %17 = vector.extract_strided_slice %10 {offsets = [0, 128], sizes = [8, 128], strides = [1, 1]} : vector<8x512xf32> to vector<8x128xf32>
    %18 = arith.negf %17 : vector<8x128xf32>
    %19 = math.exp %18 : vector<8x128xf32>
    %cst_10 = arith.constant 1.000000e+00 : f32
    %20 = vector.broadcast %cst_10 : f32 to vector<8x128xf32>
    %21 = arith.addf %20, %19 : vector<8x128xf32>
    %22 = arith.divf %20, %21 : vector<8x128xf32>
    %23 = vector.extract_strided_slice %10 {offsets = [0, 256], sizes = [8, 128], strides = [1, 1]} : vector<8x512xf32> to vector<8x128xf32>
    %24 = math.tanh %23 : vector<8x128xf32>
    %25 = vector.extract_strided_slice %10 {offsets = [0, 384], sizes = [8, 128], strides = [1, 1]} : vector<8x512xf32> to vector<8x128xf32>
    %26 = arith.negf %25 : vector<8x128xf32>
    %27 = math.exp %26 : vector<8x128xf32>
    %cst_11 = arith.constant 1.000000e+00 : f32
    %28 = vector.broadcast %cst_11 : f32 to vector<8x128xf32>
    %29 = arith.addf %28, %27 : vector<8x128xf32>
    %30 = arith.divf %28, %29 : vector<8x128xf32>
    %31 = arith.mulf %22, %4 : vector<8x128xf32>
    %32 = arith.mulf %16, %24 : vector<8x128xf32>
    %33 = arith.addf %31, %32 : vector<8x128xf32>
    %34 = math.tanh %33 : vector<8x128xf32>
    %35 = arith.mulf %30, %34 : vector<8x128xf32>
    %c0_12 = arith.constant 0 : index
    %c0_13 = arith.constant 0 : index
    %36 = vector.load %arg7[%c0_12, %c0_13] : memref<8x128xf32, #tpu.memory_space<vmem>>, vector<8x128xf32>
    tpu.vector_store %arg7[%c0_12, %c0_13], %33 {strides = array<i32>} : memref<8x128xf32, #tpu.memory_space<vmem>>, vector<8x128xf32>,
    %c0_14 = arith.constant 0 : index
    %c0_15 = arith.constant 0 : index
    %37 = vector.load %arg6[%c0_14, %c0_15] : memref<8x128xf32, #tpu.memory_space<vmem>>, vector<8x128xf32>
    tpu.vector_store %arg6[%c0_14, %c0_15], %35 {strides = array<i32>} : memref<8x128xf32, #tpu.memory_space<vmem>>, vector<8x128xf32>,
    %38 = arith.index_cast %c0_i32_1 : i32 to index
    %c0_16 = arith.constant 0 : index
    %c0_17 = arith.constant 0 : index
    %39 = vector.load %arg4[%38, %c0_16, %c0_17] : memref<8x8x128xf32, #tpu.memory_space<vmem>>, vector<1x8x128xf32>
    %40 = vector.shape_cast %39 : vector<1x8x128xf32> to vector<8x128xf32>
    %41 = vector.shape_cast %35 : vector<8x128xf32> to vector<1x8x128xf32>
    tpu.vector_store %arg4[%38, %c0_16, %c0_17], %41 {strides = array<i32>} : memref<8x8x128xf32, #tpu.memory_space<vmem>>, vector<1x8x128xf32>,
    %c1_i32 = arith.constant 1 : i32
    %c0_18 = arith.constant 0 : index
    %c0_19 = arith.constant 0 : index
    %42 = vector.load %arg6[%c0_18, %c0_19] : memref<8x128xf32, #tpu.memory_space<vmem>>, vector<8x128xf32>
    %c0_20 = arith.constant 0 : index
    %c0_21 = arith.constant 0 : index
    %43 = vector.load %arg7[%c0_20, %c0_21] : memref<8x128xf32, #tpu.memory_space<vmem>>, vector<8x128xf32>
    %44 = arith.index_cast %c1_i32 : i32 to index
    %c0_22 = arith.constant 0 : index
    %c0_23 = arith.constant 0 : index
    %45 = vector.load %arg2[%44, %c0_22, %c0_23] : memref<8x8x512xf32, #tpu.memory_space<vmem>>, vector<1x8x512xf32>
    %46 = vector.shape_cast %45 : vector<1x8x512xf32> to vector<8x512xf32>
    %c0_24 = arith.constant 0 : index
    %c0_25 = arith.constant 0 : index
    %47 = vector.load %arg5[%c0_24, %c0_25] : memref<128x512xf32, #tpu.memory_space<vmem>>, vector<128x512xf32>
    %cst_26 = arith.constant dense<0.000000e+00> : vector<8x512xf32>
    %48 = tpu.matmul %42, %47, %cst_26 {dimension_numbers = #tpu.dot_dimension_numbers<[1], [0], [0], [1], [0, 0, 1, 1], [], []>} : vector<8x128xf32>, vector<128x512xf32>, vector<8x512xf32> -> vector<8x512xf32>
    %49 = arith.addf %46, %48 : vector<8x512xf32>
    %50 = vector.extract_strided_slice %49 {offsets = [0, 0], sizes = [8, 128], strides = [1, 1]} : vector<8x512xf32> to vector<8x128xf32>
    %51 = arith.negf %50 : vector<8x128xf32>
    %52 = math.exp %51 : vector<8x128xf32>
    %cst_27 = arith.constant 1.000000e+00 : f32
    %53 = vector.broadcast %cst_27 : f32 to vector<8x128xf32>
    %54 = arith.addf %53, %52 : vector<8x128xf32>
    %55 = arith.divf %53, %54 : vector<8x128xf32>
    %56 = vector.extract_strided_slice %49 {offsets = [0, 128], sizes = [8, 128], strides = [1, 1]} : vector<8x512xf32> to vector<8x128xf32>
    %57 = arith.negf %56 : vector<8x128xf32>
    %58 = math.exp %57 : vector<8x128xf32>
    %cst_28 = arith.constant 1.000000e+00 : f32
    %59 = vector.broadcast %cst_28 : f32 to vector<8x128xf32>
    %60 = arith.addf %59, %58 : vector<8x128xf32>
    %61 = arith.divf %59, %60 : vector<8x128xf32>
    %62 = vector.extract_strided_slice %49 {offsets = [0, 256], sizes = [8, 128], strides = [1, 1]} : vector<8x512xf32> to vector<8x128xf32>
    %63 = math.tanh %62 : vector<8x128xf32>
    %64 = vector.extract_strided_slice %49 {offsets = [0, 384], sizes = [8, 128], strides = [1, 1]} : vector<8x512xf32> to vector<8x128xf32>
    %65 = arith.negf %64 : vector<8x128xf32>
    %66 = math.exp %65 : vector<8x128xf32>
    %cst_29 = arith.constant 1.000000e+00 : f32
    %67 = vector.broadcast %cst_29 : f32 to vector<8x128xf32>
    %68 = arith.addf %67, %66 : vector<8x128xf32>
    %69 = arith.divf %67, %68 : vector<8x128xf32>
    %70 = arith.mulf %61, %43 : vector<8x128xf32>
    %71 = arith.mulf %55, %63 : vector<8x128xf32>
    %72 = arith.addf %70, %71 : vector<8x128xf32>
    %73 = math.tanh %72 : vector<8x128xf32>
    %74 = arith.mulf %69, %73 : vector<8x128xf32>
    %c0_30 = arith.constant 0 : index
    %c0_31 = arith.constant 0 : index
    %75 = vector.load %arg7[%c0_30, %c0_31] : memref<8x128xf32, #tpu.memory_space<vmem>>, vector<8x128xf32>
    tpu.vector_store %arg7[%c0_30, %c0_31], %72 {strides = array<i32>} : memref<8x128xf32, #tpu.memory_space<vmem>>, vector<8x128xf32>,
    %c0_32 = arith.constant 0 : index
    %c0_33 = arith.constant 0 : index
    %76 = vector.load %arg6[%c0_32, %c0_33] : memref<8x128xf32, #tpu.memory_space<vmem>>, vector<8x128xf32>
    tpu.vector_store %arg6[%c0_32, %c0_33], %74 {strides = array<i32>} : memref<8x128xf32, #tpu.memory_space<vmem>>, vector<8x128xf32>,
    %77 = arith.index_cast %c1_i32 : i32 to index
    %c0_34 = arith.constant 0 : index
    %c0_35 = arith.constant 0 : index
    %78 = vector.load %arg4[%77, %c0_34, %c0_35] : memref<8x8x128xf32, #tpu.memory_space<vmem>>, vector<1x8x128xf32>
    %79 = vector.shape_cast %78 : vector<1x8x128xf32> to vector<8x128xf32>
    %80 = vector.shape_cast %74 : vector<8x128xf32> to vector<1x8x128xf32>
    tpu.vector_store %arg4[%77, %c0_34, %c0_35], %80 {strides = array<i32>} : memref<8x8x128xf32, #tpu.memory_space<vmem>>, vector<1x8x128xf32>,
    %c2_i32 = arith.constant 2 : i32
    %c0_36 = arith.constant 0 : index
    %c0_37 = arith.constant 0 : index
    %81 = vector.load %arg6[%c0_36, %c0_37] : memref<8x128xf32, #tpu.memory_space<vmem>>, vector<8x128xf32>
    %c0_38 = arith.constant 0 : index
    %c0_39 = arith.constant 0 : index
    %82 = vector.load %arg7[%c0_38, %c0_39] : memref<8x128xf32, #tpu.memory_space<vmem>>, vector<8x128xf32>
    %83 = arith.index_cast %c2_i32 : i32 to index
    %c0_40 = arith.constant 0 : index
    %c0_41 = arith.constant 0 : index
    %84 = vector.load %arg2[%83, %c0_40, %c0_41] : memref<8x8x512xf32, #tpu.memory_space<vmem>>, vector<1x8x512xf32>
    %85 = vector.shape_cast %84 : vector<1x8x512xf32> to vector<8x512xf32>
    %c0_42 = arith.constant 0 : index
    %c0_43 = arith.constant 0 : index
    %86 = vector.load %arg5[%c0_42, %c0_43] : memref<128x512xf32, #tpu.memory_space<vmem>>, vector<128x512xf32>
    %cst_44 = arith.constant dense<0.000000e+00> : vector<8x512xf32>
    %87 = tpu.matmul %81, %86, %cst_44 {dimension_numbers = #tpu.dot_dimension_numbers<[1], [0], [0], [1], [0, 0, 1, 1], [], []>} : vector<8x128xf32>, vector<128x512xf32>, vector<8x512xf32> -> vector<8x512xf32>
    %88 = arith.addf %85, %87 : vector<8x512xf32>
    %89 = vector.extract_strided_slice %88 {offsets = [0, 0], sizes = [8, 128], strides = [1, 1]} : vector<8x512xf32> to vector<8x128xf32>
    %90 = arith.negf %89 : vector<8x128xf32>
    %91 = math.exp %90 : vector<8x128xf32>
    %cst_45 = arith.constant 1.000000e+00 : f32
    %92 = vector.broadcast %cst_45 : f32 to vector<8x128xf32>
    %93 = arith.addf %92, %91 : vector<8x128xf32>
    %94 = arith.divf %92, %93 : vector<8x128xf32>
    %95 = vector.extract_strided_slice %88 {offsets = [0, 128], sizes = [8, 128], strides = [1, 1]} : vector<8x512xf32> to vector<8x128xf32>
    %96 = arith.negf %95 : vector<8x128xf32>
    %97 = math.exp %96 : vector<8x128xf32>
    %cst_46 = arith.constant 1.000000e+00 : f32
    %98 = vector.broadcast %cst_46 : f32 to vector<8x128xf32>
    %99 = arith.addf %98, %97 : vector<8x128xf32>
    %100 = arith.divf %98, %99 : vector<8x128xf32>
    %101 = vector.extract_strided_slice %88 {offsets = [0, 256], sizes = [8, 128], strides = [1, 1]} : vector<8x512xf32> to vector<8x128xf32>
    %102 = math.tanh %101 : vector<8x128xf32>
    %103 = vector.extract_strided_slice %88 {offsets = [0, 384], sizes = [8, 128], strides = [1, 1]} : vector<8x512xf32> to vector<8x128xf32>
    %104 = arith.negf %103 : vector<8x128xf32>
    %105 = math.exp %104 : vector<8x128xf32>
    %cst_47 = arith.constant 1.000000e+00 : f32
    %106 = vector.broadcast %cst_47 : f32 to vector<8x128xf32>
    %107 = arith.addf %106, %105 : vector<8x128xf32>
    %108 = arith.divf %106, %107 : vector<8x128xf32>
    %109 = arith.mulf %100, %82 : vector<8x128xf32>
    %110 = arith.mulf %94, %102 : vector<8x128xf32>
    %111 = arith.addf %109, %110 : vector<8x128xf32>
    %112 = math.tanh %111 : vector<8x128xf32>
    %113 = arith.mulf %108, %112 : vector<8x128xf32>
    %c0_48 = arith.constant 0 : index
    %c0_49 = arith.constant 0 : index
    %114 = vector.load %arg7[%c0_48, %c0_49] : memref<8x128xf32, #tpu.memory_space<vmem>>, vector<8x128xf32>
    tpu.vector_store %arg7[%c0_48, %c0_49], %111 {strides = array<i32>} : memref<8x128xf32, #tpu.memory_space<vmem>>, vector<8x128xf32>,
    %c0_50 = arith.constant 0 : index
    %c0_51 = arith.constant 0 : index
    %115 = vector.load %arg6[%c0_50, %c0_51] : memref<8x128xf32, #tpu.memory_space<vmem>>, vector<8x128xf32>
    tpu.vector_store %arg6[%c0_50, %c0_51], %113 {strides = array<i32>} : memref<8x128xf32, #tpu.memory_space<vmem>>, vector<8x128xf32>,
    %116 = arith.index_cast %c2_i32 : i32 to index
    %c0_52 = arith.constant 0 : index
    %c0_53 = arith.constant 0 : index
    %117 = vector.load %arg4[%116, %c0_52, %c0_53] : memref<8x8x128xf32, #tpu.memory_space<vmem>>, vector<1x8x128xf32>
    %118 = vector.shape_cast %117 : vector<1x8x128xf32> to vector<8x128xf32>
    %119 = vector.shape_cast %113 : vector<8x128xf32> to vector<1x8x128xf32>
    tpu.vector_store %arg4[%116, %c0_52, %c0_53], %119 {strides = array<i32>} : memref<8x8x128xf32, #tpu.memory_space<vmem>>, vector<1x8x128xf32>,
    %c3_i32 = arith.constant 3 : i32
    %c0_54 = arith.constant 0 : index
    %c0_55 = arith.constant 0 : index
    %120 = vector.load %arg6[%c0_54, %c0_55] : memref<8x128xf32, #tpu.memory_space<vmem>>, vector<8x128xf32>
    %c0_56 = arith.constant 0 : index
    %c0_57 = arith.constant 0 : index
    %121 = vector.load %arg7[%c0_56, %c0_57] : memref<8x128xf32, #tpu.memory_space<vmem>>, vector<8x128xf32>
    %122 = arith.index_cast %c3_i32 : i32 to index
    %c0_58 = arith.constant 0 : index
    %c0_59 = arith.constant 0 : index
    %123 = vector.load %arg2[%122, %c0_58, %c0_59] : memref<8x8x512xf32, #tpu.memory_space<vmem>>, vector<1x8x512xf32>
    %124 = vector.shape_cast %123 : vector<1x8x512xf32> to vector<8x512xf32>
    %c0_60 = arith.constant 0 : index
    %c0_61 = arith.constant 0 : index
    %125 = vector.load %arg5[%c0_60, %c0_61] : memref<128x512xf32, #tpu.memory_space<vmem>>, vector<128x512xf32>
    %cst_62 = arith.constant dense<0.000000e+00> : vector<8x512xf32>
    %126 = tpu.matmul %120, %125, %cst_62 {dimension_numbers = #tpu.dot_dimension_numbers<[1], [0], [0], [1], [0, 0, 1, 1], [], []>} : vector<8x128xf32>, vector<128x512xf32>, vector<8x512xf32> -> vector<8x512xf32>
    %127 = arith.addf %124, %126 : vector<8x512xf32>
    %128 = vector.extract_strided_slice %127 {offsets = [0, 0], sizes = [8, 128], strides = [1, 1]} : vector<8x512xf32> to vector<8x128xf32>
    %129 = arith.negf %128 : vector<8x128xf32>
    %130 = math.exp %129 : vector<8x128xf32>
    %cst_63 = arith.constant 1.000000e+00 : f32
    %131 = vector.broadcast %cst_63 : f32 to vector<8x128xf32>
    %132 = arith.addf %131, %130 : vector<8x128xf32>
    %133 = arith.divf %131, %132 : vector<8x128xf32>
    %134 = vector.extract_strided_slice %127 {offsets = [0, 128], sizes = [8, 128], strides = [1, 1]} : vector<8x512xf32> to vector<8x128xf32>
    %135 = arith.negf %134 : vector<8x128xf32>
    %136 = math.exp %135 : vector<8x128xf32>
    %cst_64 = arith.constant 1.000000e+00 : f32
    %137 = vector.broadcast %cst_64 : f32 to vector<8x128xf32>
    %138 = arith.addf %137, %136 : vector<8x128xf32>
    %139 = arith.divf %137, %138 : vector<8x128xf32>
    %140 = vector.extract_strided_slice %127 {offsets = [0, 256], sizes = [8, 128], strides = [1, 1]} : vector<8x512xf32> to vector<8x128xf32>
    %141 = math.tanh %140 : vector<8x128xf32>
    %142 = vector.extract_strided_slice %127 {offsets = [0, 384], sizes = [8, 128], strides = [1, 1]} : vector<8x512xf32> to vector<8x128xf32>
    %143 = arith.negf %142 : vector<8x128xf32>
    %144 = math.exp %143 : vector<8x128xf32>
    %cst_65 = arith.constant 1.000000e+00 : f32
    %145 = vector.broadcast %cst_65 : f32 to vector<8x128xf32>
    %146 = arith.addf %145, %144 : vector<8x128xf32>
    %147 = arith.divf %145, %146 : vector<8x128xf32>
    %148 = arith.mulf %139, %121 : vector<8x128xf32>
    %149 = arith.mulf %133, %141 : vector<8x128xf32>
    %150 = arith.addf %148, %149 : vector<8x128xf32>
    %151 = math.tanh %150 : vector<8x128xf32>
    %152 = arith.mulf %147, %151 : vector<8x128xf32>
    %c0_66 = arith.constant 0 : index
    %c0_67 = arith.constant 0 : index
    %153 = vector.load %arg7[%c0_66, %c0_67] : memref<8x128xf32, #tpu.memory_space<vmem>>, vector<8x128xf32>
    tpu.vector_store %arg7[%c0_66, %c0_67], %150 {strides = array<i32>} : memref<8x128xf32, #tpu.memory_space<vmem>>, vector<8x128xf32>,
    %c0_68 = arith.constant 0 : index
    %c0_69 = arith.constant 0 : index
    %154 = vector.load %arg6[%c0_68, %c0_69] : memref<8x128xf32, #tpu.memory_space<vmem>>, vector<8x128xf32>
    tpu.vector_store %arg6[%c0_68, %c0_69], %152 {strides = array<i32>} : memref<8x128xf32, #tpu.memory_space<vmem>>, vector<8x128xf32>,
    %155 = arith.index_cast %c3_i32 : i32 to index
    %c0_70 = arith.constant 0 : index
    %c0_71 = arith.constant 0 : index
    %156 = vector.load %arg4[%155, %c0_70, %c0_71] : memref<8x8x128xf32, #tpu.memory_space<vmem>>, vector<1x8x128xf32>
    %157 = vector.shape_cast %156 : vector<1x8x128xf32> to vector<8x128xf32>
    %158 = vector.shape_cast %152 : vector<8x128xf32> to vector<1x8x128xf32>
    tpu.vector_store %arg4[%155, %c0_70, %c0_71], %158 {strides = array<i32>} : memref<8x8x128xf32, #tpu.memory_space<vmem>>, vector<1x8x128xf32>,
    %c4_i32 = arith.constant 4 : i32
    %c0_72 = arith.constant 0 : index
    %c0_73 = arith.constant 0 : index
    %159 = vector.load %arg6[%c0_72, %c0_73] : memref<8x128xf32, #tpu.memory_space<vmem>>, vector<8x128xf32>
    %c0_74 = arith.constant 0 : index
    %c0_75 = arith.constant 0 : index
    %160 = vector.load %arg7[%c0_74, %c0_75] : memref<8x128xf32, #tpu.memory_space<vmem>>, vector<8x128xf32>
    %161 = arith.index_cast %c4_i32 : i32 to index
    %c0_76 = arith.constant 0 : index
    %c0_77 = arith.constant 0 : index
    %162 = vector.load %arg2[%161, %c0_76, %c0_77] : memref<8x8x512xf32, #tpu.memory_space<vmem>>, vector<1x8x512xf32>
    %163 = vector.shape_cast %162 : vector<1x8x512xf32> to vector<8x512xf32>
    %c0_78 = arith.constant 0 : index
    %c0_79 = arith.constant 0 : index
    %164 = vector.load %arg5[%c0_78, %c0_79] : memref<128x512xf32, #tpu.memory_space<vmem>>, vector<128x512xf32>
    %cst_80 = arith.constant dense<0.000000e+00> : vector<8x512xf32>
    %165 = tpu.matmul %159, %164, %cst_80 {dimension_numbers = #tpu.dot_dimension_numbers<[1], [0], [0], [1], [0, 0, 1, 1], [], []>} : vector<8x128xf32>, vector<128x512xf32>, vector<8x512xf32> -> vector<8x512xf32>
    %166 = arith.addf %163, %165 : vector<8x512xf32>
    %167 = vector.extract_strided_slice %166 {offsets = [0, 0], sizes = [8, 128], strides = [1, 1]} : vector<8x512xf32> to vector<8x128xf32>
    %168 = arith.negf %167 : vector<8x128xf32>
    %169 = math.exp %168 : vector<8x128xf32>
    %cst_81 = arith.constant 1.000000e+00 : f32
    %170 = vector.broadcast %cst_81 : f32 to vector<8x128xf32>
    %171 = arith.addf %170, %169 : vector<8x128xf32>
    %172 = arith.divf %170, %171 : vector<8x128xf32>
    %173 = vector.extract_strided_slice %166 {offsets = [0, 128], sizes = [8, 128], strides = [1, 1]} : vector<8x512xf32> to vector<8x128xf32>
    %174 = arith.negf %173 : vector<8x128xf32>
    %175 = math.exp %174 : vector<8x128xf32>
    %cst_82 = arith.constant 1.000000e+00 : f32
    %176 = vector.broadcast %cst_82 : f32 to vector<8x128xf32>
    %177 = arith.addf %176, %175 : vector<8x128xf32>
    %178 = arith.divf %176, %177 : vector<8x128xf32>
    %179 = vector.extract_strided_slice %166 {offsets = [0, 256], sizes = [8, 128], strides = [1, 1]} : vector<8x512xf32> to vector<8x128xf32>
    %180 = math.tanh %179 : vector<8x128xf32>
    %181 = vector.extract_strided_slice %166 {offsets = [0, 384], sizes = [8, 128], strides = [1, 1]} : vector<8x512xf32> to vector<8x128xf32>
    %182 = arith.negf %181 : vector<8x128xf32>
    %183 = math.exp %182 : vector<8x128xf32>
    %cst_83 = arith.constant 1.000000e+00 : f32
    %184 = vector.broadcast %cst_83 : f32 to vector<8x128xf32>
    %185 = arith.addf %184, %183 : vector<8x128xf32>
    %186 = arith.divf %184, %185 : vector<8x128xf32>
    %187 = arith.mulf %178, %160 : vector<8x128xf32>
    %188 = arith.mulf %172, %180 : vector<8x128xf32>
    %189 = arith.addf %187, %188 : vector<8x128xf32>
    %190 = math.tanh %189 : vector<8x128xf32>
    %191 = arith.mulf %186, %190 : vector<8x128xf32>
    %c0_84 = arith.constant 0 : index
    %c0_85 = arith.constant 0 : index
    %192 = vector.load %arg7[%c0_84, %c0_85] : memref<8x128xf32, #tpu.memory_space<vmem>>, vector<8x128xf32>
    tpu.vector_store %arg7[%c0_84, %c0_85], %189 {strides = array<i32>} : memref<8x128xf32, #tpu.memory_space<vmem>>, vector<8x128xf32>,
    %c0_86 = arith.constant 0 : index
    %c0_87 = arith.constant 0 : index
    %193 = vector.load %arg6[%c0_86, %c0_87] : memref<8x128xf32, #tpu.memory_space<vmem>>, vector<8x128xf32>
    tpu.vector_store %arg6[%c0_86, %c0_87], %191 {strides = array<i32>} : memref<8x128xf32, #tpu.memory_space<vmem>>, vector<8x128xf32>,
    %194 = arith.index_cast %c4_i32 : i32 to index
    %c0_88 = arith.constant 0 : index
    %c0_89 = arith.constant 0 : index
    %195 = vector.load %arg4[%194, %c0_88, %c0_89] : memref<8x8x128xf32, #tpu.memory_space<vmem>>, vector<1x8x128xf32>
    %196 = vector.shape_cast %195 : vector<1x8x128xf32> to vector<8x128xf32>
    %197 = vector.shape_cast %191 : vector<8x128xf32> to vector<1x8x128xf32>
    tpu.vector_store %arg4[%194, %c0_88, %c0_89], %197 {strides = array<i32>} : memref<8x8x128xf32, #tpu.memory_space<vmem>>, vector<1x8x128xf32>,
    %c5_i32 = arith.constant 5 : i32
    %c0_90 = arith.constant 0 : index
    %c0_91 = arith.constant 0 : index
    %198 = vector.load %arg6[%c0_90, %c0_91] : memref<8x128xf32, #tpu.memory_space<vmem>>, vector<8x128xf32>
    %c0_92 = arith.constant 0 : index
    %c0_93 = arith.constant 0 : index
    %199 = vector.load %arg7[%c0_92, %c0_93] : memref<8x128xf32, #tpu.memory_space<vmem>>, vector<8x128xf32>
    %200 = arith.index_cast %c5_i32 : i32 to index
    %c0_94 = arith.constant 0 : index
    %c0_95 = arith.constant 0 : index
    %201 = vector.load %arg2[%200, %c0_94, %c0_95] : memref<8x8x512xf32, #tpu.memory_space<vmem>>, vector<1x8x512xf32>
    %202 = vector.shape_cast %201 : vector<1x8x512xf32> to vector<8x512xf32>
    %c0_96 = arith.constant 0 : index
    %c0_97 = arith.constant 0 : index
    %203 = vector.load %arg5[%c0_96, %c0_97] : memref<128x512xf32, #tpu.memory_space<vmem>>, vector<128x512xf32>
    %cst_98 = arith.constant dense<0.000000e+00> : vector<8x512xf32>
    %204 = tpu.matmul %198, %203, %cst_98 {dimension_numbers = #tpu.dot_dimension_numbers<[1], [0], [0], [1], [0, 0, 1, 1], [], []>} : vector<8x128xf32>, vector<128x512xf32>, vector<8x512xf32> -> vector<8x512xf32>
    %205 = arith.addf %202, %204 : vector<8x512xf32>
    %206 = vector.extract_strided_slice %205 {offsets = [0, 0], sizes = [8, 128], strides = [1, 1]} : vector<8x512xf32> to vector<8x128xf32>
    %207 = arith.negf %206 : vector<8x128xf32>
    %208 = math.exp %207 : vector<8x128xf32>
    %cst_99 = arith.constant 1.000000e+00 : f32
    %209 = vector.broadcast %cst_99 : f32 to vector<8x128xf32>
    %210 = arith.addf %209, %208 : vector<8x128xf32>
    %211 = arith.divf %209, %210 : vector<8x128xf32>
    %212 = vector.extract_strided_slice %205 {offsets = [0, 128], sizes = [8, 128], strides = [1, 1]} : vector<8x512xf32> to vector<8x128xf32>
    %213 = arith.negf %212 : vector<8x128xf32>
    %214 = math.exp %213 : vector<8x128xf32>
    %cst_100 = arith.constant 1.000000e+00 : f32
    %215 = vector.broadcast %cst_100 : f32 to vector<8x128xf32>
    %216 = arith.addf %215, %214 : vector<8x128xf32>
    %217 = arith.divf %215, %216 : vector<8x128xf32>
    %218 = vector.extract_strided_slice %205 {offsets = [0, 256], sizes = [8, 128], strides = [1, 1]} : vector<8x512xf32> to vector<8x128xf32>
    %219 = math.tanh %218 : vector<8x128xf32>
    %220 = vector.extract_strided_slice %205 {offsets = [0, 384], sizes = [8, 128], strides = [1, 1]} : vector<8x512xf32> to vector<8x128xf32>
    %221 = arith.negf %220 : vector<8x128xf32>
    %222 = math.exp %221 : vector<8x128xf32>
    %cst_101 = arith.constant 1.000000e+00 : f32
    %223 = vector.broadcast %cst_101 : f32 to vector<8x128xf32>
    %224 = arith.addf %223, %222 : vector<8x128xf32>
    %225 = arith.divf %223, %224 : vector<8x128xf32>
    %226 = arith.mulf %217, %199 : vector<8x128xf32>
    %227 = arith.mulf %211, %219 : vector<8x128xf32>
    %228 = arith.addf %226, %227 : vector<8x128xf32>
    %229 = math.tanh %228 : vector<8x128xf32>
    %230 = arith.mulf %225, %229 : vector<8x128xf32>
    %c0_102 = arith.constant 0 : index
    %c0_103 = arith.constant 0 : index
    %231 = vector.load %arg7[%c0_102, %c0_103] : memref<8x128xf32, #tpu.memory_space<vmem>>, vector<8x128xf32>
    tpu.vector_store %arg7[%c0_102, %c0_103], %228 {strides = array<i32>} : memref<8x128xf32, #tpu.memory_space<vmem>>, vector<8x128xf32>,
    %c0_104 = arith.constant 0 : index
    %c0_105 = arith.constant 0 : index
    %232 = vector.load %arg6[%c0_104, %c0_105] : memref<8x128xf32, #tpu.memory_space<vmem>>, vector<8x128xf32>
    tpu.vector_store %arg6[%c0_104, %c0_105], %230 {strides = array<i32>} : memref<8x128xf32, #tpu.memory_space<vmem>>, vector<8x128xf32>,
    %233 = arith.index_cast %c5_i32 : i32 to index
    %c0_106 = arith.constant 0 : index
    %c0_107 = arith.constant 0 : index
    %234 = vector.load %arg4[%233, %c0_106, %c0_107] : memref<8x8x128xf32, #tpu.memory_space<vmem>>, vector<1x8x128xf32>
    %235 = vector.shape_cast %234 : vector<1x8x128xf32> to vector<8x128xf32>
    %236 = vector.shape_cast %230 : vector<8x128xf32> to vector<1x8x128xf32>
    tpu.vector_store %arg4[%233, %c0_106, %c0_107], %236 {strides = array<i32>} : memref<8x8x128xf32, #tpu.memory_space<vmem>>, vector<1x8x128xf32>,
    %c6_i32 = arith.constant 6 : i32
    %c0_108 = arith.constant 0 : index
    %c0_109 = arith.constant 0 : index
    %237 = vector.load %arg6[%c0_108, %c0_109] : memref<8x128xf32, #tpu.memory_space<vmem>>, vector<8x128xf32>
    %c0_110 = arith.constant 0 : index
    %c0_111 = arith.constant 0 : index
    %238 = vector.load %arg7[%c0_110, %c0_111] : memref<8x128xf32, #tpu.memory_space<vmem>>, vector<8x128xf32>
    %239 = arith.index_cast %c6_i32 : i32 to index
    %c0_112 = arith.constant 0 : index
    %c0_113 = arith.constant 0 : index
    %240 = vector.load %arg2[%239, %c0_112, %c0_113] : memref<8x8x512xf32, #tpu.memory_space<vmem>>, vector<1x8x512xf32>
    %241 = vector.shape_cast %240 : vector<1x8x512xf32> to vector<8x512xf32>
    %c0_114 = arith.constant 0 : index
    %c0_115 = arith.constant 0 : index
    %242 = vector.load %arg5[%c0_114, %c0_115] : memref<128x512xf32, #tpu.memory_space<vmem>>, vector<128x512xf32>
    %cst_116 = arith.constant dense<0.000000e+00> : vector<8x512xf32>
    %243 = tpu.matmul %237, %242, %cst_116 {dimension_numbers = #tpu.dot_dimension_numbers<[1], [0], [0], [1], [0, 0, 1, 1], [], []>} : vector<8x128xf32>, vector<128x512xf32>, vector<8x512xf32> -> vector<8x512xf32>
    %244 = arith.addf %241, %243 : vector<8x512xf32>
    %245 = vector.extract_strided_slice %244 {offsets = [0, 0], sizes = [8, 128], strides = [1, 1]} : vector<8x512xf32> to vector<8x128xf32>
    %246 = arith.negf %245 : vector<8x128xf32>
    %247 = math.exp %246 : vector<8x128xf32>
    %cst_117 = arith.constant 1.000000e+00 : f32
    %248 = vector.broadcast %cst_117 : f32 to vector<8x128xf32>
    %249 = arith.addf %248, %247 : vector<8x128xf32>
    %250 = arith.divf %248, %249 : vector<8x128xf32>
    %251 = vector.extract_strided_slice %244 {offsets = [0, 128], sizes = [8, 128], strides = [1, 1]} : vector<8x512xf32> to vector<8x128xf32>
    %252 = arith.negf %251 : vector<8x128xf32>
    %253 = math.exp %252 : vector<8x128xf32>
    %cst_118 = arith.constant 1.000000e+00 : f32
    %254 = vector.broadcast %cst_118 : f32 to vector<8x128xf32>
    %255 = arith.addf %254, %253 : vector<8x128xf32>
    %256 = arith.divf %254, %255 : vector<8x128xf32>
    %257 = vector.extract_strided_slice %244 {offsets = [0, 256], sizes = [8, 128], strides = [1, 1]} : vector<8x512xf32> to vector<8x128xf32>
    %258 = math.tanh %257 : vector<8x128xf32>
    %259 = vector.extract_strided_slice %244 {offsets = [0, 384], sizes = [8, 128], strides = [1, 1]} : vector<8x512xf32> to vector<8x128xf32>
    %260 = arith.negf %259 : vector<8x128xf32>
    %261 = math.exp %260 : vector<8x128xf32>
    %cst_119 = arith.constant 1.000000e+00 : f32
    %262 = vector.broadcast %cst_119 : f32 to vector<8x128xf32>
    %263 = arith.addf %262, %261 : vector<8x128xf32>
    %264 = arith.divf %262, %263 : vector<8x128xf32>
    %265 = arith.mulf %256, %238 : vector<8x128xf32>
    %266 = arith.mulf %250, %258 : vector<8x128xf32>
    %267 = arith.addf %265, %266 : vector<8x128xf32>
    %268 = math.tanh %267 : vector<8x128xf32>
    %269 = arith.mulf %264, %268 : vector<8x128xf32>
    %c0_120 = arith.constant 0 : index
    %c0_121 = arith.constant 0 : index
    %270 = vector.load %arg7[%c0_120, %c0_121] : memref<8x128xf32, #tpu.memory_space<vmem>>, vector<8x128xf32>
    tpu.vector_store %arg7[%c0_120, %c0_121], %267 {strides = array<i32>} : memref<8x128xf32, #tpu.memory_space<vmem>>, vector<8x128xf32>,
    %c0_122 = arith.constant 0 : index
    %c0_123 = arith.constant 0 : index
    %271 = vector.load %arg6[%c0_122, %c0_123] : memref<8x128xf32, #tpu.memory_space<vmem>>, vector<8x128xf32>
    tpu.vector_store %arg6[%c0_122, %c0_123], %269 {strides = array<i32>} : memref<8x128xf32, #tpu.memory_space<vmem>>, vector<8x128xf32>,
    %272 = arith.index_cast %c6_i32 : i32 to index
    %c0_124 = arith.constant 0 : index
    %c0_125 = arith.constant 0 : index
    %273 = vector.load %arg4[%272, %c0_124, %c0_125] : memref<8x8x128xf32, #tpu.memory_space<vmem>>, vector<1x8x128xf32>
    %274 = vector.shape_cast %273 : vector<1x8x128xf32> to vector<8x128xf32>
    %275 = vector.shape_cast %269 : vector<8x128xf32> to vector<1x8x128xf32>
    tpu.vector_store %arg4[%272, %c0_124, %c0_125], %275 {strides = array<i32>} : memref<8x8x128xf32, #tpu.memory_space<vmem>>, vector<1x8x128xf32>,
    %c7_i32 = arith.constant 7 : i32
    %c0_126 = arith.constant 0 : index
    %c0_127 = arith.constant 0 : index
    %276 = vector.load %arg6[%c0_126, %c0_127] : memref<8x128xf32, #tpu.memory_space<vmem>>, vector<8x128xf32>
    %c0_128 = arith.constant 0 : index
    %c0_129 = arith.constant 0 : index
    %277 = vector.load %arg7[%c0_128, %c0_129] : memref<8x128xf32, #tpu.memory_space<vmem>>, vector<8x128xf32>
    %278 = arith.index_cast %c7_i32 : i32 to index
    %c0_130 = arith.constant 0 : index
    %c0_131 = arith.constant 0 : index
    %279 = vector.load %arg2[%278, %c0_130, %c0_131] : memref<8x8x512xf32, #tpu.memory_space<vmem>>, vector<1x8x512xf32>
    %280 = vector.shape_cast %279 : vector<1x8x512xf32> to vector<8x512xf32>
    %c0_132 = arith.constant 0 : index
    %c0_133 = arith.constant 0 : index
    %281 = vector.load %arg5[%c0_132, %c0_133] : memref<128x512xf32, #tpu.memory_space<vmem>>, vector<128x512xf32>
    %cst_134 = arith.constant dense<0.000000e+00> : vector<8x512xf32>
    %282 = tpu.matmul %276, %281, %cst_134 {dimension_numbers = #tpu.dot_dimension_numbers<[1], [0], [0], [1], [0, 0, 1, 1], [], []>} : vector<8x128xf32>, vector<128x512xf32>, vector<8x512xf32> -> vector<8x512xf32>
    %283 = arith.addf %280, %282 : vector<8x512xf32>
    %284 = vector.extract_strided_slice %283 {offsets = [0, 0], sizes = [8, 128], strides = [1, 1]} : vector<8x512xf32> to vector<8x128xf32>
    %285 = arith.negf %284 : vector<8x128xf32>
    %286 = math.exp %285 : vector<8x128xf32>
    %cst_135 = arith.constant 1.000000e+00 : f32
    %287 = vector.broadcast %cst_135 : f32 to vector<8x128xf32>
    %288 = arith.addf %287, %286 : vector<8x128xf32>
    %289 = arith.divf %287, %288 : vector<8x128xf32>
    %290 = vector.extract_strided_slice %283 {offsets = [0, 128], sizes = [8, 128], strides = [1, 1]} : vector<8x512xf32> to vector<8x128xf32>
    %291 = arith.negf %290 : vector<8x128xf32>
    %292 = math.exp %291 : vector<8x128xf32>
    %cst_136 = arith.constant 1.000000e+00 : f32
    %293 = vector.broadcast %cst_136 : f32 to vector<8x128xf32>
    %294 = arith.addf %293, %292 : vector<8x128xf32>
    %295 = arith.divf %293, %294 : vector<8x128xf32>
    %296 = vector.extract_strided_slice %283 {offsets = [0, 256], sizes = [8, 128], strides = [1, 1]} : vector<8x512xf32> to vector<8x128xf32>
    %297 = math.tanh %296 : vector<8x128xf32>
    %298 = vector.extract_strided_slice %283 {offsets = [0, 384], sizes = [8, 128], strides = [1, 1]} : vector<8x512xf32> to vector<8x128xf32>
    %299 = arith.negf %298 : vector<8x128xf32>
    %300 = math.exp %299 : vector<8x128xf32>
    %cst_137 = arith.constant 1.000000e+00 : f32
    %301 = vector.broadcast %cst_137 : f32 to vector<8x128xf32>
    %302 = arith.addf %301, %300 : vector<8x128xf32>
    %303 = arith.divf %301, %302 : vector<8x128xf32>
    %304 = arith.mulf %295, %277 : vector<8x128xf32>
    %305 = arith.mulf %289, %297 : vector<8x128xf32>
    %306 = arith.addf %304, %305 : vector<8x128xf32>
    %307 = math.tanh %306 : vector<8x128xf32>
    %308 = arith.mulf %303, %307 : vector<8x128xf32>
    %c0_138 = arith.constant 0 : index
    %c0_139 = arith.constant 0 : index
    %309 = vector.load %arg7[%c0_138, %c0_139] : memref<8x128xf32, #tpu.memory_space<vmem>>, vector<8x128xf32>
    tpu.vector_store %arg7[%c0_138, %c0_139], %306 {strides = array<i32>} : memref<8x128xf32, #tpu.memory_space<vmem>>, vector<8x128xf32>,
    %c0_140 = arith.constant 0 : index
    %c0_141 = arith.constant 0 : index
    %310 = vector.load %arg6[%c0_140, %c0_141] : memref<8x128xf32, #tpu.memory_space<vmem>>, vector<8x128xf32>
    tpu.vector_store %arg6[%c0_140, %c0_141], %308 {strides = array<i32>} : memref<8x128xf32, #tpu.memory_space<vmem>>, vector<8x128xf32>,
    %311 = arith.index_cast %c7_i32 : i32 to index
    %c0_142 = arith.constant 0 : index
    %c0_143 = arith.constant 0 : index
    %312 = vector.load %arg4[%311, %c0_142, %c0_143] : memref<8x8x128xf32, #tpu.memory_space<vmem>>, vector<1x8x128xf32>
    %313 = vector.shape_cast %312 : vector<1x8x128xf32> to vector<8x128xf32>
    %314 = vector.shape_cast %308 : vector<8x128xf32> to vector<1x8x128xf32>
    tpu.vector_store %arg4[%311, %c0_142, %c0_143], %314 {strides = array<i32>} : memref<8x8x128xf32, #tpu.memory_space<vmem>>, vector<1x8x128xf32>,
    %c8_i32 = arith.constant 8 : i32
    return
  }
  func.func @transform_0(%arg0: i32, %arg1: i32) -> (i32, i32, i32) {
    %c0_i32 = arith.constant 0 : i32
    %c0_i32_0 = arith.constant 0 : i32
    return %arg1, %arg0, %c0_i32 : i32, i32, i32
  }
  func.func @transform_2(%arg0: i32, %arg1: i32) -> (i32, i32, i32) {
    %c0_i32 = arith.constant 0 : i32
    %c0_i32_0 = arith.constant 0 : i32
    return %arg1, %arg0, %c0_i32 : i32, i32, i32
  }
}

module attributes {stable_mosaic.version = 11 : i64} {
  func.func @_lstm_seq_head_kernel(%arg0: i32, %arg1: i32, %arg2: memref<8x8x512xf32, #tpu.memory_space<vmem>>, %arg3: memref<128x512xf32, #tpu.memory_space<any>>, %arg4: memref<128x128xf32, #tpu.memory_space<vmem>>, %arg5: memref<1x128xf32, #tpu.memory_space<vmem>>, %arg6: memref<8x128xf32, #tpu.memory_space<vmem>>, %arg7: memref<128x512xf32, #tpu.memory_space<vmem>>, %arg8: memref<8x128xf32, #tpu.memory_space<vmem>>, %arg9: memref<8x128xf32, #tpu.memory_space<vmem>>, %arg10: memref<!tpu.dma_semaphore, #tpu.memory_space<semaphore_mem>>) attributes {dimension_semantics = [#tpu.dimension_semantics<parallel>, #tpu.dimension_semantics<arbitrary>], iteration_bounds = array<i64: 1, 1>, scalar_prefetch = 0 : i64, scratch_operands = 4 : i64, tpu.core_type = #tpu.core_type<tc>, window_params = [{transform_indices = @transform_0, window_bounds = array<i64: 8, 8, 512>}, {}, {pipeline_mode = #tpu.pipeline_mode<synchronous>, transform_indices = @transform_2, window_bounds = array<i64: 128, 128>}, {pipeline_mode = #tpu.pipeline_mode<synchronous>, transform_indices = @transform_3, window_bounds = array<i64: 1, 128>}, {transform_indices = @transform_4, window_bounds = array<i64: 8, 128>}]} {
    %c0_i32 = arith.constant 0 : i32
    %0 = arith.cmpi eq, %arg1, %c0_i32 : i32
    %1 = arith.extui %0 : i1 to i32
    %c0_i32_0 = arith.constant 0 : i32
    %2 = arith.cmpi ne, %1, %c0_i32_0 : i32
    scf.if %2 {
      tpu.enqueue_dma source(%arg3 : memref<128x512xf32, #tpu.memory_space<any>>) target(%arg7 : memref<128x512xf32, #tpu.memory_space<vmem>>) target_semaphore(%arg10 : memref<!tpu.dma_semaphore, #tpu.memory_space<semaphore_mem>>)
      tpu.wait_dma2 semaphore(%arg10 : memref<!tpu.dma_semaphore, #tpu.memory_space<semaphore_mem>>) src(%arg3 : memref<128x512xf32, #tpu.memory_space<any>>) dst(%arg7 : memref<128x512xf32, #tpu.memory_space<vmem>>)
      %cst_130 = arith.constant 0.000000e+00 : f32
      %286 = vector.broadcast %cst_130 : f32 to vector<8x128xf32>
      %c0_131 = arith.constant 0 : index
      %c0_132 = arith.constant 0 : index
      %287 = vector.load %arg8[%c0_131, %c0_132] : memref<8x128xf32, #tpu.memory_space<vmem>>, vector<8x128xf32>
      tpu.vector_store %arg8[%c0_131, %c0_132], %286 {strides = array<i32>} : memref<8x128xf32, #tpu.memory_space<vmem>>, vector<8x128xf32>,
      %cst_133 = arith.constant 0.000000e+00 : f32
      %288 = vector.broadcast %cst_133 : f32 to vector<8x128xf32>
      %c0_134 = arith.constant 0 : index
      %c0_135 = arith.constant 0 : index
      %289 = vector.load %arg9[%c0_134, %c0_135] : memref<8x128xf32, #tpu.memory_space<vmem>>, vector<8x128xf32>
      tpu.vector_store %arg9[%c0_134, %c0_135], %288 {strides = array<i32>} : memref<8x128xf32, #tpu.memory_space<vmem>>, vector<8x128xf32>,
    } else {
    }
    %c0_i32_1 = arith.constant 0 : i32
    %c0 = arith.constant 0 : index
    %c0_2 = arith.constant 0 : index
    %3 = vector.load %arg8[%c0, %c0_2] : memref<8x128xf32, #tpu.memory_space<vmem>>, vector<8x128xf32>
    %c0_3 = arith.constant 0 : index
    %c0_4 = arith.constant 0 : index
    %4 = vector.load %arg9[%c0_3, %c0_4] : memref<8x128xf32, #tpu.memory_space<vmem>>, vector<8x128xf32>
    %5 = arith.index_cast %c0_i32_1 : i32 to index
    %c0_5 = arith.constant 0 : index
    %c0_6 = arith.constant 0 : index
    %6 = vector.load %arg2[%5, %c0_5, %c0_6] : memref<8x8x512xf32, #tpu.memory_space<vmem>>, vector<1x8x512xf32>
    %7 = vector.shape_cast %6 : vector<1x8x512xf32> to vector<8x512xf32>
    %c0_7 = arith.constant 0 : index
    %c0_8 = arith.constant 0 : index
    %8 = vector.load %arg7[%c0_7, %c0_8] : memref<128x512xf32, #tpu.memory_space<vmem>>, vector<128x512xf32>
    %cst = arith.constant dense<0.000000e+00> : vector<8x512xf32>
    %9 = tpu.matmul %3, %8, %cst {dimension_numbers = #tpu.dot_dimension_numbers<[1], [0], [0], [1], [0, 0, 1, 1], [], []>} : vector<8x128xf32>, vector<128x512xf32>, vector<8x512xf32> -> vector<8x512xf32>
    %10 = arith.addf %7, %9 : vector<8x512xf32>
    %11 = vector.extract_strided_slice %10 {offsets = [0, 0], sizes = [8, 128], strides = [1, 1]} : vector<8x512xf32> to vector<8x128xf32>
    %12 = arith.negf %11 : vector<8x128xf32>
    %13 = math.exp %12 : vector<8x128xf32>
    %cst_9 = arith.constant 1.000000e+00 : f32
    %14 = vector.broadcast %cst_9 : f32 to vector<8x128xf32>
    %15 = arith.addf %14, %13 : vector<8x128xf32>
    %16 = arith.divf %14, %15 : vector<8x128xf32>
    %17 = vector.extract_strided_slice %10 {offsets = [0, 128], sizes = [8, 128], strides = [1, 1]} : vector<8x512xf32> to vector<8x128xf32>
    %18 = arith.negf %17 : vector<8x128xf32>
    %19 = math.exp %18 : vector<8x128xf32>
    %cst_10 = arith.constant 1.000000e+00 : f32
    %20 = vector.broadcast %cst_10 : f32 to vector<8x128xf32>
    %21 = arith.addf %20, %19 : vector<8x128xf32>
    %22 = arith.divf %20, %21 : vector<8x128xf32>
    %23 = vector.extract_strided_slice %10 {offsets = [0, 256], sizes = [8, 128], strides = [1, 1]} : vector<8x512xf32> to vector<8x128xf32>
    %24 = math.tanh %23 : vector<8x128xf32>
    %25 = vector.extract_strided_slice %10 {offsets = [0, 384], sizes = [8, 128], strides = [1, 1]} : vector<8x512xf32> to vector<8x128xf32>
    %26 = arith.negf %25 : vector<8x128xf32>
    %27 = math.exp %26 : vector<8x128xf32>
    %cst_11 = arith.constant 1.000000e+00 : f32
    %28 = vector.broadcast %cst_11 : f32 to vector<8x128xf32>
    %29 = arith.addf %28, %27 : vector<8x128xf32>
    %30 = arith.divf %28, %29 : vector<8x128xf32>
    %31 = arith.mulf %22, %4 : vector<8x128xf32>
    %32 = arith.mulf %16, %24 : vector<8x128xf32>
    %33 = arith.addf %31, %32 : vector<8x128xf32>
    %34 = math.tanh %33 : vector<8x128xf32>
    %35 = arith.mulf %30, %34 : vector<8x128xf32>
    %c0_12 = arith.constant 0 : index
    %c0_13 = arith.constant 0 : index
    %36 = vector.load %arg9[%c0_12, %c0_13] : memref<8x128xf32, #tpu.memory_space<vmem>>, vector<8x128xf32>
    tpu.vector_store %arg9[%c0_12, %c0_13], %33 {strides = array<i32>} : memref<8x128xf32, #tpu.memory_space<vmem>>, vector<8x128xf32>,
    %c0_14 = arith.constant 0 : index
    %c0_15 = arith.constant 0 : index
    %37 = vector.load %arg8[%c0_14, %c0_15] : memref<8x128xf32, #tpu.memory_space<vmem>>, vector<8x128xf32>
    tpu.vector_store %arg8[%c0_14, %c0_15], %35 {strides = array<i32>} : memref<8x128xf32, #tpu.memory_space<vmem>>, vector<8x128xf32>,
    %c1_i32 = arith.constant 1 : i32
    %c0_16 = arith.constant 0 : index
    %c0_17 = arith.constant 0 : index
    %38 = vector.load %arg8[%c0_16, %c0_17] : memref<8x128xf32, #tpu.memory_space<vmem>>, vector<8x128xf32>
    %c0_18 = arith.constant 0 : index
    %c0_19 = arith.constant 0 : index
    %39 = vector.load %arg9[%c0_18, %c0_19] : memref<8x128xf32, #tpu.memory_space<vmem>>, vector<8x128xf32>
    %40 = arith.index_cast %c1_i32 : i32 to index
    %c0_20 = arith.constant 0 : index
    %c0_21 = arith.constant 0 : index
    %41 = vector.load %arg2[%40, %c0_20, %c0_21] : memref<8x8x512xf32, #tpu.memory_space<vmem>>, vector<1x8x512xf32>
    %42 = vector.shape_cast %41 : vector<1x8x512xf32> to vector<8x512xf32>
    %c0_22 = arith.constant 0 : index
    %c0_23 = arith.constant 0 : index
    %43 = vector.load %arg7[%c0_22, %c0_23] : memref<128x512xf32, #tpu.memory_space<vmem>>, vector<128x512xf32>
    %cst_24 = arith.constant dense<0.000000e+00> : vector<8x512xf32>
    %44 = tpu.matmul %38, %43, %cst_24 {dimension_numbers = #tpu.dot_dimension_numbers<[1], [0], [0], [1], [0, 0, 1, 1], [], []>} : vector<8x128xf32>, vector<128x512xf32>, vector<8x512xf32> -> vector<8x512xf32>
    %45 = arith.addf %42, %44 : vector<8x512xf32>
    %46 = vector.extract_strided_slice %45 {offsets = [0, 0], sizes = [8, 128], strides = [1, 1]} : vector<8x512xf32> to vector<8x128xf32>
    %47 = arith.negf %46 : vector<8x128xf32>
    %48 = math.exp %47 : vector<8x128xf32>
    %cst_25 = arith.constant 1.000000e+00 : f32
    %49 = vector.broadcast %cst_25 : f32 to vector<8x128xf32>
    %50 = arith.addf %49, %48 : vector<8x128xf32>
    %51 = arith.divf %49, %50 : vector<8x128xf32>
    %52 = vector.extract_strided_slice %45 {offsets = [0, 128], sizes = [8, 128], strides = [1, 1]} : vector<8x512xf32> to vector<8x128xf32>
    %53 = arith.negf %52 : vector<8x128xf32>
    %54 = math.exp %53 : vector<8x128xf32>
    %cst_26 = arith.constant 1.000000e+00 : f32
    %55 = vector.broadcast %cst_26 : f32 to vector<8x128xf32>
    %56 = arith.addf %55, %54 : vector<8x128xf32>
    %57 = arith.divf %55, %56 : vector<8x128xf32>
    %58 = vector.extract_strided_slice %45 {offsets = [0, 256], sizes = [8, 128], strides = [1, 1]} : vector<8x512xf32> to vector<8x128xf32>
    %59 = math.tanh %58 : vector<8x128xf32>
    %60 = vector.extract_strided_slice %45 {offsets = [0, 384], sizes = [8, 128], strides = [1, 1]} : vector<8x512xf32> to vector<8x128xf32>
    %61 = arith.negf %60 : vector<8x128xf32>
    %62 = math.exp %61 : vector<8x128xf32>
    %cst_27 = arith.constant 1.000000e+00 : f32
    %63 = vector.broadcast %cst_27 : f32 to vector<8x128xf32>
    %64 = arith.addf %63, %62 : vector<8x128xf32>
    %65 = arith.divf %63, %64 : vector<8x128xf32>
    %66 = arith.mulf %57, %39 : vector<8x128xf32>
    %67 = arith.mulf %51, %59 : vector<8x128xf32>
    %68 = arith.addf %66, %67 : vector<8x128xf32>
    %69 = math.tanh %68 : vector<8x128xf32>
    %70 = arith.mulf %65, %69 : vector<8x128xf32>
    %c0_28 = arith.constant 0 : index
    %c0_29 = arith.constant 0 : index
    %71 = vector.load %arg9[%c0_28, %c0_29] : memref<8x128xf32, #tpu.memory_space<vmem>>, vector<8x128xf32>
    tpu.vector_store %arg9[%c0_28, %c0_29], %68 {strides = array<i32>} : memref<8x128xf32, #tpu.memory_space<vmem>>, vector<8x128xf32>,
    %c0_30 = arith.constant 0 : index
    %c0_31 = arith.constant 0 : index
    %72 = vector.load %arg8[%c0_30, %c0_31] : memref<8x128xf32, #tpu.memory_space<vmem>>, vector<8x128xf32>
    tpu.vector_store %arg8[%c0_30, %c0_31], %70 {strides = array<i32>} : memref<8x128xf32, #tpu.memory_space<vmem>>, vector<8x128xf32>,
    %c2_i32 = arith.constant 2 : i32
    %c0_32 = arith.constant 0 : index
    %c0_33 = arith.constant 0 : index
    %73 = vector.load %arg8[%c0_32, %c0_33] : memref<8x128xf32, #tpu.memory_space<vmem>>, vector<8x128xf32>
    %c0_34 = arith.constant 0 : index
    %c0_35 = arith.constant 0 : index
    %74 = vector.load %arg9[%c0_34, %c0_35] : memref<8x128xf32, #tpu.memory_space<vmem>>, vector<8x128xf32>
    %75 = arith.index_cast %c2_i32 : i32 to index
    %c0_36 = arith.constant 0 : index
    %c0_37 = arith.constant 0 : index
    %76 = vector.load %arg2[%75, %c0_36, %c0_37] : memref<8x8x512xf32, #tpu.memory_space<vmem>>, vector<1x8x512xf32>
    %77 = vector.shape_cast %76 : vector<1x8x512xf32> to vector<8x512xf32>
    %c0_38 = arith.constant 0 : index
    %c0_39 = arith.constant 0 : index
    %78 = vector.load %arg7[%c0_38, %c0_39] : memref<128x512xf32, #tpu.memory_space<vmem>>, vector<128x512xf32>
    %cst_40 = arith.constant dense<0.000000e+00> : vector<8x512xf32>
    %79 = tpu.matmul %73, %78, %cst_40 {dimension_numbers = #tpu.dot_dimension_numbers<[1], [0], [0], [1], [0, 0, 1, 1], [], []>} : vector<8x128xf32>, vector<128x512xf32>, vector<8x512xf32> -> vector<8x512xf32>
    %80 = arith.addf %77, %79 : vector<8x512xf32>
    %81 = vector.extract_strided_slice %80 {offsets = [0, 0], sizes = [8, 128], strides = [1, 1]} : vector<8x512xf32> to vector<8x128xf32>
    %82 = arith.negf %81 : vector<8x128xf32>
    %83 = math.exp %82 : vector<8x128xf32>
    %cst_41 = arith.constant 1.000000e+00 : f32
    %84 = vector.broadcast %cst_41 : f32 to vector<8x128xf32>
    %85 = arith.addf %84, %83 : vector<8x128xf32>
    %86 = arith.divf %84, %85 : vector<8x128xf32>
    %87 = vector.extract_strided_slice %80 {offsets = [0, 128], sizes = [8, 128], strides = [1, 1]} : vector<8x512xf32> to vector<8x128xf32>
    %88 = arith.negf %87 : vector<8x128xf32>
    %89 = math.exp %88 : vector<8x128xf32>
    %cst_42 = arith.constant 1.000000e+00 : f32
    %90 = vector.broadcast %cst_42 : f32 to vector<8x128xf32>
    %91 = arith.addf %90, %89 : vector<8x128xf32>
    %92 = arith.divf %90, %91 : vector<8x128xf32>
    %93 = vector.extract_strided_slice %80 {offsets = [0, 256], sizes = [8, 128], strides = [1, 1]} : vector<8x512xf32> to vector<8x128xf32>
    %94 = math.tanh %93 : vector<8x128xf32>
    %95 = vector.extract_strided_slice %80 {offsets = [0, 384], sizes = [8, 128], strides = [1, 1]} : vector<8x512xf32> to vector<8x128xf32>
    %96 = arith.negf %95 : vector<8x128xf32>
    %97 = math.exp %96 : vector<8x128xf32>
    %cst_43 = arith.constant 1.000000e+00 : f32
    %98 = vector.broadcast %cst_43 : f32 to vector<8x128xf32>
    %99 = arith.addf %98, %97 : vector<8x128xf32>
    %100 = arith.divf %98, %99 : vector<8x128xf32>
    %101 = arith.mulf %92, %74 : vector<8x128xf32>
    %102 = arith.mulf %86, %94 : vector<8x128xf32>
    %103 = arith.addf %101, %102 : vector<8x128xf32>
    %104 = math.tanh %103 : vector<8x128xf32>
    %105 = arith.mulf %100, %104 : vector<8x128xf32>
    %c0_44 = arith.constant 0 : index
    %c0_45 = arith.constant 0 : index
    %106 = vector.load %arg9[%c0_44, %c0_45] : memref<8x128xf32, #tpu.memory_space<vmem>>, vector<8x128xf32>
    tpu.vector_store %arg9[%c0_44, %c0_45], %103 {strides = array<i32>} : memref<8x128xf32, #tpu.memory_space<vmem>>, vector<8x128xf32>,
    %c0_46 = arith.constant 0 : index
    %c0_47 = arith.constant 0 : index
    %107 = vector.load %arg8[%c0_46, %c0_47] : memref<8x128xf32, #tpu.memory_space<vmem>>, vector<8x128xf32>
    tpu.vector_store %arg8[%c0_46, %c0_47], %105 {strides = array<i32>} : memref<8x128xf32, #tpu.memory_space<vmem>>, vector<8x128xf32>,
    %c3_i32 = arith.constant 3 : i32
    %c0_48 = arith.constant 0 : index
    %c0_49 = arith.constant 0 : index
    %108 = vector.load %arg8[%c0_48, %c0_49] : memref<8x128xf32, #tpu.memory_space<vmem>>, vector<8x128xf32>
    %c0_50 = arith.constant 0 : index
    %c0_51 = arith.constant 0 : index
    %109 = vector.load %arg9[%c0_50, %c0_51] : memref<8x128xf32, #tpu.memory_space<vmem>>, vector<8x128xf32>
    %110 = arith.index_cast %c3_i32 : i32 to index
    %c0_52 = arith.constant 0 : index
    %c0_53 = arith.constant 0 : index
    %111 = vector.load %arg2[%110, %c0_52, %c0_53] : memref<8x8x512xf32, #tpu.memory_space<vmem>>, vector<1x8x512xf32>
    %112 = vector.shape_cast %111 : vector<1x8x512xf32> to vector<8x512xf32>
    %c0_54 = arith.constant 0 : index
    %c0_55 = arith.constant 0 : index
    %113 = vector.load %arg7[%c0_54, %c0_55] : memref<128x512xf32, #tpu.memory_space<vmem>>, vector<128x512xf32>
    %cst_56 = arith.constant dense<0.000000e+00> : vector<8x512xf32>
    %114 = tpu.matmul %108, %113, %cst_56 {dimension_numbers = #tpu.dot_dimension_numbers<[1], [0], [0], [1], [0, 0, 1, 1], [], []>} : vector<8x128xf32>, vector<128x512xf32>, vector<8x512xf32> -> vector<8x512xf32>
    %115 = arith.addf %112, %114 : vector<8x512xf32>
    %116 = vector.extract_strided_slice %115 {offsets = [0, 0], sizes = [8, 128], strides = [1, 1]} : vector<8x512xf32> to vector<8x128xf32>
    %117 = arith.negf %116 : vector<8x128xf32>
    %118 = math.exp %117 : vector<8x128xf32>
    %cst_57 = arith.constant 1.000000e+00 : f32
    %119 = vector.broadcast %cst_57 : f32 to vector<8x128xf32>
    %120 = arith.addf %119, %118 : vector<8x128xf32>
    %121 = arith.divf %119, %120 : vector<8x128xf32>
    %122 = vector.extract_strided_slice %115 {offsets = [0, 128], sizes = [8, 128], strides = [1, 1]} : vector<8x512xf32> to vector<8x128xf32>
    %123 = arith.negf %122 : vector<8x128xf32>
    %124 = math.exp %123 : vector<8x128xf32>
    %cst_58 = arith.constant 1.000000e+00 : f32
    %125 = vector.broadcast %cst_58 : f32 to vector<8x128xf32>
    %126 = arith.addf %125, %124 : vector<8x128xf32>
    %127 = arith.divf %125, %126 : vector<8x128xf32>
    %128 = vector.extract_strided_slice %115 {offsets = [0, 256], sizes = [8, 128], strides = [1, 1]} : vector<8x512xf32> to vector<8x128xf32>
    %129 = math.tanh %128 : vector<8x128xf32>
    %130 = vector.extract_strided_slice %115 {offsets = [0, 384], sizes = [8, 128], strides = [1, 1]} : vector<8x512xf32> to vector<8x128xf32>
    %131 = arith.negf %130 : vector<8x128xf32>
    %132 = math.exp %131 : vector<8x128xf32>
    %cst_59 = arith.constant 1.000000e+00 : f32
    %133 = vector.broadcast %cst_59 : f32 to vector<8x128xf32>
    %134 = arith.addf %133, %132 : vector<8x128xf32>
    %135 = arith.divf %133, %134 : vector<8x128xf32>
    %136 = arith.mulf %127, %109 : vector<8x128xf32>
    %137 = arith.mulf %121, %129 : vector<8x128xf32>
    %138 = arith.addf %136, %137 : vector<8x128xf32>
    %139 = math.tanh %138 : vector<8x128xf32>
    %140 = arith.mulf %135, %139 : vector<8x128xf32>
    %c0_60 = arith.constant 0 : index
    %c0_61 = arith.constant 0 : index
    %141 = vector.load %arg9[%c0_60, %c0_61] : memref<8x128xf32, #tpu.memory_space<vmem>>, vector<8x128xf32>
    tpu.vector_store %arg9[%c0_60, %c0_61], %138 {strides = array<i32>} : memref<8x128xf32, #tpu.memory_space<vmem>>, vector<8x128xf32>,
    %c0_62 = arith.constant 0 : index
    %c0_63 = arith.constant 0 : index
    %142 = vector.load %arg8[%c0_62, %c0_63] : memref<8x128xf32, #tpu.memory_space<vmem>>, vector<8x128xf32>
    tpu.vector_store %arg8[%c0_62, %c0_63], %140 {strides = array<i32>} : memref<8x128xf32, #tpu.memory_space<vmem>>, vector<8x128xf32>,
    %c4_i32 = arith.constant 4 : i32
    %c0_64 = arith.constant 0 : index
    %c0_65 = arith.constant 0 : index
    %143 = vector.load %arg8[%c0_64, %c0_65] : memref<8x128xf32, #tpu.memory_space<vmem>>, vector<8x128xf32>
    %c0_66 = arith.constant 0 : index
    %c0_67 = arith.constant 0 : index
    %144 = vector.load %arg9[%c0_66, %c0_67] : memref<8x128xf32, #tpu.memory_space<vmem>>, vector<8x128xf32>
    %145 = arith.index_cast %c4_i32 : i32 to index
    %c0_68 = arith.constant 0 : index
    %c0_69 = arith.constant 0 : index
    %146 = vector.load %arg2[%145, %c0_68, %c0_69] : memref<8x8x512xf32, #tpu.memory_space<vmem>>, vector<1x8x512xf32>
    %147 = vector.shape_cast %146 : vector<1x8x512xf32> to vector<8x512xf32>
    %c0_70 = arith.constant 0 : index
    %c0_71 = arith.constant 0 : index
    %148 = vector.load %arg7[%c0_70, %c0_71] : memref<128x512xf32, #tpu.memory_space<vmem>>, vector<128x512xf32>
    %cst_72 = arith.constant dense<0.000000e+00> : vector<8x512xf32>
    %149 = tpu.matmul %143, %148, %cst_72 {dimension_numbers = #tpu.dot_dimension_numbers<[1], [0], [0], [1], [0, 0, 1, 1], [], []>} : vector<8x128xf32>, vector<128x512xf32>, vector<8x512xf32> -> vector<8x512xf32>
    %150 = arith.addf %147, %149 : vector<8x512xf32>
    %151 = vector.extract_strided_slice %150 {offsets = [0, 0], sizes = [8, 128], strides = [1, 1]} : vector<8x512xf32> to vector<8x128xf32>
    %152 = arith.negf %151 : vector<8x128xf32>
    %153 = math.exp %152 : vector<8x128xf32>
    %cst_73 = arith.constant 1.000000e+00 : f32
    %154 = vector.broadcast %cst_73 : f32 to vector<8x128xf32>
    %155 = arith.addf %154, %153 : vector<8x128xf32>
    %156 = arith.divf %154, %155 : vector<8x128xf32>
    %157 = vector.extract_strided_slice %150 {offsets = [0, 128], sizes = [8, 128], strides = [1, 1]} : vector<8x512xf32> to vector<8x128xf32>
    %158 = arith.negf %157 : vector<8x128xf32>
    %159 = math.exp %158 : vector<8x128xf32>
    %cst_74 = arith.constant 1.000000e+00 : f32
    %160 = vector.broadcast %cst_74 : f32 to vector<8x128xf32>
    %161 = arith.addf %160, %159 : vector<8x128xf32>
    %162 = arith.divf %160, %161 : vector<8x128xf32>
    %163 = vector.extract_strided_slice %150 {offsets = [0, 256], sizes = [8, 128], strides = [1, 1]} : vector<8x512xf32> to vector<8x128xf32>
    %164 = math.tanh %163 : vector<8x128xf32>
    %165 = vector.extract_strided_slice %150 {offsets = [0, 384], sizes = [8, 128], strides = [1, 1]} : vector<8x512xf32> to vector<8x128xf32>
    %166 = arith.negf %165 : vector<8x128xf32>
    %167 = math.exp %166 : vector<8x128xf32>
    %cst_75 = arith.constant 1.000000e+00 : f32
    %168 = vector.broadcast %cst_75 : f32 to vector<8x128xf32>
    %169 = arith.addf %168, %167 : vector<8x128xf32>
    %170 = arith.divf %168, %169 : vector<8x128xf32>
    %171 = arith.mulf %162, %144 : vector<8x128xf32>
    %172 = arith.mulf %156, %164 : vector<8x128xf32>
    %173 = arith.addf %171, %172 : vector<8x128xf32>
    %174 = math.tanh %173 : vector<8x128xf32>
    %175 = arith.mulf %170, %174 : vector<8x128xf32>
    %c0_76 = arith.constant 0 : index
    %c0_77 = arith.constant 0 : index
    %176 = vector.load %arg9[%c0_76, %c0_77] : memref<8x128xf32, #tpu.memory_space<vmem>>, vector<8x128xf32>
    tpu.vector_store %arg9[%c0_76, %c0_77], %173 {strides = array<i32>} : memref<8x128xf32, #tpu.memory_space<vmem>>, vector<8x128xf32>,
    %c0_78 = arith.constant 0 : index
    %c0_79 = arith.constant 0 : index
    %177 = vector.load %arg8[%c0_78, %c0_79] : memref<8x128xf32, #tpu.memory_space<vmem>>, vector<8x128xf32>
    tpu.vector_store %arg8[%c0_78, %c0_79], %175 {strides = array<i32>} : memref<8x128xf32, #tpu.memory_space<vmem>>, vector<8x128xf32>,
    %c5_i32 = arith.constant 5 : i32
    %c0_80 = arith.constant 0 : index
    %c0_81 = arith.constant 0 : index
    %178 = vector.load %arg8[%c0_80, %c0_81] : memref<8x128xf32, #tpu.memory_space<vmem>>, vector<8x128xf32>
    %c0_82 = arith.constant 0 : index
    %c0_83 = arith.constant 0 : index
    %179 = vector.load %arg9[%c0_82, %c0_83] : memref<8x128xf32, #tpu.memory_space<vmem>>, vector<8x128xf32>
    %180 = arith.index_cast %c5_i32 : i32 to index
    %c0_84 = arith.constant 0 : index
    %c0_85 = arith.constant 0 : index
    %181 = vector.load %arg2[%180, %c0_84, %c0_85] : memref<8x8x512xf32, #tpu.memory_space<vmem>>, vector<1x8x512xf32>
    %182 = vector.shape_cast %181 : vector<1x8x512xf32> to vector<8x512xf32>
    %c0_86 = arith.constant 0 : index
    %c0_87 = arith.constant 0 : index
    %183 = vector.load %arg7[%c0_86, %c0_87] : memref<128x512xf32, #tpu.memory_space<vmem>>, vector<128x512xf32>
    %cst_88 = arith.constant dense<0.000000e+00> : vector<8x512xf32>
    %184 = tpu.matmul %178, %183, %cst_88 {dimension_numbers = #tpu.dot_dimension_numbers<[1], [0], [0], [1], [0, 0, 1, 1], [], []>} : vector<8x128xf32>, vector<128x512xf32>, vector<8x512xf32> -> vector<8x512xf32>
    %185 = arith.addf %182, %184 : vector<8x512xf32>
    %186 = vector.extract_strided_slice %185 {offsets = [0, 0], sizes = [8, 128], strides = [1, 1]} : vector<8x512xf32> to vector<8x128xf32>
    %187 = arith.negf %186 : vector<8x128xf32>
    %188 = math.exp %187 : vector<8x128xf32>
    %cst_89 = arith.constant 1.000000e+00 : f32
    %189 = vector.broadcast %cst_89 : f32 to vector<8x128xf32>
    %190 = arith.addf %189, %188 : vector<8x128xf32>
    %191 = arith.divf %189, %190 : vector<8x128xf32>
    %192 = vector.extract_strided_slice %185 {offsets = [0, 128], sizes = [8, 128], strides = [1, 1]} : vector<8x512xf32> to vector<8x128xf32>
    %193 = arith.negf %192 : vector<8x128xf32>
    %194 = math.exp %193 : vector<8x128xf32>
    %cst_90 = arith.constant 1.000000e+00 : f32
    %195 = vector.broadcast %cst_90 : f32 to vector<8x128xf32>
    %196 = arith.addf %195, %194 : vector<8x128xf32>
    %197 = arith.divf %195, %196 : vector<8x128xf32>
    %198 = vector.extract_strided_slice %185 {offsets = [0, 256], sizes = [8, 128], strides = [1, 1]} : vector<8x512xf32> to vector<8x128xf32>
    %199 = math.tanh %198 : vector<8x128xf32>
    %200 = vector.extract_strided_slice %185 {offsets = [0, 384], sizes = [8, 128], strides = [1, 1]} : vector<8x512xf32> to vector<8x128xf32>
    %201 = arith.negf %200 : vector<8x128xf32>
    %202 = math.exp %201 : vector<8x128xf32>
    %cst_91 = arith.constant 1.000000e+00 : f32
    %203 = vector.broadcast %cst_91 : f32 to vector<8x128xf32>
    %204 = arith.addf %203, %202 : vector<8x128xf32>
    %205 = arith.divf %203, %204 : vector<8x128xf32>
    %206 = arith.mulf %197, %179 : vector<8x128xf32>
    %207 = arith.mulf %191, %199 : vector<8x128xf32>
    %208 = arith.addf %206, %207 : vector<8x128xf32>
    %209 = math.tanh %208 : vector<8x128xf32>
    %210 = arith.mulf %205, %209 : vector<8x128xf32>
    %c0_92 = arith.constant 0 : index
    %c0_93 = arith.constant 0 : index
    %211 = vector.load %arg9[%c0_92, %c0_93] : memref<8x128xf32, #tpu.memory_space<vmem>>, vector<8x128xf32>
    tpu.vector_store %arg9[%c0_92, %c0_93], %208 {strides = array<i32>} : memref<8x128xf32, #tpu.memory_space<vmem>>, vector<8x128xf32>,
    %c0_94 = arith.constant 0 : index
    %c0_95 = arith.constant 0 : index
    %212 = vector.load %arg8[%c0_94, %c0_95] : memref<8x128xf32, #tpu.memory_space<vmem>>, vector<8x128xf32>
    tpu.vector_store %arg8[%c0_94, %c0_95], %210 {strides = array<i32>} : memref<8x128xf32, #tpu.memory_space<vmem>>, vector<8x128xf32>,
    %c6_i32 = arith.constant 6 : i32
    %c0_96 = arith.constant 0 : index
    %c0_97 = arith.constant 0 : index
    %213 = vector.load %arg8[%c0_96, %c0_97] : memref<8x128xf32, #tpu.memory_space<vmem>>, vector<8x128xf32>
    %c0_98 = arith.constant 0 : index
    %c0_99 = arith.constant 0 : index
    %214 = vector.load %arg9[%c0_98, %c0_99] : memref<8x128xf32, #tpu.memory_space<vmem>>, vector<8x128xf32>
    %215 = arith.index_cast %c6_i32 : i32 to index
    %c0_100 = arith.constant 0 : index
    %c0_101 = arith.constant 0 : index
    %216 = vector.load %arg2[%215, %c0_100, %c0_101] : memref<8x8x512xf32, #tpu.memory_space<vmem>>, vector<1x8x512xf32>
    %217 = vector.shape_cast %216 : vector<1x8x512xf32> to vector<8x512xf32>
    %c0_102 = arith.constant 0 : index
    %c0_103 = arith.constant 0 : index
    %218 = vector.load %arg7[%c0_102, %c0_103] : memref<128x512xf32, #tpu.memory_space<vmem>>, vector<128x512xf32>
    %cst_104 = arith.constant dense<0.000000e+00> : vector<8x512xf32>
    %219 = tpu.matmul %213, %218, %cst_104 {dimension_numbers = #tpu.dot_dimension_numbers<[1], [0], [0], [1], [0, 0, 1, 1], [], []>} : vector<8x128xf32>, vector<128x512xf32>, vector<8x512xf32> -> vector<8x512xf32>
    %220 = arith.addf %217, %219 : vector<8x512xf32>
    %221 = vector.extract_strided_slice %220 {offsets = [0, 0], sizes = [8, 128], strides = [1, 1]} : vector<8x512xf32> to vector<8x128xf32>
    %222 = arith.negf %221 : vector<8x128xf32>
    %223 = math.exp %222 : vector<8x128xf32>
    %cst_105 = arith.constant 1.000000e+00 : f32
    %224 = vector.broadcast %cst_105 : f32 to vector<8x128xf32>
    %225 = arith.addf %224, %223 : vector<8x128xf32>
    %226 = arith.divf %224, %225 : vector<8x128xf32>
    %227 = vector.extract_strided_slice %220 {offsets = [0, 128], sizes = [8, 128], strides = [1, 1]} : vector<8x512xf32> to vector<8x128xf32>
    %228 = arith.negf %227 : vector<8x128xf32>
    %229 = math.exp %228 : vector<8x128xf32>
    %cst_106 = arith.constant 1.000000e+00 : f32
    %230 = vector.broadcast %cst_106 : f32 to vector<8x128xf32>
    %231 = arith.addf %230, %229 : vector<8x128xf32>
    %232 = arith.divf %230, %231 : vector<8x128xf32>
    %233 = vector.extract_strided_slice %220 {offsets = [0, 256], sizes = [8, 128], strides = [1, 1]} : vector<8x512xf32> to vector<8x128xf32>
    %234 = math.tanh %233 : vector<8x128xf32>
    %235 = vector.extract_strided_slice %220 {offsets = [0, 384], sizes = [8, 128], strides = [1, 1]} : vector<8x512xf32> to vector<8x128xf32>
    %236 = arith.negf %235 : vector<8x128xf32>
    %237 = math.exp %236 : vector<8x128xf32>
    %cst_107 = arith.constant 1.000000e+00 : f32
    %238 = vector.broadcast %cst_107 : f32 to vector<8x128xf32>
    %239 = arith.addf %238, %237 : vector<8x128xf32>
    %240 = arith.divf %238, %239 : vector<8x128xf32>
    %241 = arith.mulf %232, %214 : vector<8x128xf32>
    %242 = arith.mulf %226, %234 : vector<8x128xf32>
    %243 = arith.addf %241, %242 : vector<8x128xf32>
    %244 = math.tanh %243 : vector<8x128xf32>
    %245 = arith.mulf %240, %244 : vector<8x128xf32>
    %c0_108 = arith.constant 0 : index
    %c0_109 = arith.constant 0 : index
    %246 = vector.load %arg9[%c0_108, %c0_109] : memref<8x128xf32, #tpu.memory_space<vmem>>, vector<8x128xf32>
    tpu.vector_store %arg9[%c0_108, %c0_109], %243 {strides = array<i32>} : memref<8x128xf32, #tpu.memory_space<vmem>>, vector<8x128xf32>,
    %c0_110 = arith.constant 0 : index
    %c0_111 = arith.constant 0 : index
    %247 = vector.load %arg8[%c0_110, %c0_111] : memref<8x128xf32, #tpu.memory_space<vmem>>, vector<8x128xf32>
    tpu.vector_store %arg8[%c0_110, %c0_111], %245 {strides = array<i32>} : memref<8x128xf32, #tpu.memory_space<vmem>>, vector<8x128xf32>,
    %c7_i32 = arith.constant 7 : i32
    %c0_112 = arith.constant 0 : index
    %c0_113 = arith.constant 0 : index
    %248 = vector.load %arg8[%c0_112, %c0_113] : memref<8x128xf32, #tpu.memory_space<vmem>>, vector<8x128xf32>
    %c0_114 = arith.constant 0 : index
    %c0_115 = arith.constant 0 : index
    %249 = vector.load %arg9[%c0_114, %c0_115] : memref<8x128xf32, #tpu.memory_space<vmem>>, vector<8x128xf32>
    %250 = arith.index_cast %c7_i32 : i32 to index
    %c0_116 = arith.constant 0 : index
    %c0_117 = arith.constant 0 : index
    %251 = vector.load %arg2[%250, %c0_116, %c0_117] : memref<8x8x512xf32, #tpu.memory_space<vmem>>, vector<1x8x512xf32>
    %252 = vector.shape_cast %251 : vector<1x8x512xf32> to vector<8x512xf32>
    %c0_118 = arith.constant 0 : index
    %c0_119 = arith.constant 0 : index
    %253 = vector.load %arg7[%c0_118, %c0_119] : memref<128x512xf32, #tpu.memory_space<vmem>>, vector<128x512xf32>
    %cst_120 = arith.constant dense<0.000000e+00> : vector<8x512xf32>
    %254 = tpu.matmul %248, %253, %cst_120 {dimension_numbers = #tpu.dot_dimension_numbers<[1], [0], [0], [1], [0, 0, 1, 1], [], []>} : vector<8x128xf32>, vector<128x512xf32>, vector<8x512xf32> -> vector<8x512xf32>
    %255 = arith.addf %252, %254 : vector<8x512xf32>
    %256 = vector.extract_strided_slice %255 {offsets = [0, 0], sizes = [8, 128], strides = [1, 1]} : vector<8x512xf32> to vector<8x128xf32>
    %257 = arith.negf %256 : vector<8x128xf32>
    %258 = math.exp %257 : vector<8x128xf32>
    %cst_121 = arith.constant 1.000000e+00 : f32
    %259 = vector.broadcast %cst_121 : f32 to vector<8x128xf32>
    %260 = arith.addf %259, %258 : vector<8x128xf32>
    %261 = arith.divf %259, %260 : vector<8x128xf32>
    %262 = vector.extract_strided_slice %255 {offsets = [0, 128], sizes = [8, 128], strides = [1, 1]} : vector<8x512xf32> to vector<8x128xf32>
    %263 = arith.negf %262 : vector<8x128xf32>
    %264 = math.exp %263 : vector<8x128xf32>
    %cst_122 = arith.constant 1.000000e+00 : f32
    %265 = vector.broadcast %cst_122 : f32 to vector<8x128xf32>
    %266 = arith.addf %265, %264 : vector<8x128xf32>
    %267 = arith.divf %265, %266 : vector<8x128xf32>
    %268 = vector.extract_strided_slice %255 {offsets = [0, 256], sizes = [8, 128], strides = [1, 1]} : vector<8x512xf32> to vector<8x128xf32>
    %269 = math.tanh %268 : vector<8x128xf32>
    %270 = vector.extract_strided_slice %255 {offsets = [0, 384], sizes = [8, 128], strides = [1, 1]} : vector<8x512xf32> to vector<8x128xf32>
    %271 = arith.negf %270 : vector<8x128xf32>
    %272 = math.exp %271 : vector<8x128xf32>
    %cst_123 = arith.constant 1.000000e+00 : f32
    %273 = vector.broadcast %cst_123 : f32 to vector<8x128xf32>
    %274 = arith.addf %273, %272 : vector<8x128xf32>
    %275 = arith.divf %273, %274 : vector<8x128xf32>
    %276 = arith.mulf %267, %249 : vector<8x128xf32>
    %277 = arith.mulf %261, %269 : vector<8x128xf32>
    %278 = arith.addf %276, %277 : vector<8x128xf32>
    %279 = math.tanh %278 : vector<8x128xf32>
    %280 = arith.mulf %275, %279 : vector<8x128xf32>
    %c0_124 = arith.constant 0 : index
    %c0_125 = arith.constant 0 : index
    %281 = vector.load %arg9[%c0_124, %c0_125] : memref<8x128xf32, #tpu.memory_space<vmem>>, vector<8x128xf32>
    tpu.vector_store %arg9[%c0_124, %c0_125], %278 {strides = array<i32>} : memref<8x128xf32, #tpu.memory_space<vmem>>, vector<8x128xf32>,
    %c0_126 = arith.constant 0 : index
    %c0_127 = arith.constant 0 : index
    %282 = vector.load %arg8[%c0_126, %c0_127] : memref<8x128xf32, #tpu.memory_space<vmem>>, vector<8x128xf32>
    tpu.vector_store %arg8[%c0_126, %c0_127], %280 {strides = array<i32>} : memref<8x128xf32, #tpu.memory_space<vmem>>, vector<8x128xf32>,
    %c8_i32 = arith.constant 8 : i32
    %c0_i32_128 = arith.constant 0 : i32
    %283 = arith.cmpi eq, %arg1, %c0_i32_128 : i32
    %284 = arith.extui %283 : i1 to i32
    %c0_i32_129 = arith.constant 0 : i32
    %285 = arith.cmpi ne, %284, %c0_i32_129 : i32
    scf.if %285 {
      %c0_130 = arith.constant 0 : index
      %c0_131 = arith.constant 0 : index
      %286 = vector.load %arg8[%c0_130, %c0_131] : memref<8x128xf32, #tpu.memory_space<vmem>>, vector<8x128xf32>
      %c0_132 = arith.constant 0 : index
      %c0_133 = arith.constant 0 : index
      %287 = vector.load %arg4[%c0_132, %c0_133] : memref<128x128xf32, #tpu.memory_space<vmem>>, vector<128x128xf32>
      %cst_134 = arith.constant dense<0.000000e+00> : vector<8x128xf32>
      %288 = tpu.matmul %286, %287, %cst_134 {dimension_numbers = #tpu.dot_dimension_numbers<[1], [0], [0], [1], [0, 0, 1, 1], [], []>} : vector<8x128xf32>, vector<128x128xf32>, vector<8x128xf32> -> vector<8x128xf32>
      %c0_135 = arith.constant 0 : index
      %c0_136 = arith.constant 0 : index
      %289 = vector.load %arg5[%c0_135, %c0_136] : memref<1x128xf32, #tpu.memory_space<vmem>>, vector<1x128xf32>
      %290 = vector.broadcast %289 : vector<1x128xf32> to vector<8x128xf32>
      %291 = arith.addf %288, %290 : vector<8x128xf32>
      %292 = arith.negf %291 : vector<8x128xf32>
      %293 = math.exp %292 : vector<8x128xf32>
      %cst_137 = arith.constant 1.000000e+00 : f32
      %294 = vector.broadcast %cst_137 : f32 to vector<8x128xf32>
      %295 = arith.addf %294, %293 : vector<8x128xf32>
      %296 = arith.divf %294, %295 : vector<8x128xf32>
      %c0_138 = arith.constant 0 : index
      %c0_139 = arith.constant 0 : index
      %297 = vector.load %arg6[%c0_138, %c0_139] : memref<8x128xf32, #tpu.memory_space<vmem>>, vector<8x128xf32>
      tpu.vector_store %arg6[%c0_138, %c0_139], %296 {strides = array<i32>} : memref<8x128xf32, #tpu.memory_space<vmem>>, vector<8x128xf32>,
    } else {
    }
    return
  }
  func.func @transform_0(%arg0: i32, %arg1: i32) -> (i32, i32, i32) {
    %c0_i32 = arith.constant 0 : i32
    %c0_i32_0 = arith.constant 0 : i32
    return %arg1, %arg0, %c0_i32 : i32, i32, i32
  }
  func.func @transform_2(%arg0: i32, %arg1: i32) -> (i32, i32) {
    %c0_i32 = arith.constant 0 : i32
    %c0_i32_0 = arith.constant 0 : i32
    %c0_i32_1 = arith.constant 0 : i32
    return %c0_i32, %c0_i32_0 : i32, i32
  }
  func.func @transform_3(%arg0: i32, %arg1: i32) -> (i32, i32) {
    %c0_i32 = arith.constant 0 : i32
    %c0_i32_0 = arith.constant 0 : i32
    %c0_i32_1 = arith.constant 0 : i32
    return %c0_i32, %c0_i32_0 : i32, i32
  }
  func.func @transform_4(%arg0: i32, %arg1: i32) -> (i32, i32) {
    %c0_i32 = arith.constant 0 : i32
    %c0_i32_0 = arith.constant 0 : i32
    return %arg0, %c0_i32 : i32, i32
  }
}

</mosaic_0001>

<bundles_post_ra>
// kernel: lstm_model_forward.4
= control target key start
LH: loop header
LB: loop body
LE: loop exit
PB: predicated region body
PF: predicated region fallthrough
CT: control target
= control target key end

     0   :  { %v435_v3 = vmov 0.0   ;;  %s827_s1 = inlined_call_operand.vmem [shape: f32[128,512], index: 1, kind: input, shape index: {}]   ;;  %s828_s0 = inlined_call_operand.vmem [shape: f32[8,8,128], index: 0, kind: input, shape index: {}]   ;;  %s829_s2 = inlined_call_operand.vmem [shape: f32[1,512], index: 2, kind: input, shape index: {}]   ;;  %s830_s3 = inlined_call_operand.vmem [shape: f32[8,8,512], index: 3, kind: output, shape index: {}]  }
   0x1   :  { %v23_v0 = vld [vmem:[%s827_s1 + $0x8] sm:$0xff]  ;;  %v25_v2 = vld [vmem:[%s827_s1 + $0x18] sm:$0xff]  ;;  %172 = vmatprep.mubr.f32.mxu0 %v435_v3  ;;  %285 = vmatprep.mubr.f32.mxu1 %v435_v3  ;;  %v22_v6 = vld [vmem:[%s827_s1] sm:$0xff] }
   0x2   :  { %v27_v1 = vld [vmem:[%s827_s1 + $0x28] sm:$0xff]  ;;  %v29_v5 = vld [vmem:[%s827_s1 + $0x38] sm:$0xff]  ;;  %v26_v7 = vld [vmem:[%s827_s1 + $0x20] sm:$0xff] }
   0x3   :  { %v370_v4 = vpack.c.bf16 %v27_v1, %v23_v0  ;;  %v402_v8 = vpack.c.bf16 %v29_v5, %v25_v2  ;;  %v372_v9 = vpack.c.bf16 %v26_v7, %v22_v6  ;;  %v24_v10 = vld [vmem:[%s827_s1 + $0x10] sm:$0xff]  ;;  %v31_v12 = vld [vmem:[%s827_s1 + $0x48] sm:$0xff]  ;;  %v33_v15 = vld [vmem:[%s827_s1 + $0x58] sm:$0xff] }
   0x4   :  { %v28_v11 = vld [vmem:[%s827_s1 + $0x30] sm:$0xff]  ;;  %v35_v14 = vld [vmem:[%s827_s1 + $0x68] sm:$0xff]  ;;  %v37_v16 = vld [vmem:[%s827_s1 + $0x78] sm:$0xff] }
   0x5   :  { %371 = vmatprep.subr.bf16.mxu0 %v370_v4  ;;  %v404_v13 = vpack.c.bf16 %v28_v11, %v24_v10  ;;  %403 = vmatprep.subr.bf16.mxu1 %v402_v8  ;;  %v374_v17 = vpack.c.bf16 %v35_v14, %v31_v12  ;;  %v406_v18 = vpack.c.bf16 %v37_v16, %v33_v15  ;;  %v30_v19 = vld [vmem:[%s827_s1 + $0x40] sm:$0xff]  ;;  %v32_v21 = vld [vmem:[%s827_s1 + $0x50] sm:$0xff]  ;;  %v39_v24 = vld [vmem:[%s827_s1 + $0x88] sm:$0xff] }
   0x6   :  { %373 = vmatpush1.bf16.msra.mxu0 %v372_v9  ;;  %v34_v20 = vld [vmem:[%s827_s1 + $0x60] sm:$0xff]  ;;  %v36_v23 = vld [vmem:[%s827_s1 + $0x70] sm:$0xff]  ;;  %v43_v25 = vld [vmem:[%s827_s1 + $0xa8] sm:$0xff] }
   0x7   :  { %405 = vmatpush1.bf16.msra.mxu1 %v404_v13  ;;  %v376_v22 = vpack.c.bf16 %v34_v20, %v30_v19  ;;  %375 = vmatprep.subr.bf16.mxu0 %v374_v17  ;;  %v408_v26 = vpack.c.bf16 %v36_v23, %v32_v21  ;;  %v378_v27 = vpack.c.bf16 %v43_v25, %v39_v24  ;;  %v41_v28 = vld [vmem:[%s827_s1 + $0x98] sm:$0xff]  ;;  %v38_v30 = vld [vmem:[%s827_s1 + $0x80] sm:$0xff]  ;;  %v40_v33 = vld [vmem:[%s827_s1 + $0x90] sm:$0xff] }
   0x8   :  { %407 = vmatprep.subr.bf16.mxu1 %v406_v18  ;;  %v45_v29 = vld [vmem:[%s827_s1 + $0xb8] sm:$0xff]  ;;  %v42_v32 = vld [vmem:[%s827_s1 + $0xa0] sm:$0xff]  ;;  %v44_v34 = vld [vmem:[%s827_s1 + $0xb0] sm:$0xff] }
   0x9   :  { %v410_v31 = vpack.c.bf16 %v45_v29, %v41_v28  ;;  %v380_v35 = vpack.c.bf16 %v42_v32, %v38_v30  ;;  %v47_v36 = vld [vmem:[%s827_s1 + $0xc8] sm:$0xff]  ;;  %v49_v38 = vld [vmem:[%s827_s1 + $0xd8] sm:$0xff]  ;;  %v412_v39 = vpack.c.bf16 %v44_v34, %v40_v33  ;;  %v46_v42 = vld [vmem:[%s827_s1 + $0xc0] sm:$0xff] }
   0xa   :  { %377 = vmatpush1.bf16.msra.mxu0 %v376_v22  ;;  %v51_v37 = vld [vmem:[%s827_s1 + $0xe8] sm:$0xff]  ;;  %v53_v41 = vld [vmem:[%s827_s1 + $0xf8] sm:$0xff]  ;;  %v50_v43 = vld [vmem:[%s827_s1 + $0xe0] sm:$0xff] }
   0xb   :  { %409 = vmatpush1.bf16.msra.mxu1 %v408_v26  ;;  %379 = vmatprep.subr.bf16.mxu0 %v378_v27  ;;  %v382_v40 = vpack.c.bf16 %v51_v37, %v47_v36  ;;  %v414_v44 = vpack.c.bf16 %v53_v41, %v49_v38  ;;  %v48_v45 = vld [vmem:[%s827_s1 + $0xd0] sm:$0xff]  ;;  %v55_v47 = vld [vmem:[%s827_s1 + $0x108] sm:$0xff]  ;;  %v57_v49 = vld [vmem:[%s827_s1 + $0x118] sm:$0xff]  ;;  %v384_v51 = vpack.c.bf16 %v50_v43, %v46_v42  ;;  %v88_v42 = vlaneseq }
   0xc   :  { %411 = vmatprep.subr.bf16.mxu1 %v410_v31  ;;  %v52_v46 = vld [vmem:[%s827_s1 + $0xf0] sm:$0xff]  ;;  %v59_v48 = vld [vmem:[%s827_s1 + $0x128] sm:$0xff]  ;;  %v61_v50 = vld [vmem:[%s827_s1 + $0x138] sm:$0xff] }
   0xd   :  { %v416_v52 = vpack.c.bf16 %v52_v46, %v48_v45  ;;  %v386_v53 = vpack.c.bf16 %v59_v48, %v55_v47  ;;  %v54_v54 = vld [vmem:[%s827_s1 + $0x100] sm:$0xff]  ;;  %v56_v56 = vld [vmem:[%s827_s1 + $0x110] sm:$0xff]  ;;  %v418_v57 = vpack.c.bf16 %v61_v50, %v57_v49  ;;  %v63_v59 = vld [vmem:[%s827_s1 + $0x148] sm:$0xff]  ;;  %v89_v43 = vshrl.u32 %v88_v42, 7 }
   0xe   :  { %381 = vmatpush1.bf16.msra.mxu0 %v380_v35  ;;  %v58_v55 = vld [vmem:[%s827_s1 + $0x120] sm:$0xff]  ;;  %v60_v58 = vld [vmem:[%s827_s1 + $0x130] sm:$0xff]  ;;  %v67_v60 = vld [vmem:[%s827_s1 + $0x168] sm:$0xff] }
   0xf   :  { %413 = vmatpush1.bf16.msra.mxu1 %v412_v39  ;;  %383 = vmatprep.subr.bf16.mxu0 %v382_v40  ;;  %v65_v61 = vld [vmem:[%s827_s1 + $0x158] sm:$0xff]  ;;  %v388_v63 = vpack.c.bf16 %v58_v55, %v54_v54  ;;  %v420_v0 = vpack.c.bf16 %v60_v58, %v56_v56  ;;  %v390_v1 = vpack.c.bf16 %v67_v60, %v63_v59  ;;  %v62_v2 = vld [vmem:[%s827_s1 + $0x140] sm:$0xff]  ;;  %v64_v5 = vld [vmem:[%s827_s1 + $0x150] sm:$0xff]  ;;  %v98_v46 = vsub.s32 2, %v89_v43 }
  0x10   :  { %415 = vmatprep.subr.bf16.mxu1 %v414_v44  ;;  %v69_v62 = vld [vmem:[%s827_s1 + $0x178] sm:$0xff]  ;;  %v66_v4 = vld [vmem:[%s827_s1 + $0x160] sm:$0xff]  ;;  %v68_v7 = vld [vmem:[%s827_s1 + $0x170] sm:$0xff]  ;;  %v90_v44 = vsub.s32 0, %v89_v43  ;;  %v94_v47 = vsub.s32 1, %v89_v43  ;;  %v102_v48 = vsub.s32 3, %v89_v43 }
  0x11   :  { %v422_v6 = vpack.c.bf16 %v69_v62, %v65_v61  ;;  %v71_v8 = vld [vmem:[%s827_s1 + $0x188] sm:$0xff]  ;;  %v73_v10 = vld [vmem:[%s827_s1 + $0x198] sm:$0xff]  ;;  %v392_v12 = vpack.c.bf16 %v66_v4, %v62_v2  ;;  %v424_v13 = vpack.c.bf16 %v68_v7, %v64_v5  ;;  %v70_v15 = vld [vmem:[%s827_s1 + $0x180] sm:$0xff] }
  0x12   :  { %385 = vmatpush1.bf16.msra.mxu0 %v384_v51  ;;  %v75_v9 = vld [vmem:[%s827_s1 + $0x1a8] sm:$0xff]  ;;  %v77_v11 = vld [vmem:[%s827_s1 + $0x1b8] sm:$0xff]  ;;  %v74_v16 = vld [vmem:[%s827_s1 + $0x1a0] sm:$0xff] }
  0x13   :  { %417 = vmatpush1.bf16.msra.mxu1 %v416_v52  ;;  %387 = vmatprep.subr.bf16.mxu0 %v386_v53  ;;  %v394_v14 = vpack.c.bf16 %v75_v9, %v71_v8  ;;  %v72_v17 = vld [vmem:[%s827_s1 + $0x190] sm:$0xff]  ;;  %v426_v18 = vpack.c.bf16 %v77_v11, %v73_v10  ;;  %v79_v20 = vld [vmem:[%s827_s1 + $0x1c8] sm:$0xff]  ;;  %v81_v22 = vld [vmem:[%s827_s1 + $0x1d8] sm:$0xff]  ;;  %v396_v24 = vpack.c.bf16 %v74_v16, %v70_v15 }
  0x14   :  { %419 = vmatprep.subr.bf16.mxu1 %v418_v57  ;;  %v76_v19 = vld [vmem:[%s827_s1 + $0x1b0] sm:$0xff]  ;;  %v83_v21 = vld [vmem:[%s827_s1 + $0x1e8] sm:$0xff]  ;;  %v85_v23 = vld [vmem:[%s827_s1 + $0x1f8] sm:$0xff] }
  0x15   :  { %v428_v25 = vpack.c.bf16 %v76_v19, %v72_v17  ;;  %v398_v26 = vpack.c.bf16 %v83_v21, %v79_v20  ;;  %v78_v27 = vld [vmem:[%s827_s1 + $0x1c0] sm:$0xff]  ;;  %v430_v29 = vpack.c.bf16 %v85_v23, %v81_v22  ;;  %v80_v30 = vld [vmem:[%s827_s1 + $0x1d0] sm:$0xff]  ;;  %v15_v35 = vld [vmem:[%s828_s0 + $0x8] sm:$0xff] }
  0x16   :  { %389 = vmatpush1.bf16.msra.mxu0 %v388_v63  ;;  %v82_v28 = vld [vmem:[%s827_s1 + $0x1e0] sm:$0xff]  ;;  %v84_v31 = vld [vmem:[%s827_s1 + $0x1f0] sm:$0xff]  ;;  %v17_v37 = vld [vmem:[%s828_s0 + $0x18] sm:$0xff] }
  0x17   :  { %421 = vmatpush1.bf16.msra.mxu1 %v420_v0  ;;  %391 = vmatprep.subr.bf16.mxu0 %v390_v1  ;;  %v400_v32 = vpack.c.bf16 %v82_v28, %v78_v27  ;;  %v432_v33 = vpack.c.bf16 %v84_v31, %v80_v30  ;;  %v14_v34 = vld [vmem:[%s828_s0] sm:$0xff]  ;;  %v16_v36 = vld [vmem:[%s828_s0 + $0x10] sm:$0xff]  ;;  %v19_v39 = vld [vmem:[%s828_s0 + $0x28] sm:$0xff] }
  0x18   :  { %423 = vmatprep.subr.bf16.mxu1 %v422_v6  ;;  %v18_v38 = vld [vmem:[%s828_s0 + $0x20] sm:$0xff]  ;;  %v20_v40 = vld [vmem:[%s828_s0 + $0x30] sm:$0xff]  ;;  %v21_v41 = vld [vmem:[%s828_s0 + $0x38] sm:$0xff] }
  0x19   :  { %v86_v45 = vld [vmem:[%s829_s2] sm:$0xf] }
  0x1a   :  { %393 = vmatpush1.bf16.msra.mxu0 %v392_v12  ;;  %v691_v49 = vrot.slane %v86_v45, %v90_v44  ;;  %v693_v50 = vrot.slane %v86_v45, %v98_v46  ;;  %v695_v51 = vrot.slane %v86_v45, %v94_v47  ;;  %v697_v52 = vrot.slane %v86_v45, %v102_v48 }
  0x1b   :  { %425 = vmatpush1.bf16.msra.mxu1 %v424_v13  ;;  %395 = vmatprep.subr.bf16.mxu0 %v394_v14 }
  0x1c   :  { %427 = vmatprep.subr.bf16.mxu1 %v426_v18 }
  0x1e   :  { %397 = vmatpush1.bf16.msra.mxu0 %v396_v24 }
  0x1f   :  { %429 = vmatpush1.bf16.msra.mxu1 %v428_v25  ;;  %399 = vmatprep.subr.bf16.mxu0 %v398_v26 }
  0x20   :  { %431 = vmatprep.subr.bf16.mxu1 %v430_v29 }
  0x22   :  { %401 = vmatpush1.bf16.msra.mxu0 %v400_v32 }
  0x23   :  { %433 = vmatpush1.bf16.msra.mxu1 %v432_v33 }
  0x25   :  { %173 = vmatmul.mubr.f32.vlgmr.msra.gmra.mrb[0].mxu0 %v14_v34 }
  0x26   :  { %286 = vmatmul.mubr.f32.vlgmr.msra.gmra.mrb[0].mxu1 %v14_v34  ;;  %178 = vmatprep.mubr.f32.mxu0 %v435_v3 }
  0x27   :  { %291 = vmatprep.mubr.f32.mxu1 %v435_v3 }
  0x29   :  { %179 = vmatmul.mubr.f32.gmra.mrb[2].mxu0 %v15_v35 }
  0x2a   :  { %292 = vmatmul.mubr.f32.gmra.mrb[2].mxu1 %v15_v35  ;;  %184 = vmatprep.mubr.f32.mxu0 %v435_v3 }
  0x2b   :  { %297 = vmatprep.mubr.f32.mxu1 %v435_v3 }
  0x2d   :  { %185 = vmatmul.mubr.f32.gmra.mrb[4].mxu0 %v16_v36 }
  0x2e   :  { %298 = vmatmul.mubr.f32.gmra.mrb[4].mxu1 %v16_v36  ;;  %190 = vmatprep.mubr.f32.mxu0 %v435_v3 }
  0x2f   :  { %303 = vmatprep.mubr.f32.mxu1 %v435_v3 }
  0x31   :  { %191 = vmatmul.mubr.f32.gmra.mrb[6].mxu0 %v17_v37 }
  0x32   :  { %304 = vmatmul.mubr.f32.gmra.mrb[6].mxu1 %v17_v37  ;;  %196 = vmatprep.mubr.f32.mxu0 %v435_v3 }
  0x33   :  { %309 = vmatprep.mubr.f32.mxu1 %v435_v3 }
  0x35   :  { %197 = vmatmul.mubr.f32.gmra.mrb[8].mxu0 %v18_v38 }
  0x36   :  { %310 = vmatmul.mubr.f32.gmra.mrb[8].mxu1 %v18_v38  ;;  %202 = vmatprep.mubr.f32.mxu0 %v435_v3 }
  0x37   :  { %315 = vmatprep.mubr.f32.mxu1 %v435_v3 }
  0x39   :  { %203 = vmatmul.mubr.f32.gmra.mrb[10].mxu0 %v19_v39 }
  0x3a   :  { %316 = vmatmul.mubr.f32.gmra.mrb[10].mxu1 %v19_v39  ;;  %208 = vmatprep.mubr.f32.mxu0 %v435_v3 }
  0x3b   :  { %321 = vmatprep.mubr.f32.mxu1 %v435_v3 }
  0x3d   :  { %209 = vmatmul.mubr.f32.gmra.mrb[12].mxu0 %v20_v40 }
  0x3e   :  { %322 = vmatmul.mubr.f32.gmra.mrb[12].mxu1 %v20_v40  ;;  %214 = vmatprep.mubr.f32.mxu0 %v435_v3 }
  0x3f   :  { %327 = vmatprep.mubr.f32.mxu1 %v435_v3 }
  0x41   :  { %215 = vmatmul.mubr.f32.gmra.mrb[14].mxu0 %v21_v41 }
  0x42   :  { %328 = vmatmul.mubr.f32.gmra.mrb[14].mxu1 %v21_v41 }
  0xf8   :  { %v174_v3 = vpop.f32.mrb[0].mxu0 }
  0xf9   :  { %v175_v53 = vadd.f32 %v174_v3, %v691_v49  ;;  %v287_v54 = vpop.f32.mrb[0].mxu1  ;;  %v176_v55 = vpop.f32.mrb[1].mxu0 }
  0xfa   :  { %v288_v56 = vadd.f32 %v287_v54, %v693_v50  ;;  %v177_v57 = vadd.f32 %v176_v55, %v695_v51  ;;  %v289_v58 = vpop.f32.mrb[1].mxu1 }
  0xfb   :  { %334 = vst [vmem:[%s830_s3] sm:$0xff] %v175_v53  ;;  %v290_v59 = vadd.f32 %v289_v58, %v697_v52 }
  0xfc   :  { %336 = vst [vmem:[%s830_s3 + $0x10] sm:$0xff] %v288_v56  ;;  %335 = vst [vmem:[%s830_s3 + $0x8] sm:$0xff] %v177_v57  ;;  %v180_v60 = vpop.f32.mrb[2].mxu0 }
  0xfd   :  { %337 = vst [vmem:[%s830_s3 + $0x18] sm:$0xff] %v290_v59  ;;  %v181_v61 = vadd.f32 %v180_v60, %v691_v49  ;;  %v293_v62 = vpop.f32.mrb[2].mxu1  ;;  %v182_v63 = vpop.f32.mrb[3].mxu0 }
  0xfe   :  { %v294_v0 = vadd.f32 %v293_v62, %v693_v50  ;;  %v183_v1 = vadd.f32 %v182_v63, %v695_v51  ;;  %v295_v2 = vpop.f32.mrb[3].mxu1 }
  0xff   :  { %338 = vst [vmem:[%s830_s3 + $0x20] sm:$0xff] %v181_v61  ;;  %v296_v4 = vadd.f32 %v295_v2, %v697_v52 }
 0x100   :  { %340 = vst [vmem:[%s830_s3 + $0x30] sm:$0xff] %v294_v0  ;;  %339 = vst [vmem:[%s830_s3 + $0x28] sm:$0xff] %v183_v1  ;;  %v186_v5 = vpop.f32.mrb[4].mxu0 }
 0x101   :  { %341 = vst [vmem:[%s830_s3 + $0x38] sm:$0xff] %v296_v4  ;;  %v187_v6 = vadd.f32 %v186_v5, %v691_v49  ;;  %v299_v7 = vpop.f32.mrb[4].mxu1  ;;  %v188_v8 = vpop.f32.mrb[5].mxu0 }
 0x102   :  { %v300_v9 = vadd.f32 %v299_v7, %v693_v50  ;;  %v189_v10 = vadd.f32 %v188_v8, %v695_v51  ;;  %v301_v11 = vpop.f32.mrb[5].mxu1 }
 0x103   :  { %342 = vst [vmem:[%s830_s3 + $0x40] sm:$0xff] %v187_v6  ;;  %v302_v12 = vadd.f32 %v301_v11, %v697_v52 }
 0x104   :  { %344 = vst [vmem:[%s830_s3 + $0x50] sm:$0xff] %v300_v9  ;;  %343 = vst [vmem:[%s830_s3 + $0x48] sm:$0xff] %v189_v10  ;;  %v192_v13 = vpop.f32.mrb[6].mxu0 }
 0x105   :  { %345 = vst [vmem:[%s830_s3 + $0x58] sm:$0xff] %v302_v12  ;;  %v193_v14 = vadd.f32 %v192_v13, %v691_v49  ;;  %v305_v15 = vpop.f32.mrb[6].mxu1  ;;  %v194_v16 = vpop.f32.mrb[7].mxu0 }
 0x106   :  { %v306_v17 = vadd.f32 %v305_v15, %v693_v50  ;;  %v195_v18 = vadd.f32 %v194_v16, %v695_v51  ;;  %v307_v19 = vpop.f32.mrb[7].mxu1 }
 0x107   :  { %346 = vst [vmem:[%s830_s3 + $0x60] sm:$0xff] %v193_v14  ;;  %v308_v20 = vadd.f32 %v307_v19, %v697_v52 }
 0x108   :  { %348 = vst [vmem:[%s830_s3 + $0x70] sm:$0xff] %v306_v17  ;;  %347 = vst [vmem:[%s830_s3 + $0x68] sm:$0xff] %v195_v18  ;;  %v198_v21 = vpop.f32.mrb[8].mxu0 }
 0x109   :  { %349 = vst [vmem:[%s830_s3 + $0x78] sm:$0xff] %v308_v20  ;;  %v199_v22 = vadd.f32 %v198_v21, %v691_v49  ;;  %v311_v23 = vpop.f32.mrb[8].mxu1  ;;  %v200_v24 = vpop.f32.mrb[9].mxu0 }
 0x10a   :  { %v312_v25 = vadd.f32 %v311_v23, %v693_v50  ;;  %v201_v26 = vadd.f32 %v200_v24, %v695_v51  ;;  %v313_v27 = vpop.f32.mrb[9].mxu1 }
 0x10b   :  { %350 = vst [vmem:[%s830_s3 + $0x80] sm:$0xff] %v199_v22  ;;  %v314_v28 = vadd.f32 %v313_v27, %v697_v52 }
 0x10c   :  { %352 = vst [vmem:[%s830_s3 + $0x90] sm:$0xff] %v312_v25  ;;  %351 = vst [vmem:[%s830_s3 + $0x88] sm:$0xff] %v201_v26  ;;  %v204_v29 = vpop.f32.mrb[10].mxu0 }
 0x10d   :  { %353 = vst [vmem:[%s830_s3 + $0x98] sm:$0xff] %v314_v28  ;;  %v205_v30 = vadd.f32 %v204_v29, %v691_v49  ;;  %v317_v31 = vpop.f32.mrb[10].mxu1  ;;  %v206_v32 = vpop.f32.mrb[11].mxu0 }
 0x10e   :  { %v318_v33 = vadd.f32 %v317_v31, %v693_v50  ;;  %v207_v34 = vadd.f32 %v206_v32, %v695_v51  ;;  %v319_v35 = vpop.f32.mrb[11].mxu1 }
 0x10f   :  { %354 = vst [vmem:[%s830_s3 + $0xa0] sm:$0xff] %v205_v30  ;;  %v320_v36 = vadd.f32 %v319_v35, %v697_v52 }
 0x110   :  { %356 = vst [vmem:[%s830_s3 + $0xb0] sm:$0xff] %v318_v33  ;;  %355 = vst [vmem:[%s830_s3 + $0xa8] sm:$0xff] %v207_v34  ;;  %v210_v37 = vpop.f32.mrb[12].mxu0 }
 0x111   :  { %357 = vst [vmem:[%s830_s3 + $0xb8] sm:$0xff] %v320_v36  ;;  %v211_v38 = vadd.f32 %v210_v37, %v691_v49  ;;  %v323_v39 = vpop.f32.mrb[12].mxu1  ;;  %v212_v40 = vpop.f32.mrb[13].mxu0 }
 0x112   :  { %v324_v41 = vadd.f32 %v323_v39, %v693_v50  ;;  %v213_v42 = vadd.f32 %v212_v40, %v695_v51  ;;  %v325_v43 = vpop.f32.mrb[13].mxu1 }
 0x113   :  { %358 = vst [vmem:[%s830_s3 + $0xc0] sm:$0xff] %v211_v38  ;;  %v326_v44 = vadd.f32 %v325_v43, %v697_v52 }
 0x114   :  { %360 = vst [vmem:[%s830_s3 + $0xd0] sm:$0xff] %v324_v41  ;;  %359 = vst [vmem:[%s830_s3 + $0xc8] sm:$0xff] %v213_v42  ;;  %v216_v45 = vpop.f32.mrb[14].mxu0 }
 0x115   :  { %361 = vst [vmem:[%s830_s3 + $0xd8] sm:$0xff] %v326_v44  ;;  %v217_v46 = vadd.f32 %v216_v45, %v691_v49  ;;  %v329_v47 = vpop.f32.mrb[14].mxu1  ;;  %v218_v48 = vpop.f32.mrb[15].mxu0 }
 0x116   :  { %v330_v3 = vadd.f32 %v329_v47, %v693_v50  ;;  %v219_v53 = vadd.f32 %v218_v48, %v695_v51  ;;  %v331_v54 = vpop.f32.mrb[15].mxu1 }
 0x117   :  { %362 = vst [vmem:[%s830_s3 + $0xe0] sm:$0xff] %v217_v46  ;;  %v332_v55 = vadd.f32 %v331_v54, %v697_v52 }
 0x118   :  { %364 = vst [vmem:[%s830_s3 + $0xf0] sm:$0xff] %v330_v3  ;;  %363 = vst [vmem:[%s830_s3 + $0xe8] sm:$0xff] %v219_v53 }
 0x119   :  { %365 = vst [vmem:[%s830_s3 + $0xf8] sm:$0xff] %v332_v55 }

// kernel: lstm_model_forward.5
= control target key start
LH: loop header
LB: loop body
LE: loop exit
PB: predicated region body
PF: predicated region fallthrough
CT: control target
= control target key end

     0   :  { %s3691_s0 = inlined_call_operand.vmem [shape: f32[8,8,512], index: 0, kind: input, shape index: {}]   ;;  %s3692_s1 = inlined_call_operand.vmem [shape: f32[128,512], index: 1, kind: input, shape index: {}]   ;;  %s3693_s2 = inlined_call_operand.vmem [shape: f32[8,8,128], index: 2, kind: output, shape index: {}]  }
   0x1   :  { %v2885_v0 = vld [vmem:[%s3692_s1] sm:$0xff]  ;;  %v2890_v1 = vld [vmem:[%s3692_s1 + $0x8] sm:$0xff]  ;;  %v2895_v2 = vld [vmem:[%s3692_s1 + $0x10] sm:$0xff] }
   0x2   :  { %v2900_v3 = vld [vmem:[%s3692_s1 + $0x18] sm:$0xff]  ;;  %v53_v4 = vld [vmem:[%s3692_s1 + $0x20] sm:$0xff]  ;;  %v55_v5 = vld [vmem:[%s3692_s1 + $0x28] sm:$0xff] }
   0x3   :  { %v2911_v6 = vld [vmem:[%s3692_s1 + $0x30] sm:$0xff]  ;;  %v2916_v7 = vld [vmem:[%s3692_s1 + $0x38] sm:$0xff]  ;;  %v2921_v8 = vld [vmem:[%s3692_s1 + $0x40] sm:$0xff] }
   0x4   :  { %v63_v9 = vld [vmem:[%s3692_s1 + $0x48] sm:$0xff]  ;;  %v2929_v10 = vld [vmem:[%s3692_s1 + $0x50] sm:$0xff]  ;;  %v2934_v11 = vld [vmem:[%s3692_s1 + $0x58] sm:$0xff] }
   0x5   :  { %v69_v12 = vld [vmem:[%s3692_s1 + $0x60] sm:$0xff]  ;;  %v71_v13 = vld [vmem:[%s3692_s1 + $0x68] sm:$0xff]  ;;  %v2945_v14 = vld [vmem:[%s3692_s1 + $0x70] sm:$0xff] }
   0x6   :  { %v75_v15 = vld [vmem:[%s3692_s1 + $0x78] sm:$0xff]  ;;  %v2953_v16 = vld [vmem:[%s3692_s1 + $0x80] sm:$0xff]  ;;  %v79_v17 = vld [vmem:[%s3692_s1 + $0x88] sm:$0xff] }
   0x7   :  { %v2961_v18 = vld [vmem:[%s3692_s1 + $0x90] sm:$0xff]  ;;  %v2966_v19 = vld [vmem:[%s3692_s1 + $0x98] sm:$0xff]  ;;  %v2971_v20 = vld [vmem:[%s3692_s1 + $0xa0] sm:$0xff] }
   0x8   :  { %v87_v21 = vld [vmem:[%s3692_s1 + $0xa8] sm:$0xff]  ;;  %v2979_v22 = vld [vmem:[%s3692_s1 + $0xb0] sm:$0xff]  ;;  %v91_v23 = vld [vmem:[%s3692_s1 + $0xb8] sm:$0xff] }
   0x9   :  { %v2987_v24 = vld [vmem:[%s3692_s1 + $0xc0] sm:$0xff]  ;;  %v2992_v25 = vld [vmem:[%s3692_s1 + $0xc8] sm:$0xff]  ;;  %v2997_v26 = vld [vmem:[%s3692_s1 + $0xd0] sm:$0xff] }
   0xa   :  { %v3002_v27 = vld [vmem:[%s3692_s1 + $0xd8] sm:$0xff]  ;;  %v3007_v28 = vld [vmem:[%s3692_s1 + $0xe0] sm:$0xff]  ;;  %v103_v29 = vld [vmem:[%s3692_s1 + $0xe8] sm:$0xff] }
   0xb   :  { %v3015_v30 = vld [vmem:[%s3692_s1 + $0xf0] sm:$0xff]  ;;  %v107_v31 = vld [vmem:[%s3692_s1 + $0xf8] sm:$0xff]  ;;  %v3023_v32 = vld [vmem:[%s3692_s1 + $0x100] sm:$0xff] }
   0xc   :  { %v3028_v33 = vld [vmem:[%s3692_s1 + $0x108] sm:$0xff]  ;;  %v3033_v34 = vld [vmem:[%s3692_s1 + $0x110] sm:$0xff]  ;;  %v3038_v35 = vld [vmem:[%s3692_s1 + $0x118] sm:$0xff] }
   0xd   :  { %v3043_v36 = vld [vmem:[%s3692_s1 + $0x120] sm:$0xff]  ;;  %v119_v37 = vld [vmem:[%s3692_s1 + $0x128] sm:$0xff]  ;;  %v3051_v38 = vld [vmem:[%s3692_s1 + $0x130] sm:$0xff] }
   0xe   :  { %v123_v39 = vld [vmem:[%s3692_s1 + $0x138] sm:$0xff]  ;;  %v3059_v40 = vld [vmem:[%s3692_s1 + $0x140] sm:$0xff]  ;;  %v3064_v41 = vld [vmem:[%s3692_s1 + $0x148] sm:$0xff] }
   0xf   :  { %v3069_v42 = vld [vmem:[%s3692_s1 + $0x150] sm:$0xff]  ;;  %v3074_v43 = vld [vmem:[%s3692_s1 + $0x158] sm:$0xff]  ;;  %v3079_v44 = vld [vmem:[%s3692_s1 + $0x160] sm:$0xff] }
  0x10   :  { %v135_v45 = vld [vmem:[%s3692_s1 + $0x168] sm:$0xff]  ;;  %v3087_v46 = vld [vmem:[%s3692_s1 + $0x170] sm:$0xff]  ;;  %v139_v47 = vld [vmem:[%s3692_s1 + $0x178] sm:$0xff] }
  0x11   :  { %v3095_v48 = vld [vmem:[%s3692_s1 + $0x180] sm:$0xff]  ;;  %v3100_v49 = vld [vmem:[%s3692_s1 + $0x188] sm:$0xff]  ;;  %v3105_v50 = vld [vmem:[%s3692_s1 + $0x190] sm:$0xff] }
  0x12   :  { %v3110_v51 = vld [vmem:[%s3692_s1 + $0x198] sm:$0xff]  ;;  %v3115_v52 = vld [vmem:[%s3692_s1 + $0x1a0] sm:$0xff]  ;;  %v151_v53 = vld [vmem:[%s3692_s1 + $0x1a8] sm:$0xff] }
  0x13   :  { %v3123_v54 = vld [vmem:[%s3692_s1 + $0x1b0] sm:$0xff]  ;;  %v155_v55 = vld [vmem:[%s3692_s1 + $0x1b8] sm:$0xff]  ;;  %v3131_v56 = vld [vmem:[%s3692_s1 + $0x1c0] sm:$0xff] }
  0x14   :  { %3694 = vst [vmem:[#allocation8_spill] sm:$0xff] %v3131_v56  ;;  %v3136_v57 = vld [vmem:[%s3692_s1 + $0x1c8] sm:$0xff]  ;;  %v3141_v58 = vld [vmem:[%s3692_s1 + $0x1d0] sm:$0xff]  ;;  %v3146_v59 = vld [vmem:[%s3692_s1 + $0x1d8] sm:$0xff] }
  0x15   :  { %3695 = vst [vmem:[#allocation9_spill] sm:$0xff] %v3141_v58  ;;  %3696 = vst [vmem:[#allocation10_spill] sm:$0xff] %v3146_v59  ;;  %v3151_v60 = vld [vmem:[%s3692_s1 + $0x1e0] sm:$0xff]  ;;  %v167_v61 = vld [vmem:[%s3692_s1 + $0x1e8] sm:$0xff] }
  0x16   :  { %3697 = vst [vmem:[#allocation11_spill] sm:$0xff] %v3151_v60  ;;  %v3159_v62 = vld [vmem:[%s3692_s1 + $0x1f0] sm:$0xff]  ;;  %v171_v63 = vld [vmem:[%s3692_s1 + $0x1f8] sm:$0xff] }
  0x17   :  { %3698 = vst [vmem:[#allocation12_spill] sm:$0xff] %v3159_v62 }
  0x18   :  { %180 = vsyncadd [#allocation5], 8192  ;;  %v3165_v58 = vpack.c.bf16 %v55_v5, %v2890_v1  ;;  %v3168_v56 = vpack.c.bf16 %v53_v4, %v2885_v0  ;;  %v3170_v60 = vpack.c.bf16 %v71_v13, %v63_v9 }
  0x19   :  { %2864 = dma.done.wait [#allocation5], 8192 }
  0x1a   :  { %2865 = vsyncadd [#allocation5], 4294959104  ;;  %2224 = vmatprep.subr.bf16.mxu0 %v3165_v58  ;;  %v3175_v62 = vpack.c.bf16 %v2916_v7, %v2900_v3  ;;  %v3179_v59 = vpack.c.bf16 %v2911_v6, %v2895_v2  ;;  %v3183_v1 = vpack.c.bf16 %v69_v12, %v2921_v8  ;;  %v3186_v0 = vpack.c.bf16 %v75_v15, %v2934_v11 }
  0x1b   :  { %2226 = vmatpush1.bf16.msra.mxu0 %v3168_v56  ;;  %v3189_v4 = vpack.c.bf16 %v87_v21, %v79_v17  ;;  %v3195_v2 = vpack.c.bf16 %v2945_v14, %v2929_v10  ;;  %v3199_v3 = vpack.c.bf16 %v91_v23, %v2966_v19  ;;  %v2866_v5 = vmov 0.0  }
  0x1c   :  { %2228 = vmatprep.subr.bf16.mxu0 %v3170_v60  ;;  %2256 = vmatprep.subr.bf16.mxu1 %v3175_v62  ;;  %v3205_v6 = vpack.c.bf16 %v2971_v20, %v2953_v16  ;;  %v3209_v7 = vpack.c.bf16 %v103_v29, %v2992_v25  ;;  %v3215_v8 = vpack.c.bf16 %v2979_v22, %v2961_v18  ;;  %v3699_v25 = vld [vmem:[#allocation10_spill] sm:$0xff] }
  0x1d   :  { %2258 = vmatpush1.bf16.msra.mxu1 %v3179_v59  ;;  %321 = vmatprep.mubr.f32.mxu0 %v2866_v5  ;;  %v3219_v9 = vpack.c.bf16 %v107_v31, %v3002_v27  ;;  %v3224_v10 = vpack.c.bf16 %v3007_v28, %v2987_v24  ;;  %v3228_v11 = vpack.c.bf16 %v119_v37, %v3028_v33  ;;  %v3700_v27 = vld [vmem:[#allocation8_spill] sm:$0xff]  ;;  %v3701_v28 = vld [vmem:[#allocation11_spill] sm:$0xff] }
  0x1e   :  { %2260 = vmatprep.subr.bf16.mxu1 %v3186_v0  ;;  %392 = vmatprep.mubr.f32.mxu1 %v2866_v5  ;;  %v3233_v12 = vpack.c.bf16 %v3015_v30, %v2997_v26  ;;  %v3237_v13 = vpack.c.bf16 %v123_v39, %v3038_v35  ;;  %v3242_v14 = vpack.c.bf16 %v3043_v36, %v3023_v32  ;;  %v3702_v30 = vld [vmem:[#allocation9_spill] sm:$0xff]  ;;  %v3703_v31 = vld [vmem:[#allocation12_spill] sm:$0xff] }
  0x1f   :  { %2230 = vmatpush1.bf16.msra.mxu0 %v3183_v1  ;;  %v3246_v15 = vpack.c.bf16 %v135_v45, %v3064_v41  ;;  %v3251_v16 = vpack.c.bf16 %v3051_v38, %v3033_v34  ;;  %v3255_v17 = vpack.c.bf16 %v139_v47, %v3074_v43  ;;  %v3260_v18 = vpack.c.bf16 %v3079_v44, %v3059_v40  ;;  %v189_v33 = vld [vmem:[%s3691_s0] sm:$0xff]  ;;  %v190_v34 = vld [vmem:[%s3691_s0 + $0x8] sm:$0xff]  ;;  %v192_v43 = vld [vmem:[%s3691_s0 + $0x18] sm:$0xff] }
  0x20   :  { %2232 = vmatprep.subr.bf16.mxu0 %v3189_v4  ;;  %v3264_v19 = vpack.c.bf16 %v151_v53, %v3100_v49  ;;  %v3269_v20 = vpack.c.bf16 %v3087_v46, %v3069_v42  ;;  %v3273_v21 = vpack.c.bf16 %v155_v55, %v3110_v51  ;;  %v3278_v22 = vpack.c.bf16 %v3115_v52, %v3095_v48  ;;  %v191_v45 = vld [vmem:[%s3691_s0 + $0x10] sm:$0xff] }
  0x21   :  { %2262 = vmatpush1.bf16.msra.mxu1 %v3195_v2  ;;  %v3282_v23 = vpack.c.bf16 %v167_v61, %v3136_v57  ;;  %v3287_v24 = vpack.c.bf16 %v3123_v54, %v3105_v50  ;;  %v3291_v26 = vpack.c.bf16 %v171_v63, %v3699_v25  ;;  %v3296_v29 = vpack.c.bf16 %v3701_v28, %v3700_v27 }
  0x22   :  { %2264 = vmatprep.subr.bf16.mxu1 %v3199_v3  ;;  %v3302_v32 = vpack.c.bf16 %v3703_v31, %v3702_v30  ;;  %v2166_v31 = vld [vmem:[%s3691_s0 + $0x20] sm:$0xff] }
  0x23   :  { %2234 = vmatpush1.bf16.msra.mxu0 %v3205_v6 }
  0x24   :  { %2236 = vmatprep.subr.bf16.mxu0 %v3209_v7 }
  0x25   :  { %2266 = vmatpush1.bf16.msra.mxu1 %v3215_v8 }
  0x26   :  { %2268 = vmatprep.subr.bf16.mxu1 %v3219_v9 }
  0x27   :  { %2238 = vmatpush1.bf16.msra.mxu0 %v3224_v10 }
  0x28   :  { %2240 = vmatprep.subr.bf16.mxu0 %v3228_v11 }
  0x29   :  { %2270 = vmatpush1.bf16.msra.mxu1 %v3233_v12 }
  0x2a   :  { %2272 = vmatprep.subr.bf16.mxu1 %v3237_v13 }
  0x2b   :  { %2242 = vmatpush1.bf16.msra.mxu0 %v3242_v14 }
  0x2c   :  { %2244 = vmatprep.subr.bf16.mxu0 %v3246_v15 }
  0x2d   :  { %2274 = vmatpush1.bf16.msra.mxu1 %v3251_v16 }
  0x2e   :  { %2276 = vmatprep.subr.bf16.mxu1 %v3255_v17 }
  0x2f   :  { %2246 = vmatpush1.bf16.msra.mxu0 %v3260_v18 }
  0x30   :  { %2248 = vmatprep.subr.bf16.mxu0 %v3264_v19 }
  0x31   :  { %2278 = vmatpush1.bf16.msra.mxu1 %v3269_v20 }
  0x32   :  { %2280 = vmatprep.subr.bf16.mxu1 %v3273_v21 }
  0x33   :  { %2250 = vmatpush1.bf16.msra.mxu0 %v3278_v22 }
  0x34   :  { %2252 = vmatprep.subr.bf16.mxu0 %v3282_v23 }
  0x35   :  { %2282 = vmatpush1.bf16.msra.mxu1 %v3287_v24 }
  0x36   :  { %2284 = vmatprep.subr.bf16.mxu1 %v3291_v26 }
  0x37   :  { %2254 = vmatpush1.bf16.msra.mxu0 %v3296_v29 }
  0x38   :  { %2288 = vmatprep.subr.bf16.mxu0 %v3165_v58 }
  0x39   :  { %2286 = vmatpush1.bf16.msra.mxu1 %v3302_v32 }
  0x3a   :  { %322 = vmatmul.mubr.f32.vlgmr.msra.gmra.mrb[0].mxu0 %v2866_v5  ;;  %2320 = vmatprep.subr.bf16.mxu1 %v3175_v62 }
  0x3b   :  { %2290 = vmatpush1.bf16.msra.mxu0 %v3168_v56  ;;  %565 = vmatprep.mubr.f32.mxu0 %v2866_v5 }
  0x3c   :  { %393 = vmatmul.mubr.f32.vlgmr.msra.gmra.mrb[0].mxu1 %v2866_v5  ;;  %2292 = vmatprep.subr.bf16.mxu0 %v3170_v60 }
  0x3d   :  { %2322 = vmatpush1.bf16.msra.mxu1 %v3179_v59  ;;  %636 = vmatprep.mubr.f32.mxu1 %v2866_v5 }
  0x3e   :  { %2324 = vmatprep.subr.bf16.mxu1 %v3186_v0 }
  0x3f   :  { %2294 = vmatpush1.bf16.msra.mxu0 %v3183_v1 }
  0x40   :  { %2296 = vmatprep.subr.bf16.mxu0 %v3189_v4 }
  0x41   :  { %2326 = vmatpush1.bf16.msra.mxu1 %v3195_v2 }
  0x42   :  { %2328 = vmatprep.subr.bf16.mxu1 %v3199_v3 }
  0x43   :  { %2298 = vmatpush1.bf16.msra.mxu0 %v3205_v6 }
  0x44   :  { %2300 = vmatprep.subr.bf16.mxu0 %v3209_v7 }
  0x45   :  { %2330 = vmatpush1.bf16.msra.mxu1 %v3215_v8 }
  0x46   :  { %2332 = vmatprep.subr.bf16.mxu1 %v3219_v9 }
  0x47   :  { %2302 = vmatpush1.bf16.msra.mxu0 %v3224_v10 }
  0x48   :  { %2304 = vmatprep.subr.bf16.mxu0 %v3228_v11 }
  0x49   :  { %2334 = vmatpush1.bf16.msra.mxu1 %v3233_v12 }
  0x4a   :  { %2336 = vmatprep.subr.bf16.mxu1 %v3237_v13 }
  0x4b   :  { %2306 = vmatpush1.bf16.msra.mxu0 %v3242_v14 }
  0x4c   :  { %2308 = vmatprep.subr.bf16.mxu0 %v3246_v15 }
  0x4d   :  { %2338 = vmatpush1.bf16.msra.mxu1 %v3251_v16 }
  0x4e   :  { %2340 = vmatprep.subr.bf16.mxu1 %v3255_v17 }
  0x4f   :  { %2310 = vmatpush1.bf16.msra.mxu0 %v3260_v18 }
  0x50   :  { %2312 = vmatprep.subr.bf16.mxu0 %v3264_v19 }
  0x51   :  { %2342 = vmatpush1.bf16.msra.mxu1 %v3269_v20 }
  0x52   :  { %2344 = vmatprep.subr.bf16.mxu1 %v3273_v21 }
  0x53   :  { %2314 = vmatpush1.bf16.msra.mxu0 %v3278_v22 }
  0x54   :  { %2316 = vmatprep.subr.bf16.mxu0 %v3282_v23 }
  0x55   :  { %2346 = vmatpush1.bf16.msra.mxu1 %v3287_v24 }
  0x56   :  { %2348 = vmatprep.subr.bf16.mxu1 %v3291_v26 }
  0x57   :  { %2318 = vmatpush1.bf16.msra.mxu0 %v3296_v29 }
  0x58   :  { %2352 = vmatprep.subr.bf16.mxu0 %v3165_v58 }
  0x59   :  { %2350 = vmatpush1.bf16.msra.mxu1 %v3302_v32 }
  0x5a   :  { %2384 = vmatprep.subr.bf16.mxu1 %v3175_v62 }
 0x10d   :  { %v323_v35 = vpop.f32.mrb[0].mxu0 }
 0x10e   :  { %v399_v36 = vadd.f32 %v323_v35, %v189_v33  ;;  %v325_v37 = vpop.f32.mrb[1].mxu0  ;;  %v2167_v33 = vld [vmem:[%s3691_s0 + $0x28] sm:$0xff] }
 0x10f   :  { %v400_v38 = vadd.f32 %v325_v37, %v190_v34  ;;  %v394_v39 = vpop.f32.mrb[0].mxu1 }
 0x110   :  { %v2163_v40 = vmul.f32 -1.442695, %v399_v36  ;;  %v396_v41 = vpop.f32.mrb[1].mxu1  ;;  %v401_v47 = vadd.f32 %v394_v39, %v191_v45 }
 0x111   :  { %v2164_v42 = vmul.f32 -1.442695, %v400_v38  ;;  %v402_v44 = vadd.f32 %v396_v41, %v192_v43 }
 0x112   :  { %2736 = vpow2.f32 %v2163_v40 }
 0x113   :  { %2738 = vpow2.f32 %v2164_v42  ;;  %v2165_v46 = vmul.f32 -1.442695, %v402_v44  ;;  %v2169_v42 = vld [vmem:[%s3691_s0 + $0x38] sm:$0xff]  ;;  %v2168_v44 = vld [vmem:[%s3691_s0 + $0x30] sm:$0xff] }
 0x115   :  { %2740 = vpow2.f32 %v2165_v46 }
 0x116   :  { %2742 = vtanh.f32 %v401_v47 }
 0x11c   :  { %v2737_v48 = vpop.eup %2736 }
 0x11d   :  { %v2739_v49 = vpop.eup %2738  ;;  %v406_v50 = vadd.f32 1.0, %v2737_v48 }
 0x11e   :  { %v412_v51 = vadd.f32 1.0, %v2739_v49 }
 0x11f   :  { %2744 = vrcp.f32 %v406_v50  ;;  %v2741_v52 = vpop.eup %2740 }
 0x120   :  { %2746 = vrcp.f32 %v412_v51  ;;  %v2743_v53 = vpop.eup %2742  ;;  %v419_v55 = vadd.f32 1.0, %v2741_v52 }
 0x122   :  { %2748 = vrcp.f32 %v419_v55 }
 0x129   :  { %v2745_v54 = vpop.eup %2744 }
 0x12a   :  { %v2747_v57 = vpop.eup %2746  ;;  %v423_v61 = vmul.f32 %v2745_v54, %v2743_v53 }
 0x12b   :  { %v422_v63 = vmul.f32 0.0, %v2747_v57 }
 0x12c   :  { %v2749_v27 = vpop.eup %2748 }
 0x12d   :  { %v3357_v25 = vadd.f32 %v423_v61, %v422_v63 }
 0x12f   :  { %2750 = vtanh.f32 %v3357_v25 }
 0x139   :  { %v2751_v28 = vpop.eup %2750 }
 0x13a   :  { %v426_v30 = vmul.f32 %v2751_v28, %v2749_v27 }
 0x13c   :  { %429 = vst [vmem:[%s3693_s2] sm:$0xff] %v426_v30  ;;  %566 = vmatmul.mubr.f32.vlgmr.msra.gmra.mrb[2].mxu0 %v426_v30  ;;  %637 = vmatmul.mubr.f32.vlgmr.msra.gmra.mrb[2].mxu1 %v426_v30 }
 0x13d   :  { %2354 = vmatpush1.bf16.msra.mxu0 %v3168_v56  ;;  %2386 = vmatpush1.bf16.msra.mxu1 %v3179_v59 }
 0x13e   :  { %2356 = vmatprep.subr.bf16.mxu0 %v3170_v60  ;;  %2388 = vmatprep.subr.bf16.mxu1 %v3186_v0 }
 0x13f   :  { %810 = vmatprep.mubr.f32.mxu0 %v2866_v5  ;;  %881 = vmatprep.mubr.f32.mxu1 %v2866_v5 }
 0x141   :  { %2358 = vmatpush1.bf16.msra.mxu0 %v3183_v1  ;;  %2390 = vmatpush1.bf16.msra.mxu1 %v3195_v2 }
 0x142   :  { %2360 = vmatprep.subr.bf16.mxu0 %v3189_v4  ;;  %2392 = vmatprep.subr.bf16.mxu1 %v3199_v3 }
 0x145   :  { %2362 = vmatpush1.bf16.msra.mxu0 %v3205_v6  ;;  %2394 = vmatpush1.bf16.msra.mxu1 %v3215_v8 }
 0x146   :  { %2364 = vmatprep.subr.bf16.mxu0 %v3209_v7  ;;  %2396 = vmatprep.subr.bf16.mxu1 %v3219_v9 }
 0x149   :  { %2366 = vmatpush1.bf16.msra.mxu0 %v3224_v10  ;;  %2398 = vmatpush1.bf16.msra.mxu1 %v3233_v12 }
 0x14a   :  { %2368 = vmatprep.subr.bf16.mxu0 %v3228_v11  ;;  %2400 = vmatprep.subr.bf16.mxu1 %v3237_v13 }
 0x14d   :  { %2370 = vmatpush1.bf16.msra.mxu0 %v3242_v14  ;;  %2402 = vmatpush1.bf16.msra.mxu1 %v3251_v16 }
 0x14e   :  { %2372 = vmatprep.subr.bf16.mxu0 %v3246_v15  ;;  %2404 = vmatprep.subr.bf16.mxu1 %v3255_v17 }
 0x151   :  { %2374 = vmatpush1.bf16.msra.mxu0 %v3260_v18  ;;  %2406 = vmatpush1.bf16.msra.mxu1 %v3269_v20 }
 0x152   :  { %2376 = vmatprep.subr.bf16.mxu0 %v3264_v19  ;;  %2408 = vmatprep.subr.bf16.mxu1 %v3273_v21 }
 0x155   :  { %2378 = vmatpush1.bf16.msra.mxu0 %v3278_v22  ;;  %2410 = vmatpush1.bf16.msra.mxu1 %v3287_v24 }
 0x156   :  { %2380 = vmatprep.subr.bf16.mxu0 %v3282_v23  ;;  %2412 = vmatprep.subr.bf16.mxu1 %v3291_v26 }
 0x159   :  { %2382 = vmatpush1.bf16.msra.mxu0 %v3296_v29  ;;  %2414 = vmatpush1.bf16.msra.mxu1 %v3302_v32 }
 0x15a   :  { %2416 = vmatprep.subr.bf16.mxu0 %v3165_v58  ;;  %2448 = vmatprep.subr.bf16.mxu1 %v3175_v62 }
 0x20f   :  { %v567_v34 = vpop.f32.mrb[2].mxu0  ;;  %v638_v35 = vpop.f32.mrb[2].mxu1 }
 0x210   :  { %v643_v36 = vadd.f32 %v2166_v31, %v567_v34  ;;  %v569_v37 = vpop.f32.mrb[3].mxu0  ;;  %v640_v38 = vpop.f32.mrb[3].mxu1  ;;  %v645_v46 = vadd.f32 %v2168_v44, %v638_v35  ;;  %v2175_v31 = vld [vmem:[%s3691_s0 + $0x48] sm:$0xff] }
 0x211   :  { %v644_v39 = vadd.f32 %v2167_v33, %v569_v37  ;;  %v646_v43 = vadd.f32 %v2169_v42, %v640_v38 }
 0x212   :  { %v2170_v40 = vmul.f32 -1.442695, %v643_v36 }
 0x213   :  { %v2171_v41 = vmul.f32 -1.442695, %v644_v39  ;;  %v2172_v45 = vmul.f32 -1.442695, %v646_v43  ;;  %v2176_v43 = vld [vmem:[%s3691_s0 + $0x50] sm:$0xff] }
 0x214   :  { %2752 = vpow2.f32 %v2170_v40 }
 0x215   :  { %2754 = vpow2.f32 %v2171_v41  ;;  %v2177_v41 = vld [vmem:[%s3691_s0 + $0x58] sm:$0xff] }
 0x216   :  { %2756 = vpow2.f32 %v2172_v45 }
 0x217   :  { %2758 = vtanh.f32 %v645_v46 }
 0x21e   :  { %v2753_v47 = vpop.eup %2752 }
 0x21f   :  { %v2755_v48 = vpop.eup %2754  ;;  %v650_v49 = vadd.f32 1.0, %v2753_v47 }
 0x220   :  { %v656_v50 = vadd.f32 1.0, %v2755_v48  ;;  %v2757_v51 = vpop.eup %2756 }
 0x221   :  { %2760 = vrcp.f32 %v650_v49  ;;  %v2759_v52 = vpop.eup %2758  ;;  %v663_v57 = vadd.f32 1.0, %v2757_v51 }
 0x222   :  { %2762 = vrcp.f32 %v656_v50 }
 0x223   :  { %2764 = vrcp.f32 %v663_v57 }
 0x22b   :  { %v2761_v53 = vpop.eup %2760 }
 0x22c   :  { %v2763_v54 = vpop.eup %2762  ;;  %v667_v55 = vmul.f32 %v2761_v53, %v2759_v52 }
 0x22d   :  { %v666_v61 = vmul.f32 %v2763_v54, %v3357_v25  ;;  %v2765_v27 = vpop.eup %2764  ;;  %v2174_v25 = vld [vmem:[%s3691_s0 + $0x40] sm:$0xff] }
 0x22f   :  { %v3410_v63 = vadd.f32 %v667_v55, %v666_v61 }
 0x231   :  { %2766 = vtanh.f32 %v3410_v63 }
 0x23b   :  { %v2767_v28 = vpop.eup %2766 }
 0x23c   :  { %v670_v30 = vmul.f32 %v2767_v28, %v2765_v27 }
 0x23e   :  { %2173 = vst [vmem:[%s3693_s2 + $0x8] sm:$0xff] %v670_v30  ;;  %811 = vmatmul.mubr.f32.vlgmr.msra.gmra.mrb[4].mxu0 %v670_v30  ;;  %882 = vmatmul.mubr.f32.vlgmr.msra.gmra.mrb[4].mxu1 %v670_v30 }
 0x23f   :  { %2418 = vmatpush1.bf16.msra.mxu0 %v3168_v56  ;;  %2450 = vmatpush1.bf16.msra.mxu1 %v3179_v59 }
 0x240   :  { %2420 = vmatprep.subr.bf16.mxu0 %v3170_v60  ;;  %2452 = vmatprep.subr.bf16.mxu1 %v3186_v0 }
 0x241   :  { %1055 = vmatprep.mubr.f32.mxu0 %v2866_v5  ;;  %1126 = vmatprep.mubr.f32.mxu1 %v2866_v5 }
 0x243   :  { %2422 = vmatpush1.bf16.msra.mxu0 %v3183_v1  ;;  %2454 = vmatpush1.bf16.msra.mxu1 %v3195_v2 }
 0x244   :  { %2424 = vmatprep.subr.bf16.mxu0 %v3189_v4  ;;  %2456 = vmatprep.subr.bf16.mxu1 %v3199_v3 }
 0x247   :  { %2426 = vmatpush1.bf16.msra.mxu0 %v3205_v6  ;;  %2458 = vmatpush1.bf16.msra.mxu1 %v3215_v8 }
 0x248   :  { %2428 = vmatprep.subr.bf16.mxu0 %v3209_v7  ;;  %2460 = vmatprep.subr.bf16.mxu1 %v3219_v9 }
 0x24b   :  { %2430 = vmatpush1.bf16.msra.mxu0 %v3224_v10  ;;  %2462 = vmatpush1.bf16.msra.mxu1 %v3233_v12 }
 0x24c   :  { %2432 = vmatprep.subr.bf16.mxu0 %v3228_v11  ;;  %2464 = vmatprep.subr.bf16.mxu1 %v3237_v13 }
 0x24f   :  { %2434 = vmatpush1.bf16.msra.mxu0 %v3242_v14  ;;  %2466 = vmatpush1.bf16.msra.mxu1 %v3251_v16 }
 0x250   :  { %2436 = vmatprep.subr.bf16.mxu0 %v3246_v15  ;;  %2468 = vmatprep.subr.bf16.mxu1 %v3255_v17 }
 0x253   :  { %2438 = vmatpush1.bf16.msra.mxu0 %v3260_v18  ;;  %2470 = vmatpush1.bf16.msra.mxu1 %v3269_v20 }
 0x254   :  { %2440 = vmatprep.subr.bf16.mxu0 %v3264_v19  ;;  %2472 = vmatprep.subr.bf16.mxu1 %v3273_v21 }
 0x257   :  { %2442 = vmatpush1.bf16.msra.mxu0 %v3278_v22  ;;  %2474 = vmatpush1.bf16.msra.mxu1 %v3287_v24 }
 0x258   :  { %2444 = vmatprep.subr.bf16.mxu0 %v3282_v23  ;;  %2476 = vmatprep.subr.bf16.mxu1 %v3291_v26 }
 0x25b   :  { %2446 = vmatpush1.bf16.msra.mxu0 %v3296_v29  ;;  %2478 = vmatpush1.bf16.msra.mxu1 %v3302_v32 }
 0x25c   :  { %2480 = vmatprep.subr.bf16.mxu0 %v3165_v58  ;;  %2512 = vmatprep.subr.bf16.mxu1 %v3175_v62 }
 0x311   :  { %v812_v33 = vpop.f32.mrb[4].mxu0  ;;  %v883_v34 = vpop.f32.mrb[4].mxu1 }
 0x312   :  { %v888_v35 = vadd.f32 %v2174_v25, %v812_v33  ;;  %v814_v36 = vpop.f32.mrb[5].mxu0  ;;  %v885_v37 = vpop.f32.mrb[5].mxu1  ;;  %v890_v45 = vadd.f32 %v2176_v43, %v883_v34  ;;  %v2183_v25 = vld [vmem:[%s3691_s0 + $0x68] sm:$0xff] }
 0x313   :  { %v889_v38 = vadd.f32 %v2175_v31, %v814_v36  ;;  %v891_v42 = vadd.f32 %v2177_v41, %v885_v37 }
 0x314   :  { %v2178_v39 = vmul.f32 -1.442695, %v888_v35 }
 0x315   :  { %v2179_v40 = vmul.f32 -1.442695, %v889_v38  ;;  %v2180_v44 = vmul.f32 -1.442695, %v891_v42  ;;  %v2184_v42 = vld [vmem:[%s3691_s0 + $0x70] sm:$0xff] }
 0x316   :  { %2768 = vpow2.f32 %v2178_v39 }
 0x317   :  { %2770 = vpow2.f32 %v2179_v40  ;;  %v2185_v40 = vld [vmem:[%s3691_s0 + $0x78] sm:$0xff] }
 0x318   :  { %2772 = vpow2.f32 %v2180_v44 }
 0x319   :  { %2774 = vtanh.f32 %v890_v45 }
 0x320   :  { %v2769_v46 = vpop.eup %2768 }
 0x321   :  { %v2771_v47 = vpop.eup %2770  ;;  %v895_v48 = vadd.f32 1.0, %v2769_v46 }
 0x322   :  { %v901_v49 = vadd.f32 1.0, %v2771_v47  ;;  %v2773_v50 = vpop.eup %2772 }
 0x323   :  { %2776 = vrcp.f32 %v895_v48  ;;  %v2775_v51 = vpop.eup %2774  ;;  %v908_v55 = vadd.f32 1.0, %v2773_v50 }
 0x324   :  { %2778 = vrcp.f32 %v901_v49 }
 0x325   :  { %2780 = vrcp.f32 %v908_v55 }
 0x32d   :  { %v2777_v52 = vpop.eup %2776 }
 0x32e   :  { %v2779_v53 = vpop.eup %2778  ;;  %v912_v54 = vmul.f32 %v2777_v52, %v2775_v51 }
 0x32f   :  { %v911_v57 = vmul.f32 %v2779_v53, %v3410_v63  ;;  %v2781_v27 = vpop.eup %2780  ;;  %v2182_v63 = vld [vmem:[%s3691_s0 + $0x60] sm:$0xff] }
 0x331   :  { %v3463_v61 = vadd.f32 %v912_v54, %v911_v57 }
 0x333   :  { %2782 = vtanh.f32 %v3463_v61 }
 0x33d   :  { %v2783_v28 = vpop.eup %2782 }
 0x33e   :  { %v915_v30 = vmul.f32 %v2783_v28, %v2781_v27 }
 0x340   :  { %2181 = vst [vmem:[%s3693_s2 + $0x10] sm:$0xff] %v915_v30  ;;  %1056 = vmatmul.mubr.f32.vlgmr.msra.gmra.mrb[6].mxu0 %v915_v30  ;;  %1127 = vmatmul.mubr.f32.vlgmr.msra.gmra.mrb[6].mxu1 %v915_v30 }
 0x341   :  { %2482 = vmatpush1.bf16.msra.mxu0 %v3168_v56  ;;  %2514 = vmatpush1.bf16.msra.mxu1 %v3179_v59 }
 0x342   :  { %2484 = vmatprep.subr.bf16.mxu0 %v3170_v60  ;;  %2516 = vmatprep.subr.bf16.mxu1 %v3186_v0 }
 0x343   :  { %1300 = vmatprep.mubr.f32.mxu0 %v2866_v5  ;;  %1371 = vmatprep.mubr.f32.mxu1 %v2866_v5 }
 0x345   :  { %2486 = vmatpush1.bf16.msra.mxu0 %v3183_v1  ;;  %2518 = vmatpush1.bf16.msra.mxu1 %v3195_v2 }
 0x346   :  { %2488 = vmatprep.subr.bf16.mxu0 %v3189_v4  ;;  %2520 = vmatprep.subr.bf16.mxu1 %v3199_v3 }
 0x349   :  { %2490 = vmatpush1.bf16.msra.mxu0 %v3205_v6  ;;  %2522 = vmatpush1.bf16.msra.mxu1 %v3215_v8 }
 0x34a   :  { %2492 = vmatprep.subr.bf16.mxu0 %v3209_v7  ;;  %2524 = vmatprep.subr.bf16.mxu1 %v3219_v9 }
 0x34d   :  { %2494 = vmatpush1.bf16.msra.mxu0 %v3224_v10  ;;  %2526 = vmatpush1.bf16.msra.mxu1 %v3233_v12 }
 0x34e   :  { %2496 = vmatprep.subr.bf16.mxu0 %v3228_v11  ;;  %2528 = vmatprep.subr.bf16.mxu1 %v3237_v13 }
 0x351   :  { %2498 = vmatpush1.bf16.msra.mxu0 %v3242_v14  ;;  %2530 = vmatpush1.bf16.msra.mxu1 %v3251_v16 }
 0x352   :  { %2500 = vmatprep.subr.bf16.mxu0 %v3246_v15  ;;  %2532 = vmatprep.subr.bf16.mxu1 %v3255_v17 }
 0x355   :  { %2502 = vmatpush1.bf16.msra.mxu0 %v3260_v18  ;;  %2534 = vmatpush1.bf16.msra.mxu1 %v3269_v20 }
 0x356   :  { %2504 = vmatprep.subr.bf16.mxu0 %v3264_v19  ;;  %2536 = vmatprep.subr.bf16.mxu1 %v3273_v21 }
 0x359   :  { %2506 = vmatpush1.bf16.msra.mxu0 %v3278_v22  ;;  %2538 = vmatpush1.bf16.msra.mxu1 %v3287_v24 }
 0x35a   :  { %2508 = vmatprep.subr.bf16.mxu0 %v3282_v23  ;;  %2540 = vmatprep.subr.bf16.mxu1 %v3291_v26 }
 0x35d   :  { %2510 = vmatpush1.bf16.msra.mxu0 %v3296_v29  ;;  %2542 = vmatpush1.bf16.msra.mxu1 %v3302_v32 }
 0x35e   :  { %2544 = vmatprep.subr.bf16.mxu0 %v3165_v58  ;;  %2576 = vmatprep.subr.bf16.mxu1 %v3175_v62 }
 0x413   :  { %v1057_v31 = vpop.f32.mrb[6].mxu0  ;;  %v1128_v33 = vpop.f32.mrb[6].mxu1 }
 0x414   :  { %v1133_v34 = vadd.f32 %v2182_v63, %v1057_v31  ;;  %v1059_v35 = vpop.f32.mrb[7].mxu0  ;;  %v1130_v36 = vpop.f32.mrb[7].mxu1  ;;  %v1135_v44 = vadd.f32 %v2184_v42, %v1128_v33  ;;  %v2191_v63 = vld [vmem:[%s3691_s0 + $0x88] sm:$0xff] }
 0x415   :  { %v1134_v37 = vadd.f32 %v2183_v25, %v1059_v35  ;;  %v1136_v41 = vadd.f32 %v2185_v40, %v1130_v36 }
 0x416   :  { %v2186_v38 = vmul.f32 -1.442695, %v1133_v34 }
 0x417   :  { %v2187_v39 = vmul.f32 -1.442695, %v1134_v37  ;;  %v2188_v43 = vmul.f32 -1.442695, %v1136_v41  ;;  %v2192_v41 = vld [vmem:[%s3691_s0 + $0x90] sm:$0xff] }
 0x418   :  { %2784 = vpow2.f32 %v2186_v38 }
 0x419   :  { %2786 = vpow2.f32 %v2187_v39  ;;  %v2193_v39 = vld [vmem:[%s3691_s0 + $0x98] sm:$0xff] }
 0x41a   :  { %2788 = vpow2.f32 %v2188_v43 }
 0x41b   :  { %2790 = vtanh.f32 %v1135_v44 }
 0x422   :  { %v2785_v45 = vpop.eup %2784 }
 0x423   :  { %v2787_v46 = vpop.eup %2786  ;;  %v1140_v47 = vadd.f32 1.0, %v2785_v45 }
 0x424   :  { %v1146_v48 = vadd.f32 1.0, %v2787_v46  ;;  %v2789_v49 = vpop.eup %2788 }
 0x425   :  { %2792 = vrcp.f32 %v1140_v47  ;;  %v2791_v50 = vpop.eup %2790  ;;  %v1153_v54 = vadd.f32 1.0, %v2789_v49 }
 0x426   :  { %2794 = vrcp.f32 %v1146_v48 }
 0x427   :  { %2796 = vrcp.f32 %v1153_v54 }
 0x42f   :  { %v2793_v51 = vpop.eup %2792 }
 0x430   :  { %v2795_v52 = vpop.eup %2794  ;;  %v1157_v53 = vmul.f32 %v2793_v51, %v2791_v50 }
 0x431   :  { %v1156_v55 = vmul.f32 %v2795_v52, %v3463_v61  ;;  %v2797_v27 = vpop.eup %2796  ;;  %v2190_v61 = vld [vmem:[%s3691_s0 + $0x80] sm:$0xff] }
 0x433   :  { %v3516_v57 = vadd.f32 %v1157_v53, %v1156_v55 }
 0x435   :  { %2798 = vtanh.f32 %v3516_v57 }
 0x43f   :  { %v2799_v28 = vpop.eup %2798 }
 0x440   :  { %v1160_v30 = vmul.f32 %v2799_v28, %v2797_v27 }
 0x442   :  { %2189 = vst [vmem:[%s3693_s2 + $0x18] sm:$0xff] %v1160_v30  ;;  %1301 = vmatmul.mubr.f32.vlgmr.msra.gmra.mrb[8].mxu0 %v1160_v30  ;;  %1372 = vmatmul.mubr.f32.vlgmr.msra.gmra.mrb[8].mxu1 %v1160_v30 }
 0x443   :  { %2546 = vmatpush1.bf16.msra.mxu0 %v3168_v56  ;;  %2578 = vmatpush1.bf16.msra.mxu1 %v3179_v59 }
 0x444   :  { %2548 = vmatprep.subr.bf16.mxu0 %v3170_v60  ;;  %2580 = vmatprep.subr.bf16.mxu1 %v3186_v0 }
 0x445   :  { %1545 = vmatprep.mubr.f32.mxu0 %v2866_v5  ;;  %1616 = vmatprep.mubr.f32.mxu1 %v2866_v5 }
 0x447   :  { %2550 = vmatpush1.bf16.msra.mxu0 %v3183_v1  ;;  %2582 = vmatpush1.bf16.msra.mxu1 %v3195_v2 }
 0x448   :  { %2552 = vmatprep.subr.bf16.mxu0 %v3189_v4  ;;  %2584 = vmatprep.subr.bf16.mxu1 %v3199_v3 }
 0x44b   :  { %2554 = vmatpush1.bf16.msra.mxu0 %v3205_v6  ;;  %2586 = vmatpush1.bf16.msra.mxu1 %v3215_v8 }
 0x44c   :  { %2556 = vmatprep.subr.bf16.mxu0 %v3209_v7  ;;  %2588 = vmatprep.subr.bf16.mxu1 %v3219_v9 }
 0x44f   :  { %2558 = vmatpush1.bf16.msra.mxu0 %v3224_v10  ;;  %2590 = vmatpush1.bf16.msra.mxu1 %v3233_v12 }
 0x450   :  { %2560 = vmatprep.subr.bf16.mxu0 %v3228_v11  ;;  %2592 = vmatprep.subr.bf16.mxu1 %v3237_v13 }
 0x453   :  { %2562 = vmatpush1.bf16.msra.mxu0 %v3242_v14  ;;  %2594 = vmatpush1.bf16.msra.mxu1 %v3251_v16 }
 0x454   :  { %2564 = vmatprep.subr.bf16.mxu0 %v3246_v15  ;;  %2596 = vmatprep.subr.bf16.mxu1 %v3255_v17 }
 0x457   :  { %2566 = vmatpush1.bf16.msra.mxu0 %v3260_v18  ;;  %2598 = vmatpush1.bf16.msra.mxu1 %v3269_v20 }
 0x458   :  { %2568 = vmatprep.subr.bf16.mxu0 %v3264_v19  ;;  %2600 = vmatprep.subr.bf16.mxu1 %v3273_v21 }
 0x45b   :  { %2570 = vmatpush1.bf16.msra.mxu0 %v3278_v22  ;;  %2602 = vmatpush1.bf16.msra.mxu1 %v3287_v24 }
 0x45c   :  { %2572 = vmatprep.subr.bf16.mxu0 %v3282_v23  ;;  %2604 = vmatprep.subr.bf16.mxu1 %v3291_v26 }
 0x45f   :  { %2574 = vmatpush1.bf16.msra.mxu0 %v3296_v29  ;;  %2606 = vmatpush1.bf16.msra.mxu1 %v3302_v32 }
 0x460   :  { %2608 = vmatprep.subr.bf16.mxu0 %v3165_v58  ;;  %2640 = vmatprep.subr.bf16.mxu1 %v3175_v62 }
 0x515   :  { %v1302_v25 = vpop.f32.mrb[8].mxu0  ;;  %v1373_v31 = vpop.f32.mrb[8].mxu1 }
 0x516   :  { %v1378_v33 = vadd.f32 %v2190_v61, %v1302_v25  ;;  %v1304_v34 = vpop.f32.mrb[9].mxu0  ;;  %v1375_v35 = vpop.f32.mrb[9].mxu1  ;;  %v1380_v43 = vadd.f32 %v2192_v41, %v1373_v31  ;;  %v2199_v61 = vld [vmem:[%s3691_s0 + $0xa8] sm:$0xff] }
 0x517   :  { %v1379_v36 = vadd.f32 %v2191_v63, %v1304_v34  ;;  %v1381_v40 = vadd.f32 %v2193_v39, %v1375_v35 }
 0x518   :  { %v2194_v37 = vmul.f32 -1.442695, %v1378_v33 }
 0x519   :  { %v2195_v38 = vmul.f32 -1.442695, %v1379_v36  ;;  %v2196_v42 = vmul.f32 -1.442695, %v1381_v40 }
 0x51a   :  { %2800 = vpow2.f32 %v2194_v37 }
 0x51b   :  { %2802 = vpow2.f32 %v2195_v38  ;;  %v2200_v38 = vld [vmem:[%s3691_s0 + $0xb0] sm:$0xff] }
 0x51c   :  { %2804 = vpow2.f32 %v2196_v42 }
 0x51d   :  { %2806 = vtanh.f32 %v1380_v43 }
 0x524   :  { %v2801_v44 = vpop.eup %2800 }
 0x525   :  { %v2803_v45 = vpop.eup %2802  ;;  %v1385_v46 = vadd.f32 1.0, %v2801_v44 }
 0x526   :  { %v1391_v47 = vadd.f32 1.0, %v2803_v45  ;;  %v2805_v48 = vpop.eup %2804 }
 0x527   :  { %2808 = vrcp.f32 %v1385_v46  ;;  %v2807_v49 = vpop.eup %2806  ;;  %v1398_v53 = vadd.f32 1.0, %v2805_v48 }
 0x528   :  { %2810 = vrcp.f32 %v1391_v47 }
 0x529   :  { %2812 = vrcp.f32 %v1398_v53 }
 0x531   :  { %v2809_v50 = vpop.eup %2808 }
 0x532   :  { %v2811_v51 = vpop.eup %2810  ;;  %v1402_v52 = vmul.f32 %v2809_v50, %v2807_v49 }
 0x533   :  { %v1401_v54 = vmul.f32 %v2811_v51, %v3516_v57  ;;  %v2813_v27 = vpop.eup %2812  ;;  %v2198_v57 = vld [vmem:[%s3691_s0 + $0xa0] sm:$0xff] }
 0x535   :  { %v3569_v55 = vadd.f32 %v1402_v52, %v1401_v54 }
 0x537   :  { %2814 = vtanh.f32 %v3569_v55 }
 0x541   :  { %v2815_v28 = vpop.eup %2814 }
 0x542   :  { %v1405_v30 = vmul.f32 %v2815_v28, %v2813_v27 }
 0x544   :  { %2197 = vst [vmem:[%s3693_s2 + $0x20] sm:$0xff] %v1405_v30  ;;  %1546 = vmatmul.mubr.f32.vlgmr.msra.gmra.mrb[10].mxu0 %v1405_v30  ;;  %1617 = vmatmul.mubr.f32.vlgmr.msra.gmra.mrb[10].mxu1 %v1405_v30 }
 0x545   :  { %2610 = vmatpush1.bf16.msra.mxu0 %v3168_v56  ;;  %2642 = vmatpush1.bf16.msra.mxu1 %v3179_v59 }
 0x546   :  { %2612 = vmatprep.subr.bf16.mxu0 %v3170_v60  ;;  %2644 = vmatprep.subr.bf16.mxu1 %v3186_v0 }
 0x547   :  { %1790 = vmatprep.mubr.f32.mxu0 %v2866_v5  ;;  %1861 = vmatprep.mubr.f32.mxu1 %v2866_v5 }
 0x549   :  { %2614 = vmatpush1.bf16.msra.mxu0 %v3183_v1  ;;  %2646 = vmatpush1.bf16.msra.mxu1 %v3195_v2 }
 0x54a   :  { %2616 = vmatprep.subr.bf16.mxu0 %v3189_v4  ;;  %2648 = vmatprep.subr.bf16.mxu1 %v3199_v3 }
 0x54d   :  { %2618 = vmatpush1.bf16.msra.mxu0 %v3205_v6  ;;  %2650 = vmatpush1.bf16.msra.mxu1 %v3215_v8 }
 0x54e   :  { %2620 = vmatprep.subr.bf16.mxu0 %v3209_v7  ;;  %2652 = vmatprep.subr.bf16.mxu1 %v3219_v9 }
 0x551   :  { %2622 = vmatpush1.bf16.msra.mxu0 %v3224_v10  ;;  %2654 = vmatpush1.bf16.msra.mxu1 %v3233_v12 }
 0x552   :  { %2624 = vmatprep.subr.bf16.mxu0 %v3228_v11  ;;  %2656 = vmatprep.subr.bf16.mxu1 %v3237_v13 }
 0x555   :  { %2626 = vmatpush1.bf16.msra.mxu0 %v3242_v14  ;;  %2658 = vmatpush1.bf16.msra.mxu1 %v3251_v16 }
 0x556   :  { %2628 = vmatprep.subr.bf16.mxu0 %v3246_v15  ;;  %2660 = vmatprep.subr.bf16.mxu1 %v3255_v17 }
 0x559   :  { %2630 = vmatpush1.bf16.msra.mxu0 %v3260_v18  ;;  %2662 = vmatpush1.bf16.msra.mxu1 %v3269_v20 }
 0x55a   :  { %2632 = vmatprep.subr.bf16.mxu0 %v3264_v19  ;;  %2664 = vmatprep.subr.bf16.mxu1 %v3273_v21 }
 0x55d   :  { %2634 = vmatpush1.bf16.msra.mxu0 %v3278_v22  ;;  %2666 = vmatpush1.bf16.msra.mxu1 %v3287_v24 }
 0x55e   :  { %2636 = vmatprep.subr.bf16.mxu0 %v3282_v23  ;;  %2668 = vmatprep.subr.bf16.mxu1 %v3291_v26 }
 0x561   :  { %2638 = vmatpush1.bf16.msra.mxu0 %v3296_v29  ;;  %2670 = vmatpush1.bf16.msra.mxu1 %v3302_v32 }
 0x562   :  { %2672 = vmatprep.subr.bf16.mxu0 %v3165_v58  ;;  %2704 = vmatprep.subr.bf16.mxu1 %v3175_v62  ;;  %v2201_v58 = vld [vmem:[%s3691_s0 + $0xb8] sm:$0xff] }
 0x617   :  { %v1547_v63 = vpop.f32.mrb[10].mxu0  ;;  %v1618_v25 = vpop.f32.mrb[10].mxu1 }
 0x618   :  { %v1623_v31 = vadd.f32 %v2198_v57, %v1547_v63  ;;  %v1549_v33 = vpop.f32.mrb[11].mxu0  ;;  %v1620_v34 = vpop.f32.mrb[11].mxu1  ;;  %v1625_v40 = vadd.f32 %v2200_v38, %v1618_v25 }
 0x619   :  { %v1624_v35 = vadd.f32 %v2199_v61, %v1549_v33  ;;  %v1626_v62 = vadd.f32 %v2201_v58, %v1620_v34  ;;  %v2217_v34 = vld [vmem:[%s3691_s0 + $0xf8] sm:$0xff] }
 0x61a   :  { %v2202_v36 = vmul.f32 -1.442695, %v1623_v31 }
 0x61b   :  { %v2203_v37 = vmul.f32 -1.442695, %v1624_v35  ;;  %v2204_v39 = vmul.f32 -1.442695, %v1626_v62 }
 0x61c   :  { %2816 = vpow2.f32 %v2202_v36  ;;  %v2216_v36 = vld [vmem:[%s3691_s0 + $0xf0] sm:$0xff] }
 0x61d   :  { %2818 = vpow2.f32 %v2203_v37 }
 0x61e   :  { %2820 = vpow2.f32 %v2204_v39 }
 0x61f   :  { %2822 = vtanh.f32 %v1625_v40 }
 0x626   :  { %v2817_v41 = vpop.eup %2816 }
 0x627   :  { %v2819_v42 = vpop.eup %2818  ;;  %v1630_v43 = vadd.f32 1.0, %v2817_v41 }
 0x628   :  { %v1636_v44 = vadd.f32 1.0, %v2819_v42  ;;  %v2821_v45 = vpop.eup %2820 }
 0x629   :  { %2824 = vrcp.f32 %v1630_v43  ;;  %v2823_v46 = vpop.eup %2822  ;;  %v1643_v50 = vadd.f32 1.0, %v2821_v45 }
 0x62a   :  { %2826 = vrcp.f32 %v1636_v44 }
 0x62b   :  { %2828 = vrcp.f32 %v1643_v50 }
 0x633   :  { %v2825_v47 = vpop.eup %2824 }
 0x634   :  { %v2827_v48 = vpop.eup %2826  ;;  %v1647_v49 = vmul.f32 %v2825_v47, %v2823_v46 }
 0x635   :  { %v1646_v51 = vmul.f32 %v2827_v48, %v3569_v55  ;;  %v2829_v53 = vpop.eup %2828  ;;  %v2215_v55 = vld [vmem:[%s3691_s0 + $0xe8] sm:$0xff] }
 0x637   :  { %v3622_v52 = vadd.f32 %v1647_v49, %v1646_v51 }
 0x639   :  { %2830 = vtanh.f32 %v3622_v52 }
 0x643   :  { %v2831_v54 = vpop.eup %2830 }
 0x644   :  { %v1650_v27 = vmul.f32 %v2831_v54, %v2829_v53 }
 0x646   :  { %2205 = vst [vmem:[%s3693_s2 + $0x28] sm:$0xff] %v1650_v27  ;;  %1791 = vmatmul.mubr.f32.vlgmr.msra.gmra.mrb[12].mxu0 %v1650_v27  ;;  %1862 = vmatmul.mubr.f32.vlgmr.msra.gmra.mrb[12].mxu1 %v1650_v27 }
 0x647   :  { %2674 = vmatpush1.bf16.msra.mxu0 %v3168_v56  ;;  %2706 = vmatpush1.bf16.msra.mxu1 %v3179_v59  ;;  %v2206_v56 = vld [vmem:[%s3691_s0 + $0xc0] sm:$0xff]  ;;  %v2207_v59 = vld [vmem:[%s3691_s0 + $0xc8] sm:$0xff] }
 0x648   :  { %2676 = vmatprep.subr.bf16.mxu0 %v3170_v60  ;;  %2708 = vmatprep.subr.bf16.mxu1 %v3186_v0 }
 0x649   :  { %2035 = vmatprep.mubr.f32.mxu0 %v2866_v5  ;;  %2106 = vmatprep.mubr.f32.mxu1 %v2866_v5 }
 0x64b   :  { %2678 = vmatpush1.bf16.msra.mxu0 %v3183_v1  ;;  %2710 = vmatpush1.bf16.msra.mxu1 %v3195_v2 }
 0x64c   :  { %2680 = vmatprep.subr.bf16.mxu0 %v3189_v4  ;;  %2712 = vmatprep.subr.bf16.mxu1 %v3199_v3 }
 0x64f   :  { %2682 = vmatpush1.bf16.msra.mxu0 %v3205_v6  ;;  %2714 = vmatpush1.bf16.msra.mxu1 %v3215_v8 }
 0x650   :  { %2684 = vmatprep.subr.bf16.mxu0 %v3209_v7  ;;  %2716 = vmatprep.subr.bf16.mxu1 %v3219_v9  ;;  %v2209_v7 = vld [vmem:[%s3691_s0 + $0xd8] sm:$0xff]  ;;  %v2208_v9 = vld [vmem:[%s3691_s0 + $0xd0] sm:$0xff] }
 0x653   :  { %2686 = vmatpush1.bf16.msra.mxu0 %v3224_v10  ;;  %2718 = vmatpush1.bf16.msra.mxu1 %v3233_v12 }
 0x654   :  { %2688 = vmatprep.subr.bf16.mxu0 %v3228_v11  ;;  %2720 = vmatprep.subr.bf16.mxu1 %v3237_v13 }
 0x657   :  { %2690 = vmatpush1.bf16.msra.mxu0 %v3242_v14  ;;  %2722 = vmatpush1.bf16.msra.mxu1 %v3251_v16 }
 0x658   :  { %2692 = vmatprep.subr.bf16.mxu0 %v3246_v15  ;;  %2724 = vmatprep.subr.bf16.mxu1 %v3255_v17 }
 0x65b   :  { %2694 = vmatpush1.bf16.msra.mxu0 %v3260_v18  ;;  %2726 = vmatpush1.bf16.msra.mxu1 %v3269_v20 }
 0x65c   :  { %2696 = vmatprep.subr.bf16.mxu0 %v3264_v19  ;;  %2728 = vmatprep.subr.bf16.mxu1 %v3273_v21 }
 0x65f   :  { %2698 = vmatpush1.bf16.msra.mxu0 %v3278_v22  ;;  %2730 = vmatpush1.bf16.msra.mxu1 %v3287_v24 }
 0x660   :  { %2700 = vmatprep.subr.bf16.mxu0 %v3282_v23  ;;  %2732 = vmatprep.subr.bf16.mxu1 %v3291_v26 }
 0x663   :  { %2702 = vmatpush1.bf16.msra.mxu0 %v3296_v29  ;;  %2734 = vmatpush1.bf16.msra.mxu1 %v3302_v32  ;;  %v2214_v32 = vld [vmem:[%s3691_s0 + $0xe0] sm:$0xff] }
 0x719   :  { %v1792_v60 = vpop.f32.mrb[12].mxu0  ;;  %v1863_v1 = vpop.f32.mrb[12].mxu1 }
 0x71a   :  { %v1868_v0 = vadd.f32 %v2206_v56, %v1792_v60  ;;  %v1794_v4 = vpop.f32.mrb[13].mxu0  ;;  %v1865_v2 = vpop.f32.mrb[13].mxu1  ;;  %v1870_v11 = vadd.f32 %v2208_v9, %v1863_v1 }
 0x71b   :  { %v1869_v3 = vadd.f32 %v2207_v59, %v1794_v4  ;;  %v1871_v8 = vadd.f32 %v2209_v7, %v1865_v2 }
 0x71c   :  { %v2210_v5 = vmul.f32 -1.442695, %v1868_v0 }
 0x71d   :  { %v2211_v6 = vmul.f32 -1.442695, %v1869_v3  ;;  %v2212_v10 = vmul.f32 -1.442695, %v1871_v8 }
 0x71e   :  { %2832 = vpow2.f32 %v2210_v5 }
 0x71f   :  { %2834 = vpow2.f32 %v2211_v6 }
 0x720   :  { %2836 = vpow2.f32 %v2212_v10 }
 0x721   :  { %2838 = vtanh.f32 %v1870_v11 }
 0x728   :  { %v2833_v12 = vpop.eup %2832 }
 0x729   :  { %v2835_v13 = vpop.eup %2834  ;;  %v1875_v14 = vadd.f32 1.0, %v2833_v12 }
 0x72a   :  { %v1881_v15 = vadd.f32 1.0, %v2835_v13  ;;  %v2837_v16 = vpop.eup %2836 }
 0x72b   :  { %2840 = vrcp.f32 %v1875_v14  ;;  %v2839_v17 = vpop.eup %2838  ;;  %v1888_v21 = vadd.f32 1.0, %v2837_v16 }
 0x72c   :  { %2842 = vrcp.f32 %v1881_v15 }
 0x72d   :  { %2844 = vrcp.f32 %v1888_v21 }
 0x735   :  { %v2841_v18 = vpop.eup %2840 }
 0x736   :  { %v2843_v19 = vpop.eup %2842  ;;  %v1892_v20 = vmul.f32 %v2841_v18, %v2839_v17 }
 0x737   :  { %v1891_v22 = vmul.f32 %v2843_v19, %v3622_v52  ;;  %v2845_v24 = vpop.eup %2844 }
 0x739   :  { %v1893_v23 = vadd.f32 %v1892_v20, %v1891_v22 }
 0x73b   :  { %2846 = vtanh.f32 %v1893_v23 }
 0x745   :  { %v2847_v26 = vpop.eup %2846 }
 0x746   :  { %v1895_v29 = vmul.f32 %v2847_v26, %v2845_v24 }
 0x748   :  { %2213 = vst [vmem:[%s3693_s2 + $0x30] sm:$0xff] %v1895_v29  ;;  %2036 = vmatmul.mubr.f32.vlgmr.msra.gmra.mrb[14].mxu0 %v1895_v29  ;;  %2107 = vmatmul.mubr.f32.vlgmr.msra.gmra.mrb[14].mxu1 %v1895_v29 }
 0x81b   :  { %v2037_v28 = vpop.f32.mrb[14].mxu0  ;;  %v2108_v30 = vpop.f32.mrb[14].mxu1 }
 0x81c   :  { %v2113_v57 = vadd.f32 %v2214_v32, %v2037_v28  ;;  %v2039_v61 = vpop.f32.mrb[15].mxu0  ;;  %v2110_v63 = vpop.f32.mrb[15].mxu1  ;;  %v2115_v58 = vadd.f32 %v2216_v36, %v2108_v30 }
 0x81d   :  { %v2114_v25 = vadd.f32 %v2215_v55, %v2039_v61  ;;  %v2116_v35 = vadd.f32 %v2217_v34, %v2110_v63 }
 0x81e   :  { %v2218_v31 = vmul.f32 -1.442695, %v2113_v57 }
 0x81f   :  { %v2219_v33 = vmul.f32 -1.442695, %v2114_v25  ;;  %v2220_v37 = vmul.f32 -1.442695, %v2116_v35 }
 0x820   :  { %2848 = vpow2.f32 %v2218_v31 }
 0x821   :  { %2850 = vpow2.f32 %v2219_v33 }
 0x822   :  { %2852 = vpow2.f32 %v2220_v37 }
 0x823   :  { %2854 = vtanh.f32 %v2115_v58 }
 0x82a   :  { %v2849_v62 = vpop.eup %2848 }
 0x82b   :  { %v2851_v38 = vpop.eup %2850  ;;  %v2120_v39 = vadd.f32 1.0, %v2849_v62 }
 0x82c   :  { %v2126_v40 = vadd.f32 1.0, %v2851_v38  ;;  %v2853_v41 = vpop.eup %2852 }
 0x82d   :  { %2856 = vrcp.f32 %v2120_v39  ;;  %v2855_v42 = vpop.eup %2854  ;;  %v2133_v46 = vadd.f32 1.0, %v2853_v41 }
 0x82e   :  { %2858 = vrcp.f32 %v2126_v40 }
 0x82f   :  { %2860 = vrcp.f32 %v2133_v46 }
 0x837   :  { %v2857_v43 = vpop.eup %2856 }
 0x838   :  { %v2859_v44 = vpop.eup %2858  ;;  %v2137_v45 = vmul.f32 %v2857_v43, %v2855_v42 }
 0x839   :  { %v2136_v47 = vmul.f32 %v2859_v44, %v1893_v23  ;;  %v2861_v49 = vpop.eup %2860 }
 0x83b   :  { %v2138_v48 = vadd.f32 %v2137_v45, %v2136_v47 }
 0x83d   :  { %2862 = vtanh.f32 %v2138_v48 }
 0x847   :  { %v2863_v50 = vpop.eup %2862 }
 0x848   :  { %v2140_v51 = vmul.f32 %v2863_v50, %v2861_v49 }
 0x84a   :  { %2221 = vst [vmem:[%s3693_s2 + $0x38] sm:$0xff] %v2140_v51 }
 0x84b   :  { %2149 = vsyncmov [#allocation5] }
 0x84e   :  { %s2150_s17 = vpop.sfrf %2149 }
 0x84f   :  { %p2222_p0 = scmp.ne.s32.totalorder %s2150_s17, 0 }
 0x851   :  { %2154 = shalt.err (%p2222_p0)  }

// kernel: lstm_model_forward.7
= control target key start
LH: loop header
LB: loop body
LE: loop exit
PB: predicated region body
PF: predicated region fallthrough
CT: control target
= control target key end

     0   :  { %s3910_s0 = inlined_call_operand.vmem [shape: f32[8,8,512], index: 0, kind: input, shape index: {}]   ;;  %s3911_s1 = inlined_call_operand.vmem [shape: f32[128,512], index: 1, kind: input, shape index: {}]   ;;  %s3912_s2 = inlined_call_operand.vmem [shape: f32[128,128], index: 2, kind: input, shape index: {}]   ;;  %s3913_s3 = inlined_call_operand.vmem [shape: f32[1,128], index: 3, kind: input, shape index: {}]   ;;  %s3914_s4 = inlined_call_operand.vmem [shape: f32[8,128], index: 4, kind: output, shape index: {}]  }
   0x1   :  { %v3069_v0 = vld [vmem:[%s3911_s1] sm:$0xff]  ;;  %v3074_v1 = vld [vmem:[%s3911_s1 + $0x8] sm:$0xff]  ;;  %v3079_v2 = vld [vmem:[%s3911_s1 + $0x10] sm:$0xff] }
   0x2   :  { %v3084_v3 = vld [vmem:[%s3911_s1 + $0x18] sm:$0xff]  ;;  %v59_v4 = vld [vmem:[%s3911_s1 + $0x20] sm:$0xff]  ;;  %v61_v5 = vld [vmem:[%s3911_s1 + $0x28] sm:$0xff] }
   0x3   :  { %v3095_v6 = vld [vmem:[%s3911_s1 + $0x30] sm:$0xff]  ;;  %v3100_v7 = vld [vmem:[%s3911_s1 + $0x38] sm:$0xff]  ;;  %v3105_v8 = vld [vmem:[%s3911_s1 + $0x40] sm:$0xff] }
   0x4   :  { %v69_v9 = vld [vmem:[%s3911_s1 + $0x48] sm:$0xff]  ;;  %v3113_v10 = vld [vmem:[%s3911_s1 + $0x50] sm:$0xff]  ;;  %v3118_v11 = vld [vmem:[%s3911_s1 + $0x58] sm:$0xff] }
   0x5   :  { %v75_v12 = vld [vmem:[%s3911_s1 + $0x60] sm:$0xff]  ;;  %v77_v13 = vld [vmem:[%s3911_s1 + $0x68] sm:$0xff]  ;;  %v3129_v14 = vld [vmem:[%s3911_s1 + $0x70] sm:$0xff] }
   0x6   :  { %v81_v15 = vld [vmem:[%s3911_s1 + $0x78] sm:$0xff]  ;;  %v3137_v16 = vld [vmem:[%s3911_s1 + $0x80] sm:$0xff]  ;;  %v85_v17 = vld [vmem:[%s3911_s1 + $0x88] sm:$0xff] }
   0x7   :  { %v3145_v18 = vld [vmem:[%s3911_s1 + $0x90] sm:$0xff]  ;;  %v3150_v19 = vld [vmem:[%s3911_s1 + $0x98] sm:$0xff]  ;;  %v3155_v20 = vld [vmem:[%s3911_s1 + $0xa0] sm:$0xff] }
   0x8   :  { %v93_v21 = vld [vmem:[%s3911_s1 + $0xa8] sm:$0xff]  ;;  %v3163_v22 = vld [vmem:[%s3911_s1 + $0xb0] sm:$0xff]  ;;  %v97_v23 = vld [vmem:[%s3911_s1 + $0xb8] sm:$0xff] }
   0x9   :  { %v3171_v24 = vld [vmem:[%s3911_s1 + $0xc0] sm:$0xff]  ;;  %v3176_v25 = vld [vmem:[%s3911_s1 + $0xc8] sm:$0xff]  ;;  %v3181_v26 = vld [vmem:[%s3911_s1 + $0xd0] sm:$0xff] }
   0xa   :  { %v3186_v27 = vld [vmem:[%s3911_s1 + $0xd8] sm:$0xff]  ;;  %v3191_v28 = vld [vmem:[%s3911_s1 + $0xe0] sm:$0xff]  ;;  %v109_v29 = vld [vmem:[%s3911_s1 + $0xe8] sm:$0xff] }
   0xb   :  { %v3199_v30 = vld [vmem:[%s3911_s1 + $0xf0] sm:$0xff]  ;;  %v113_v31 = vld [vmem:[%s3911_s1 + $0xf8] sm:$0xff]  ;;  %v3207_v32 = vld [vmem:[%s3911_s1 + $0x100] sm:$0xff] }
   0xc   :  { %v3212_v33 = vld [vmem:[%s3911_s1 + $0x108] sm:$0xff]  ;;  %v3217_v34 = vld [vmem:[%s3911_s1 + $0x110] sm:$0xff]  ;;  %v3222_v35 = vld [vmem:[%s3911_s1 + $0x118] sm:$0xff] }
   0xd   :  { %v3227_v36 = vld [vmem:[%s3911_s1 + $0x120] sm:$0xff]  ;;  %v125_v37 = vld [vmem:[%s3911_s1 + $0x128] sm:$0xff]  ;;  %v3235_v38 = vld [vmem:[%s3911_s1 + $0x130] sm:$0xff] }
   0xe   :  { %v129_v39 = vld [vmem:[%s3911_s1 + $0x138] sm:$0xff]  ;;  %v3243_v40 = vld [vmem:[%s3911_s1 + $0x140] sm:$0xff]  ;;  %v3248_v41 = vld [vmem:[%s3911_s1 + $0x148] sm:$0xff] }
   0xf   :  { %v3253_v42 = vld [vmem:[%s3911_s1 + $0x150] sm:$0xff]  ;;  %v3258_v43 = vld [vmem:[%s3911_s1 + $0x158] sm:$0xff]  ;;  %v3263_v44 = vld [vmem:[%s3911_s1 + $0x160] sm:$0xff] }
  0x10   :  { %v141_v45 = vld [vmem:[%s3911_s1 + $0x168] sm:$0xff]  ;;  %v3271_v46 = vld [vmem:[%s3911_s1 + $0x170] sm:$0xff]  ;;  %v145_v47 = vld [vmem:[%s3911_s1 + $0x178] sm:$0xff] }
  0x11   :  { %v3279_v48 = vld [vmem:[%s3911_s1 + $0x180] sm:$0xff]  ;;  %v3284_v49 = vld [vmem:[%s3911_s1 + $0x188] sm:$0xff]  ;;  %v3289_v50 = vld [vmem:[%s3911_s1 + $0x190] sm:$0xff] }
  0x12   :  { %v3294_v51 = vld [vmem:[%s3911_s1 + $0x198] sm:$0xff]  ;;  %v3299_v52 = vld [vmem:[%s3911_s1 + $0x1a0] sm:$0xff]  ;;  %v157_v53 = vld [vmem:[%s3911_s1 + $0x1a8] sm:$0xff] }
  0x13   :  { %v3307_v54 = vld [vmem:[%s3911_s1 + $0x1b0] sm:$0xff]  ;;  %v161_v55 = vld [vmem:[%s3911_s1 + $0x1b8] sm:$0xff]  ;;  %v3315_v56 = vld [vmem:[%s3911_s1 + $0x1c0] sm:$0xff] }
  0x14   :  { %3915 = vst [vmem:[#allocation8_spill] sm:$0xff] %v3315_v56  ;;  %v3320_v57 = vld [vmem:[%s3911_s1 + $0x1c8] sm:$0xff]  ;;  %v3325_v58 = vld [vmem:[%s3911_s1 + $0x1d0] sm:$0xff]  ;;  %v3330_v59 = vld [vmem:[%s3911_s1 + $0x1d8] sm:$0xff] }
  0x15   :  { %3916 = vst [vmem:[#allocation9_spill] sm:$0xff] %v3325_v58  ;;  %3917 = vst [vmem:[#allocation10_spill] sm:$0xff] %v3330_v59  ;;  %v3335_v60 = vld [vmem:[%s3911_s1 + $0x1e0] sm:$0xff]  ;;  %v173_v61 = vld [vmem:[%s3911_s1 + $0x1e8] sm:$0xff] }
  0x16   :  { %3918 = vst [vmem:[#allocation11_spill] sm:$0xff] %v3335_v60  ;;  %v3343_v62 = vld [vmem:[%s3911_s1 + $0x1f0] sm:$0xff]  ;;  %v177_v63 = vld [vmem:[%s3911_s1 + $0x1f8] sm:$0xff] }
  0x17   :  { %3919 = vst [vmem:[#allocation12_spill] sm:$0xff] %v3343_v62 }
  0x18   :  { %186 = vsyncadd [#allocation5], 8192  ;;  %v3349_v58 = vpack.c.bf16 %v61_v5, %v3074_v1  ;;  %v3352_v56 = vpack.c.bf16 %v59_v4, %v3069_v0  ;;  %v3354_v60 = vpack.c.bf16 %v77_v13, %v69_v9 }
  0x19   :  { %3036 = dma.done.wait [#allocation5], 8192 }
  0x1a   :  { %3037 = vsyncadd [#allocation5], 4294959104  ;;  %2366 = vmatprep.subr.bf16.mxu0 %v3349_v58  ;;  %v3359_v62 = vpack.c.bf16 %v3100_v7, %v3084_v3  ;;  %v3363_v59 = vpack.c.bf16 %v3095_v6, %v3079_v2  ;;  %v3367_v1 = vpack.c.bf16 %v75_v12, %v3105_v8  ;;  %v3370_v0 = vpack.c.bf16 %v81_v15, %v3118_v11 }
  0x1b   :  { %2368 = vmatpush1.bf16.msra.mxu0 %v3352_v56  ;;  %v3373_v4 = vpack.c.bf16 %v93_v21, %v85_v17  ;;  %v3379_v2 = vpack.c.bf16 %v3129_v14, %v3113_v10  ;;  %v3383_v3 = vpack.c.bf16 %v97_v23, %v3150_v19  ;;  %v3038_v5 = vmov 0.0  }
  0x1c   :  { %2370 = vmatprep.subr.bf16.mxu0 %v3354_v60  ;;  %2398 = vmatprep.subr.bf16.mxu1 %v3359_v62  ;;  %v3389_v6 = vpack.c.bf16 %v3155_v20, %v3137_v16  ;;  %v3393_v7 = vpack.c.bf16 %v109_v29, %v3176_v25  ;;  %v3399_v8 = vpack.c.bf16 %v3163_v22, %v3145_v18  ;;  %v3920_v25 = vld [vmem:[#allocation10_spill] sm:$0xff]  ;;  %vm3040_vm0 = vmmov 0  }
  0x1d   :  { %2400 = vmatpush1.bf16.msra.mxu1 %v3363_v59  ;;  %327 = vmatprep.mubr.f32.mxu0 %v3038_v5  ;;  %v3403_v9 = vpack.c.bf16 %v113_v31, %v3186_v27  ;;  %v3408_v10 = vpack.c.bf16 %v3191_v28, %v3171_v24  ;;  %v3412_v11 = vpack.c.bf16 %v125_v37, %v3212_v33  ;;  %v3921_v27 = vld [vmem:[#allocation8_spill] sm:$0xff]  ;;  %v3922_v28 = vld [vmem:[#allocation11_spill] sm:$0xff] }
  0x1e   :  { %2402 = vmatprep.subr.bf16.mxu1 %v3370_v0  ;;  %398 = vmatprep.mubr.f32.mxu1 %v3038_v5  ;;  %v3417_v12 = vpack.c.bf16 %v3199_v30, %v3181_v26  ;;  %v3421_v13 = vpack.c.bf16 %v129_v39, %v3222_v35  ;;  %v3426_v14 = vpack.c.bf16 %v3227_v36, %v3207_v32  ;;  %v3923_v30 = vld [vmem:[#allocation9_spill] sm:$0xff]  ;;  %v3924_v31 = vld [vmem:[#allocation12_spill] sm:$0xff] }
  0x1f   :  { %2372 = vmatpush1.bf16.msra.mxu0 %v3367_v1  ;;  %v3430_v15 = vpack.c.bf16 %v141_v45, %v3248_v41  ;;  %v3435_v16 = vpack.c.bf16 %v3235_v38, %v3217_v34  ;;  %v3439_v17 = vpack.c.bf16 %v145_v47, %v3258_v43  ;;  %v3444_v18 = vpack.c.bf16 %v3263_v44, %v3243_v40  ;;  %v195_v33 = vld [vmem:[%s3910_s0] sm:$0xff]  ;;  %v196_v34 = vld [vmem:[%s3910_s0 + $0x8] sm:$0xff]  ;;  %v198_v43 = vld [vmem:[%s3910_s0 + $0x18] sm:$0xff] }
  0x20   :  { %2374 = vmatprep.subr.bf16.mxu0 %v3373_v4  ;;  %v3448_v19 = vpack.c.bf16 %v157_v53, %v3284_v49  ;;  %v3453_v20 = vpack.c.bf16 %v3271_v46, %v3253_v42  ;;  %v3457_v21 = vpack.c.bf16 %v161_v55, %v3294_v51  ;;  %v3462_v22 = vpack.c.bf16 %v3299_v52, %v3279_v48  ;;  %v197_v45 = vld [vmem:[%s3910_s0 + $0x10] sm:$0xff] }
  0x21   :  { %2404 = vmatpush1.bf16.msra.mxu1 %v3379_v2  ;;  %v3466_v23 = vpack.c.bf16 %v173_v61, %v3320_v57  ;;  %v3471_v24 = vpack.c.bf16 %v3307_v54, %v3289_v50  ;;  %v3475_v26 = vpack.c.bf16 %v177_v63, %v3920_v25  ;;  %v3480_v29 = vpack.c.bf16 %v3922_v28, %v3921_v27 }
  0x22   :  { %2406 = vmatprep.subr.bf16.mxu1 %v3383_v3  ;;  %v3486_v32 = vpack.c.bf16 %v3924_v31, %v3923_v30  ;;  %v2261_v31 = vld [vmem:[%s3910_s0 + $0x20] sm:$0xff] }
  0x23   :  { %2376 = vmatpush1.bf16.msra.mxu0 %v3389_v6 }
  0x24   :  { %2378 = vmatprep.subr.bf16.mxu0 %v3393_v7 }
  0x25   :  { %2408 = vmatpush1.bf16.msra.mxu1 %v3399_v8 }
  0x26   :  { %2410 = vmatprep.subr.bf16.mxu1 %v3403_v9 }
  0x27   :  { %2380 = vmatpush1.bf16.msra.mxu0 %v3408_v10 }
  0x28   :  { %2382 = vmatprep.subr.bf16.mxu0 %v3412_v11 }
  0x29   :  { %2412 = vmatpush1.bf16.msra.mxu1 %v3417_v12 }
  0x2a   :  { %2414 = vmatprep.subr.bf16.mxu1 %v3421_v13 }
  0x2b   :  { %2384 = vmatpush1.bf16.msra.mxu0 %v3426_v14 }
  0x2c   :  { %2386 = vmatprep.subr.bf16.mxu0 %v3430_v15 }
  0x2d   :  { %2416 = vmatpush1.bf16.msra.mxu1 %v3435_v16 }
  0x2e   :  { %2418 = vmatprep.subr.bf16.mxu1 %v3439_v17 }
  0x2f   :  { %2388 = vmatpush1.bf16.msra.mxu0 %v3444_v18 }
  0x30   :  { %2390 = vmatprep.subr.bf16.mxu0 %v3448_v19 }
  0x31   :  { %2420 = vmatpush1.bf16.msra.mxu1 %v3453_v20 }
  0x32   :  { %2422 = vmatprep.subr.bf16.mxu1 %v3457_v21 }
  0x33   :  { %2392 = vmatpush1.bf16.msra.mxu0 %v3462_v22 }
  0x34   :  { %2394 = vmatprep.subr.bf16.mxu0 %v3466_v23 }
  0x35   :  { %2424 = vmatpush1.bf16.msra.mxu1 %v3471_v24 }
  0x36   :  { %2426 = vmatprep.subr.bf16.mxu1 %v3475_v26 }
  0x37   :  { %2396 = vmatpush1.bf16.msra.mxu0 %v3480_v29 }
  0x38   :  { %2430 = vmatprep.subr.bf16.mxu0 %v3349_v58 }
  0x39   :  { %2428 = vmatpush1.bf16.msra.mxu1 %v3486_v32 }
  0x3a   :  { %328 = vmatmul.mubr.f32.vlgmr.msra.gmra.mrb[0].mxu0 %v3038_v5  ;;  %2462 = vmatprep.subr.bf16.mxu1 %v3359_v62 }
  0x3b   :  { %2432 = vmatpush1.bf16.msra.mxu0 %v3352_v56  ;;  %570 = vmatprep.mubr.f32.mxu0 %v3038_v5 }
  0x3c   :  { %399 = vmatmul.mubr.f32.vlgmr.msra.gmra.mrb[0].mxu1 %v3038_v5  ;;  %2434 = vmatprep.subr.bf16.mxu0 %v3354_v60 }
  0x3d   :  { %2464 = vmatpush1.bf16.msra.mxu1 %v3363_v59  ;;  %641 = vmatprep.mubr.f32.mxu1 %v3038_v5 }
  0x3e   :  { %2466 = vmatprep.subr.bf16.mxu1 %v3370_v0 }
  0x3f   :  { %2436 = vmatpush1.bf16.msra.mxu0 %v3367_v1 }
  0x40   :  { %2438 = vmatprep.subr.bf16.mxu0 %v3373_v4 }
  0x41   :  { %2468 = vmatpush1.bf16.msra.mxu1 %v3379_v2 }
  0x42   :  { %2470 = vmatprep.subr.bf16.mxu1 %v3383_v3 }
  0x43   :  { %2440 = vmatpush1.bf16.msra.mxu0 %v3389_v6 }
  0x44   :  { %2442 = vmatprep.subr.bf16.mxu0 %v3393_v7 }
  0x45   :  { %2472 = vmatpush1.bf16.msra.mxu1 %v3399_v8 }
  0x46   :  { %2474 = vmatprep.subr.bf16.mxu1 %v3403_v9 }
  0x47   :  { %2444 = vmatpush1.bf16.msra.mxu0 %v3408_v10 }
  0x48   :  { %2446 = vmatprep.subr.bf16.mxu0 %v3412_v11 }
  0x49   :  { %2476 = vmatpush1.bf16.msra.mxu1 %v3417_v12 }
  0x4a   :  { %2478 = vmatprep.subr.bf16.mxu1 %v3421_v13 }
  0x4b   :  { %2448 = vmatpush1.bf16.msra.mxu0 %v3426_v14 }
  0x4c   :  { %2450 = vmatprep.subr.bf16.mxu0 %v3430_v15 }
  0x4d   :  { %2480 = vmatpush1.bf16.msra.mxu1 %v3435_v16 }
  0x4e   :  { %2482 = vmatprep.subr.bf16.mxu1 %v3439_v17 }
  0x4f   :  { %2452 = vmatpush1.bf16.msra.mxu0 %v3444_v18 }
  0x50   :  { %2454 = vmatprep.subr.bf16.mxu0 %v3448_v19 }
  0x51   :  { %2484 = vmatpush1.bf16.msra.mxu1 %v3453_v20 }
  0x52   :  { %2486 = vmatprep.subr.bf16.mxu1 %v3457_v21 }
  0x53   :  { %2456 = vmatpush1.bf16.msra.mxu0 %v3462_v22 }
  0x54   :  { %2458 = vmatprep.subr.bf16.mxu0 %v3466_v23 }
  0x55   :  { %2488 = vmatpush1.bf16.msra.mxu1 %v3471_v24 }
  0x56   :  { %2490 = vmatprep.subr.bf16.mxu1 %v3475_v26 }
  0x57   :  { %2460 = vmatpush1.bf16.msra.mxu0 %v3480_v29 }
  0x58   :  { %2494 = vmatprep.subr.bf16.mxu0 %v3349_v58 }
  0x59   :  { %2492 = vmatpush1.bf16.msra.mxu1 %v3486_v32 }
  0x5a   :  { %2526 = vmatprep.subr.bf16.mxu1 %v3359_v62 }
 0x10d   :  { %v329_v35 = vpop.f32.mrb[0].mxu0 }
 0x10e   :  { %v405_v36 = vadd.f32 %v329_v35, %v195_v33  ;;  %v331_v37 = vpop.f32.mrb[1].mxu0  ;;  %v2262_v33 = vld [vmem:[%s3910_s0 + $0x28] sm:$0xff] }
 0x10f   :  { %v406_v38 = vadd.f32 %v331_v37, %v196_v34  ;;  %v400_v39 = vpop.f32.mrb[0].mxu1 }
 0x110   :  { %v2258_v40 = vmul.f32 -1.442695, %v405_v36  ;;  %v402_v41 = vpop.f32.mrb[1].mxu1  ;;  %v407_v47 = vadd.f32 %v400_v39, %v197_v45 }
 0x111   :  { %v2259_v42 = vmul.f32 -1.442695, %v406_v38  ;;  %v408_v44 = vadd.f32 %v402_v41, %v198_v43 }
 0x112   :  { %2904 = vpow2.f32 %v2258_v40 }
 0x113   :  { %2906 = vpow2.f32 %v2259_v42  ;;  %v2260_v46 = vmul.f32 -1.442695, %v408_v44  ;;  %v2264_v42 = vld [vmem:[%s3910_s0 + $0x38] sm:$0xff]  ;;  %v2263_v44 = vld [vmem:[%s3910_s0 + $0x30] sm:$0xff] }
 0x115   :  { %2908 = vpow2.f32 %v2260_v46 }
 0x116   :  { %2910 = vtanh.f32 %v407_v47 }
 0x11c   :  { %v2905_v48 = vpop.eup %2904 }
 0x11d   :  { %v2907_v49 = vpop.eup %2906  ;;  %v412_v50 = vadd.f32 1.0, %v2905_v48 }
 0x11e   :  { %v418_v51 = vadd.f32 1.0, %v2907_v49 }
 0x11f   :  { %2912 = vrcp.f32 %v412_v50  ;;  %v2909_v52 = vpop.eup %2908 }
 0x120   :  { %2914 = vrcp.f32 %v418_v51  ;;  %v2911_v53 = vpop.eup %2910  ;;  %v425_v55 = vadd.f32 1.0, %v2909_v52 }
 0x122   :  { %2916 = vrcp.f32 %v425_v55 }
 0x129   :  { %v2913_v54 = vpop.eup %2912 }
 0x12a   :  { %v2915_v57 = vpop.eup %2914  ;;  %v429_v61 = vmul.f32 %v2913_v54, %v2911_v53 }
 0x12b   :  { %v428_v63 = vmul.f32 0.0, %v2915_v57 }
 0x12c   :  { %v2917_v27 = vpop.eup %2916 }
 0x12d   :  { %v3541_v25 = vadd.f32 %v429_v61, %v428_v63 }
 0x12f   :  { %2918 = vtanh.f32 %v3541_v25 }
 0x139   :  { %v2919_v28 = vpop.eup %2918 }
 0x13a   :  { %v432_v30 = vmul.f32 %v2919_v28, %v2917_v27 }
 0x13c   :  { %571 = vmatmul.mubr.f32.vlgmr.msra.gmra.mrb[2].mxu0 %v432_v30  ;;  %642 = vmatmul.mubr.f32.vlgmr.msra.gmra.mrb[2].mxu1 %v432_v30 }
 0x13d   :  { %2496 = vmatpush1.bf16.msra.mxu0 %v3352_v56  ;;  %2528 = vmatpush1.bf16.msra.mxu1 %v3363_v59 }
 0x13e   :  { %2498 = vmatprep.subr.bf16.mxu0 %v3354_v60  ;;  %2530 = vmatprep.subr.bf16.mxu1 %v3370_v0 }
 0x13f   :  { %813 = vmatprep.mubr.f32.mxu0 %v3038_v5  ;;  %884 = vmatprep.mubr.f32.mxu1 %v3038_v5 }
 0x141   :  { %2500 = vmatpush1.bf16.msra.mxu0 %v3367_v1  ;;  %2532 = vmatpush1.bf16.msra.mxu1 %v3379_v2 }
 0x142   :  { %2502 = vmatprep.subr.bf16.mxu0 %v3373_v4  ;;  %2534 = vmatprep.subr.bf16.mxu1 %v3383_v3 }
 0x145   :  { %2504 = vmatpush1.bf16.msra.mxu0 %v3389_v6  ;;  %2536 = vmatpush1.bf16.msra.mxu1 %v3399_v8 }
 0x146   :  { %2506 = vmatprep.subr.bf16.mxu0 %v3393_v7  ;;  %2538 = vmatprep.subr.bf16.mxu1 %v3403_v9 }
 0x149   :  { %2508 = vmatpush1.bf16.msra.mxu0 %v3408_v10  ;;  %2540 = vmatpush1.bf16.msra.mxu1 %v3417_v12 }
 0x14a   :  { %2510 = vmatprep.subr.bf16.mxu0 %v3412_v11  ;;  %2542 = vmatprep.subr.bf16.mxu1 %v3421_v13 }
 0x14d   :  { %2512 = vmatpush1.bf16.msra.mxu0 %v3426_v14  ;;  %2544 = vmatpush1.bf16.msra.mxu1 %v3435_v16 }
 0x14e   :  { %2514 = vmatprep.subr.bf16.mxu0 %v3430_v15  ;;  %2546 = vmatprep.subr.bf16.mxu1 %v3439_v17 }
 0x151   :  { %2516 = vmatpush1.bf16.msra.mxu0 %v3444_v18  ;;  %2548 = vmatpush1.bf16.msra.mxu1 %v3453_v20 }
 0x152   :  { %2518 = vmatprep.subr.bf16.mxu0 %v3448_v19  ;;  %2550 = vmatprep.subr.bf16.mxu1 %v3457_v21 }
 0x155   :  { %2520 = vmatpush1.bf16.msra.mxu0 %v3462_v22  ;;  %2552 = vmatpush1.bf16.msra.mxu1 %v3471_v24 }
 0x156   :  { %2522 = vmatprep.subr.bf16.mxu0 %v3466_v23  ;;  %2554 = vmatprep.subr.bf16.mxu1 %v3475_v26 }
 0x159   :  { %2524 = vmatpush1.bf16.msra.mxu0 %v3480_v29  ;;  %2556 = vmatpush1.bf16.msra.mxu1 %v3486_v32 }
 0x15a   :  { %2558 = vmatprep.subr.bf16.mxu0 %v3349_v58  ;;  %2590 = vmatprep.subr.bf16.mxu1 %v3359_v62 }
 0x20f   :  { %v572_v34 = vpop.f32.mrb[2].mxu0  ;;  %v643_v35 = vpop.f32.mrb[2].mxu1 }
 0x210   :  { %v648_v36 = vadd.f32 %v2261_v31, %v572_v34  ;;  %v574_v37 = vpop.f32.mrb[3].mxu0  ;;  %v645_v38 = vpop.f32.mrb[3].mxu1  ;;  %v650_v46 = vadd.f32 %v2263_v44, %v643_v35  ;;  %v2269_v31 = vld [vmem:[%s3910_s0 + $0x48] sm:$0xff] }
 0x211   :  { %v649_v39 = vadd.f32 %v2262_v33, %v574_v37  ;;  %v651_v43 = vadd.f32 %v2264_v42, %v645_v38 }
 0x212   :  { %v2265_v40 = vmul.f32 -1.442695, %v648_v36 }
 0x213   :  { %v2266_v41 = vmul.f32 -1.442695, %v649_v39  ;;  %v2267_v45 = vmul.f32 -1.442695, %v651_v43  ;;  %v2270_v43 = vld [vmem:[%s3910_s0 + $0x50] sm:$0xff] }
 0x214   :  { %2920 = vpow2.f32 %v2265_v40 }
 0x215   :  { %2922 = vpow2.f32 %v2266_v41  ;;  %v2271_v41 = vld [vmem:[%s3910_s0 + $0x58] sm:$0xff] }
 0x216   :  { %2924 = vpow2.f32 %v2267_v45 }
 0x217   :  { %2926 = vtanh.f32 %v650_v46 }
 0x21e   :  { %v2921_v47 = vpop.eup %2920 }
 0x21f   :  { %v2923_v48 = vpop.eup %2922  ;;  %v655_v49 = vadd.f32 1.0, %v2921_v47 }
 0x220   :  { %v661_v50 = vadd.f32 1.0, %v2923_v48  ;;  %v2925_v51 = vpop.eup %2924 }
 0x221   :  { %2928 = vrcp.f32 %v655_v49  ;;  %v2927_v52 = vpop.eup %2926  ;;  %v668_v57 = vadd.f32 1.0, %v2925_v51 }
 0x222   :  { %2930 = vrcp.f32 %v661_v50 }
 0x223   :  { %2932 = vrcp.f32 %v668_v57 }
 0x22b   :  { %v2929_v53 = vpop.eup %2928 }
 0x22c   :  { %v2931_v54 = vpop.eup %2930  ;;  %v672_v55 = vmul.f32 %v2929_v53, %v2927_v52 }
 0x22d   :  { %v671_v61 = vmul.f32 %v2931_v54, %v3541_v25  ;;  %v2933_v27 = vpop.eup %2932  ;;  %v2268_v25 = vld [vmem:[%s3910_s0 + $0x40] sm:$0xff] }
 0x22f   :  { %v3591_v63 = vadd.f32 %v672_v55, %v671_v61 }
 0x231   :  { %2934 = vtanh.f32 %v3591_v63 }
 0x23b   :  { %v2935_v28 = vpop.eup %2934 }
 0x23c   :  { %v675_v30 = vmul.f32 %v2935_v28, %v2933_v27 }
 0x23e   :  { %814 = vmatmul.mubr.f32.vlgmr.msra.gmra.mrb[4].mxu0 %v675_v30  ;;  %885 = vmatmul.mubr.f32.vlgmr.msra.gmra.mrb[4].mxu1 %v675_v30 }
 0x23f   :  { %2560 = vmatpush1.bf16.msra.mxu0 %v3352_v56  ;;  %2592 = vmatpush1.bf16.msra.mxu1 %v3363_v59 }
 0x240   :  { %2562 = vmatprep.subr.bf16.mxu0 %v3354_v60  ;;  %2594 = vmatprep.subr.bf16.mxu1 %v3370_v0 }
 0x241   :  { %1056 = vmatprep.mubr.f32.mxu0 %v3038_v5  ;;  %1127 = vmatprep.mubr.f32.mxu1 %v3038_v5 }
 0x243   :  { %2564 = vmatpush1.bf16.msra.mxu0 %v3367_v1  ;;  %2596 = vmatpush1.bf16.msra.mxu1 %v3379_v2 }
 0x244   :  { %2566 = vmatprep.subr.bf16.mxu0 %v3373_v4  ;;  %2598 = vmatprep.subr.bf16.mxu1 %v3383_v3 }
 0x247   :  { %2568 = vmatpush1.bf16.msra.mxu0 %v3389_v6  ;;  %2600 = vmatpush1.bf16.msra.mxu1 %v3399_v8 }
 0x248   :  { %2570 = vmatprep.subr.bf16.mxu0 %v3393_v7  ;;  %2602 = vmatprep.subr.bf16.mxu1 %v3403_v9 }
 0x24b   :  { %2572 = vmatpush1.bf16.msra.mxu0 %v3408_v10  ;;  %2604 = vmatpush1.bf16.msra.mxu1 %v3417_v12 }
 0x24c   :  { %2574 = vmatprep.subr.bf16.mxu0 %v3412_v11  ;;  %2606 = vmatprep.subr.bf16.mxu1 %v3421_v13 }
 0x24f   :  { %2576 = vmatpush1.bf16.msra.mxu0 %v3426_v14  ;;  %2608 = vmatpush1.bf16.msra.mxu1 %v3435_v16 }
 0x250   :  { %2578 = vmatprep.subr.bf16.mxu0 %v3430_v15  ;;  %2610 = vmatprep.subr.bf16.mxu1 %v3439_v17 }
 0x253   :  { %2580 = vmatpush1.bf16.msra.mxu0 %v3444_v18  ;;  %2612 = vmatpush1.bf16.msra.mxu1 %v3453_v20 }
 0x254   :  { %2582 = vmatprep.subr.bf16.mxu0 %v3448_v19  ;;  %2614 = vmatprep.subr.bf16.mxu1 %v3457_v21 }
 0x257   :  { %2584 = vmatpush1.bf16.msra.mxu0 %v3462_v22  ;;  %2616 = vmatpush1.bf16.msra.mxu1 %v3471_v24 }
 0x258   :  { %2586 = vmatprep.subr.bf16.mxu0 %v3466_v23  ;;  %2618 = vmatprep.subr.bf16.mxu1 %v3475_v26 }
 0x25b   :  { %2588 = vmatpush1.bf16.msra.mxu0 %v3480_v29  ;;  %2620 = vmatpush1.bf16.msra.mxu1 %v3486_v32 }
 0x25c   :  { %2622 = vmatprep.subr.bf16.mxu0 %v3349_v58  ;;  %2654 = vmatprep.subr.bf16.mxu1 %v3359_v62 }
 0x311   :  { %v815_v33 = vpop.f32.mrb[4].mxu0  ;;  %v886_v34 = vpop.f32.mrb[4].mxu1 }
 0x312   :  { %v891_v35 = vadd.f32 %v2268_v25, %v815_v33  ;;  %v817_v36 = vpop.f32.mrb[5].mxu0  ;;  %v888_v37 = vpop.f32.mrb[5].mxu1  ;;  %v893_v45 = vadd.f32 %v2270_v43, %v886_v34  ;;  %v2276_v25 = vld [vmem:[%s3910_s0 + $0x68] sm:$0xff] }
 0x313   :  { %v892_v38 = vadd.f32 %v2269_v31, %v817_v36  ;;  %v894_v42 = vadd.f32 %v2271_v41, %v888_v37 }
 0x314   :  { %v2272_v39 = vmul.f32 -1.442695, %v891_v35 }
 0x315   :  { %v2273_v40 = vmul.f32 -1.442695, %v892_v38  ;;  %v2274_v44 = vmul.f32 -1.442695, %v894_v42  ;;  %v2277_v42 = vld [vmem:[%s3910_s0 + $0x70] sm:$0xff] }
 0x316   :  { %2936 = vpow2.f32 %v2272_v39 }
 0x317   :  { %2938 = vpow2.f32 %v2273_v40  ;;  %v2278_v40 = vld [vmem:[%s3910_s0 + $0x78] sm:$0xff] }
 0x318   :  { %2940 = vpow2.f32 %v2274_v44 }
 0x319   :  { %2942 = vtanh.f32 %v893_v45 }
 0x320   :  { %v2937_v46 = vpop.eup %2936 }
 0x321   :  { %v2939_v47 = vpop.eup %2938  ;;  %v898_v48 = vadd.f32 1.0, %v2937_v46 }
 0x322   :  { %v904_v49 = vadd.f32 1.0, %v2939_v47  ;;  %v2941_v50 = vpop.eup %2940 }
 0x323   :  { %2944 = vrcp.f32 %v898_v48  ;;  %v2943_v51 = vpop.eup %2942  ;;  %v911_v55 = vadd.f32 1.0, %v2941_v50 }
 0x324   :  { %2946 = vrcp.f32 %v904_v49 }
 0x325   :  { %2948 = vrcp.f32 %v911_v55 }
 0x32d   :  { %v2945_v52 = vpop.eup %2944 }
 0x32e   :  { %v2947_v53 = vpop.eup %2946  ;;  %v915_v54 = vmul.f32 %v2945_v52, %v2943_v51 }
 0x32f   :  { %v914_v57 = vmul.f32 %v2947_v53, %v3591_v63  ;;  %v2949_v27 = vpop.eup %2948  ;;  %v2275_v63 = vld [vmem:[%s3910_s0 + $0x60] sm:$0xff] }
 0x331   :  { %v3641_v61 = vadd.f32 %v915_v54, %v914_v57 }
 0x333   :  { %2950 = vtanh.f32 %v3641_v61 }
 0x33d   :  { %v2951_v28 = vpop.eup %2950 }
 0x33e   :  { %v918_v30 = vmul.f32 %v2951_v28, %v2949_v27 }
 0x340   :  { %1057 = vmatmul.mubr.f32.vlgmr.msra.gmra.mrb[6].mxu0 %v918_v30  ;;  %1128 = vmatmul.mubr.f32.vlgmr.msra.gmra.mrb[6].mxu1 %v918_v30 }
 0x341   :  { %2624 = vmatpush1.bf16.msra.mxu0 %v3352_v56  ;;  %2656 = vmatpush1.bf16.msra.mxu1 %v3363_v59 }
 0x342   :  { %2626 = vmatprep.subr.bf16.mxu0 %v3354_v60  ;;  %2658 = vmatprep.subr.bf16.mxu1 %v3370_v0 }
 0x343   :  { %1299 = vmatprep.mubr.f32.mxu0 %v3038_v5  ;;  %1370 = vmatprep.mubr.f32.mxu1 %v3038_v5 }
 0x345   :  { %2628 = vmatpush1.bf16.msra.mxu0 %v3367_v1  ;;  %2660 = vmatpush1.bf16.msra.mxu1 %v3379_v2 }
 0x346   :  { %2630 = vmatprep.subr.bf16.mxu0 %v3373_v4  ;;  %2662 = vmatprep.subr.bf16.mxu1 %v3383_v3 }
 0x349   :  { %2632 = vmatpush1.bf16.msra.mxu0 %v3389_v6  ;;  %2664 = vmatpush1.bf16.msra.mxu1 %v3399_v8 }
 0x34a   :  { %2634 = vmatprep.subr.bf16.mxu0 %v3393_v7  ;;  %2666 = vmatprep.subr.bf16.mxu1 %v3403_v9 }
 0x34d   :  { %2636 = vmatpush1.bf16.msra.mxu0 %v3408_v10  ;;  %2668 = vmatpush1.bf16.msra.mxu1 %v3417_v12 }
 0x34e   :  { %2638 = vmatprep.subr.bf16.mxu0 %v3412_v11  ;;  %2670 = vmatprep.subr.bf16.mxu1 %v3421_v13 }
 0x351   :  { %2640 = vmatpush1.bf16.msra.mxu0 %v3426_v14  ;;  %2672 = vmatpush1.bf16.msra.mxu1 %v3435_v16 }
 0x352   :  { %2642 = vmatprep.subr.bf16.mxu0 %v3430_v15  ;;  %2674 = vmatprep.subr.bf16.mxu1 %v3439_v17 }
 0x355   :  { %2644 = vmatpush1.bf16.msra.mxu0 %v3444_v18  ;;  %2676 = vmatpush1.bf16.msra.mxu1 %v3453_v20 }
 0x356   :  { %2646 = vmatprep.subr.bf16.mxu0 %v3448_v19  ;;  %2678 = vmatprep.subr.bf16.mxu1 %v3457_v21 }
 0x359   :  { %2648 = vmatpush1.bf16.msra.mxu0 %v3462_v22  ;;  %2680 = vmatpush1.bf16.msra.mxu1 %v3471_v24 }
 0x35a   :  { %2650 = vmatprep.subr.bf16.mxu0 %v3466_v23  ;;  %2682 = vmatprep.subr.bf16.mxu1 %v3475_v26 }
 0x35d   :  { %2652 = vmatpush1.bf16.msra.mxu0 %v3480_v29  ;;  %2684 = vmatpush1.bf16.msra.mxu1 %v3486_v32 }
 0x35e   :  { %2686 = vmatprep.subr.bf16.mxu0 %v3349_v58  ;;  %2718 = vmatprep.subr.bf16.mxu1 %v3359_v62 }
 0x413   :  { %v1058_v31 = vpop.f32.mrb[6].mxu0  ;;  %v1129_v33 = vpop.f32.mrb[6].mxu1 }
 0x414   :  { %v1134_v34 = vadd.f32 %v2275_v63, %v1058_v31  ;;  %v1060_v35 = vpop.f32.mrb[7].mxu0  ;;  %v1131_v36 = vpop.f32.mrb[7].mxu1  ;;  %v1136_v44 = vadd.f32 %v2277_v42, %v1129_v33  ;;  %v2283_v63 = vld [vmem:[%s3910_s0 + $0x88] sm:$0xff] }
 0x415   :  { %v1135_v37 = vadd.f32 %v2276_v25, %v1060_v35  ;;  %v1137_v41 = vadd.f32 %v2278_v40, %v1131_v36 }
 0x416   :  { %v2279_v38 = vmul.f32 -1.442695, %v1134_v34 }
 0x417   :  { %v2280_v39 = vmul.f32 -1.442695, %v1135_v37  ;;  %v2281_v43 = vmul.f32 -1.442695, %v1137_v41  ;;  %v2284_v41 = vld [vmem:[%s3910_s0 + $0x90] sm:$0xff] }
 0x418   :  { %2952 = vpow2.f32 %v2279_v38 }
 0x419   :  { %2954 = vpow2.f32 %v2280_v39  ;;  %v2285_v39 = vld [vmem:[%s3910_s0 + $0x98] sm:$0xff] }
 0x41a   :  { %2956 = vpow2.f32 %v2281_v43 }
 0x41b   :  { %2958 = vtanh.f32 %v1136_v44 }
 0x422   :  { %v2953_v45 = vpop.eup %2952 }
 0x423   :  { %v2955_v46 = vpop.eup %2954  ;;  %v1141_v47 = vadd.f32 1.0, %v2953_v45 }
 0x424   :  { %v1147_v48 = vadd.f32 1.0, %v2955_v46  ;;  %v2957_v49 = vpop.eup %2956 }
 0x425   :  { %2960 = vrcp.f32 %v1141_v47  ;;  %v2959_v50 = vpop.eup %2958  ;;  %v1154_v54 = vadd.f32 1.0, %v2957_v49 }
 0x426   :  { %2962 = vrcp.f32 %v1147_v48 }
 0x427   :  { %2964 = vrcp.f32 %v1154_v54 }
 0x42f   :  { %v2961_v51 = vpop.eup %2960 }
 0x430   :  { %v2963_v52 = vpop.eup %2962  ;;  %v1158_v53 = vmul.f32 %v2961_v51, %v2959_v50 }
 0x431   :  { %v1157_v55 = vmul.f32 %v2963_v52, %v3641_v61  ;;  %v2965_v27 = vpop.eup %2964  ;;  %v2282_v61 = vld [vmem:[%s3910_s0 + $0x80] sm:$0xff] }
 0x433   :  { %v3691_v57 = vadd.f32 %v1158_v53, %v1157_v55 }
 0x435   :  { %2966 = vtanh.f32 %v3691_v57 }
 0x43f   :  { %v2967_v28 = vpop.eup %2966 }
 0x440   :  { %v1161_v30 = vmul.f32 %v2967_v28, %v2965_v27 }
 0x442   :  { %1300 = vmatmul.mubr.f32.vlgmr.msra.gmra.mrb[8].mxu0 %v1161_v30  ;;  %1371 = vmatmul.mubr.f32.vlgmr.msra.gmra.mrb[8].mxu1 %v1161_v30 }
 0x443   :  { %2688 = vmatpush1.bf16.msra.mxu0 %v3352_v56  ;;  %2720 = vmatpush1.bf16.msra.mxu1 %v3363_v59 }
 0x444   :  { %2690 = vmatprep.subr.bf16.mxu0 %v3354_v60  ;;  %2722 = vmatprep.subr.bf16.mxu1 %v3370_v0 }
 0x445   :  { %1542 = vmatprep.mubr.f32.mxu0 %v3038_v5  ;;  %1613 = vmatprep.mubr.f32.mxu1 %v3038_v5 }
 0x447   :  { %2692 = vmatpush1.bf16.msra.mxu0 %v3367_v1  ;;  %2724 = vmatpush1.bf16.msra.mxu1 %v3379_v2 }
 0x448   :  { %2694 = vmatprep.subr.bf16.mxu0 %v3373_v4  ;;  %2726 = vmatprep.subr.bf16.mxu1 %v3383_v3 }
 0x44b   :  { %2696 = vmatpush1.bf16.msra.mxu0 %v3389_v6  ;;  %2728 = vmatpush1.bf16.msra.mxu1 %v3399_v8 }
 0x44c   :  { %2698 = vmatprep.subr.bf16.mxu0 %v3393_v7  ;;  %2730 = vmatprep.subr.bf16.mxu1 %v3403_v9 }
 0x44f   :  { %2700 = vmatpush1.bf16.msra.mxu0 %v3408_v10  ;;  %2732 = vmatpush1.bf16.msra.mxu1 %v3417_v12 }
 0x450   :  { %2702 = vmatprep.subr.bf16.mxu0 %v3412_v11  ;;  %2734 = vmatprep.subr.bf16.mxu1 %v3421_v13 }
 0x453   :  { %2704 = vmatpush1.bf16.msra.mxu0 %v3426_v14  ;;  %2736 = vmatpush1.bf16.msra.mxu1 %v3435_v16 }
 0x454   :  { %2706 = vmatprep.subr.bf16.mxu0 %v3430_v15  ;;  %2738 = vmatprep.subr.bf16.mxu1 %v3439_v17 }
 0x457   :  { %2708 = vmatpush1.bf16.msra.mxu0 %v3444_v18  ;;  %2740 = vmatpush1.bf16.msra.mxu1 %v3453_v20 }
 0x458   :  { %2710 = vmatprep.subr.bf16.mxu0 %v3448_v19  ;;  %2742 = vmatprep.subr.bf16.mxu1 %v3457_v21 }
 0x45b   :  { %2712 = vmatpush1.bf16.msra.mxu0 %v3462_v22  ;;  %2744 = vmatpush1.bf16.msra.mxu1 %v3471_v24 }
 0x45c   :  { %2714 = vmatprep.subr.bf16.mxu0 %v3466_v23  ;;  %2746 = vmatprep.subr.bf16.mxu1 %v3475_v26 }
 0x45f   :  { %2716 = vmatpush1.bf16.msra.mxu0 %v3480_v29  ;;  %2748 = vmatpush1.bf16.msra.mxu1 %v3486_v32 }
 0x460   :  { %2750 = vmatprep.subr.bf16.mxu0 %v3349_v58  ;;  %2782 = vmatprep.subr.bf16.mxu1 %v3359_v62 }
 0x515   :  { %v1301_v25 = vpop.f32.mrb[8].mxu0  ;;  %v1372_v31 = vpop.f32.mrb[8].mxu1 }
 0x516   :  { %v1377_v33 = vadd.f32 %v2282_v61, %v1301_v25  ;;  %v1303_v34 = vpop.f32.mrb[9].mxu0  ;;  %v1374_v35 = vpop.f32.mrb[9].mxu1  ;;  %v1379_v43 = vadd.f32 %v2284_v41, %v1372_v31  ;;  %v2290_v61 = vld [vmem:[%s3910_s0 + $0xa8] sm:$0xff] }
 0x517   :  { %v1378_v36 = vadd.f32 %v2283_v63, %v1303_v34  ;;  %v1380_v40 = vadd.f32 %v2285_v39, %v1374_v35 }
 0x518   :  { %v2286_v37 = vmul.f32 -1.442695, %v1377_v33 }
 0x519   :  { %v2287_v38 = vmul.f32 -1.442695, %v1378_v36  ;;  %v2288_v42 = vmul.f32 -1.442695, %v1380_v40 }
 0x51a   :  { %2968 = vpow2.f32 %v2286_v37 }
 0x51b   :  { %2970 = vpow2.f32 %v2287_v38  ;;  %v2291_v38 = vld [vmem:[%s3910_s0 + $0xb0] sm:$0xff] }
 0x51c   :  { %2972 = vpow2.f32 %v2288_v42 }
 0x51d   :  { %2974 = vtanh.f32 %v1379_v43 }
 0x524   :  { %v2969_v44 = vpop.eup %2968 }
 0x525   :  { %v2971_v45 = vpop.eup %2970  ;;  %v1384_v46 = vadd.f32 1.0, %v2969_v44 }
 0x526   :  { %v1390_v47 = vadd.f32 1.0, %v2971_v45  ;;  %v2973_v48 = vpop.eup %2972 }
 0x527   :  { %2976 = vrcp.f32 %v1384_v46  ;;  %v2975_v49 = vpop.eup %2974  ;;  %v1397_v53 = vadd.f32 1.0, %v2973_v48 }
 0x528   :  { %2978 = vrcp.f32 %v1390_v47 }
 0x529   :  { %2980 = vrcp.f32 %v1397_v53 }
 0x531   :  { %v2977_v50 = vpop.eup %2976 }
 0x532   :  { %v2979_v51 = vpop.eup %2978  ;;  %v1401_v52 = vmul.f32 %v2977_v50, %v2975_v49 }
 0x533   :  { %v1400_v54 = vmul.f32 %v2979_v51, %v3691_v57  ;;  %v2981_v27 = vpop.eup %2980  ;;  %v2289_v57 = vld [vmem:[%s3910_s0 + $0xa0] sm:$0xff] }
 0x535   :  { %v3741_v55 = vadd.f32 %v1401_v52, %v1400_v54 }
 0x537   :  { %2982 = vtanh.f32 %v3741_v55 }
 0x541   :  { %v2983_v28 = vpop.eup %2982 }
 0x542   :  { %v1404_v30 = vmul.f32 %v2983_v28, %v2981_v27  ;;  %v2141_v28 = vld [vmem:[%s3912_s2 + $0x8] sm:$0xff] }
 0x544   :  { %1543 = vmatmul.mubr.f32.vlgmr.msra.gmra.mrb[10].mxu0 %v1404_v30  ;;  %1614 = vmatmul.mubr.f32.vlgmr.msra.gmra.mrb[10].mxu1 %v1404_v30 }
 0x545   :  { %2752 = vmatpush1.bf16.msra.mxu0 %v3352_v56  ;;  %2784 = vmatpush1.bf16.msra.mxu1 %v3363_v59 }
 0x546   :  { %2754 = vmatprep.subr.bf16.mxu0 %v3354_v60  ;;  %2786 = vmatprep.subr.bf16.mxu1 %v3370_v0 }
 0x547   :  { %1785 = vmatprep.mubr.f32.mxu0 %v3038_v5  ;;  %1856 = vmatprep.mubr.f32.mxu1 %v3038_v5 }
 0x549   :  { %2756 = vmatpush1.bf16.msra.mxu0 %v3367_v1  ;;  %2788 = vmatpush1.bf16.msra.mxu1 %v3379_v2 }
 0x54a   :  { %2758 = vmatprep.subr.bf16.mxu0 %v3373_v4  ;;  %2790 = vmatprep.subr.bf16.mxu1 %v3383_v3 }
 0x54d   :  { %2760 = vmatpush1.bf16.msra.mxu0 %v3389_v6  ;;  %2792 = vmatpush1.bf16.msra.mxu1 %v3399_v8 }
 0x54e   :  { %2762 = vmatprep.subr.bf16.mxu0 %v3393_v7  ;;  %2794 = vmatprep.subr.bf16.mxu1 %v3403_v9 }
 0x551   :  { %2764 = vmatpush1.bf16.msra.mxu0 %v3408_v10  ;;  %2796 = vmatpush1.bf16.msra.mxu1 %v3417_v12 }
 0x552   :  { %2766 = vmatprep.subr.bf16.mxu0 %v3412_v11  ;;  %2798 = vmatprep.subr.bf16.mxu1 %v3421_v13 }
 0x555   :  { %2768 = vmatpush1.bf16.msra.mxu0 %v3426_v14  ;;  %2800 = vmatpush1.bf16.msra.mxu1 %v3435_v16 }
 0x556   :  { %2770 = vmatprep.subr.bf16.mxu0 %v3430_v15  ;;  %2802 = vmatprep.subr.bf16.mxu1 %v3439_v17 }
 0x559   :  { %2772 = vmatpush1.bf16.msra.mxu0 %v3444_v18  ;;  %2804 = vmatpush1.bf16.msra.mxu1 %v3453_v20 }
 0x55a   :  { %2774 = vmatprep.subr.bf16.mxu0 %v3448_v19  ;;  %2806 = vmatprep.subr.bf16.mxu1 %v3457_v21 }
 0x55d   :  { %2776 = vmatpush1.bf16.msra.mxu0 %v3462_v22  ;;  %2808 = vmatpush1.bf16.msra.mxu1 %v3471_v24 }
 0x55e   :  { %2778 = vmatprep.subr.bf16.mxu0 %v3466_v23  ;;  %2810 = vmatprep.subr.bf16.mxu1 %v3475_v26 }
 0x561   :  { %2780 = vmatpush1.bf16.msra.mxu0 %v3480_v29  ;;  %2812 = vmatpush1.bf16.msra.mxu1 %v3486_v32 }
 0x562   :  { %2814 = vmatprep.subr.bf16.mxu0 %v3349_v58  ;;  %2846 = vmatprep.subr.bf16.mxu1 %v3359_v62  ;;  %v2292_v58 = vld [vmem:[%s3910_s0 + $0xb8] sm:$0xff] }
 0x617   :  { %v1544_v63 = vpop.f32.mrb[10].mxu0  ;;  %v1615_v25 = vpop.f32.mrb[10].mxu1 }
 0x618   :  { %v1620_v31 = vadd.f32 %v2289_v57, %v1544_v63  ;;  %v1546_v33 = vpop.f32.mrb[11].mxu0  ;;  %v1617_v34 = vpop.f32.mrb[11].mxu1  ;;  %v1622_v40 = vadd.f32 %v2291_v38, %v1615_v25  ;;  %v3039_v57 = vmov 0.0|0.0   ;;  %v2143_v63 = vld [vmem:[%s3912_s2 + $0x18] sm:$0xff] }
 0x619   :  { %v1621_v35 = vadd.f32 %v2290_v61, %v1546_v33  ;;  %v1623_v62 = vadd.f32 %v2292_v58, %v1617_v34  ;;  %v2142_v61 = vld [vmem:[%s3912_s2 + $0x10] sm:$0xff]  ;;  %v2145_v33 = vld [vmem:[%s3912_s2 + $0x28] sm:$0xff]  ;;  %v2148_v58 = vld [vmem:[%s3912_s2 + $0x40] sm:$0xff] }
 0x61a   :  { %v2293_v36 = vmul.f32 -1.442695, %v1620_v31  ;;  %v2881_v25 = vpack.c.bf16 %v2143_v63, %v2142_v61  ;;  %v2144_v31 = vld [vmem:[%s3912_s2 + $0x20] sm:$0xff] }
 0x61b   :  { %v2294_v37 = vmul.f32 -1.442695, %v1621_v35  ;;  %v2295_v39 = vmul.f32 -1.442695, %v1623_v62  ;;  %v2884_v34 = vpack.c.bf16 %v2145_v33, %v2144_v31  ;;  %v2146_v35 = vld [vmem:[%s3912_s2 + $0x30] sm:$0xff]  ;;  %v2149_v62 = vld [vmem:[%s3912_s2 + $0x48] sm:$0xff] }
 0x61c   :  { %2984 = vpow2.f32 %v2293_v36  ;;  %v2147_v36 = vld [vmem:[%s3912_s2 + $0x38] sm:$0xff]  ;;  %v2890_v38 = vpack.c.bf16 %v2149_v62, %v2148_v58 }
 0x61d   :  { %2986 = vpow2.f32 %v2294_v37  ;;  %v2887_v37 = vpack.c.bf16 %v2147_v36, %v2146_v35 }
 0x61e   :  { %2988 = vpow2.f32 %v2295_v39  ;;  %v2150_v39 = vld [vmem:[%s3912_s2 + $0x50] sm:$0xff] }
 0x61f   :  { %2990 = vtanh.f32 %v1622_v40  ;;  %v2151_v40 = vld [vmem:[%s3912_s2 + $0x58] sm:$0xff] }
 0x626   :  { %v2985_v41 = vpop.eup %2984 }
 0x627   :  { %v2987_v42 = vpop.eup %2986  ;;  %v1627_v43 = vadd.f32 1.0, %v2985_v41  ;;  %v2152_v41 = vld [vmem:[%s3912_s2 + $0x60] sm:$0xff] }
 0x628   :  { %v1633_v44 = vadd.f32 1.0, %v2987_v42  ;;  %v2989_v45 = vpop.eup %2988  ;;  %v2893_v42 = vpack.c.bf16 %v2151_v40, %v2150_v39 }
 0x629   :  { %2992 = vrcp.f32 %v1627_v43  ;;  %v2991_v46 = vpop.eup %2990  ;;  %v1640_v50 = vadd.f32 1.0, %v2989_v45  ;;  %v2153_v43 = vld [vmem:[%s3912_s2 + $0x68] sm:$0xff]  ;;  %v2154_v45 = vld [vmem:[%s3912_s2 + $0x70] sm:$0xff] }
 0x62a   :  { %2994 = vrcp.f32 %v1633_v44  ;;  %v2896_v44 = vpack.c.bf16 %v2153_v43, %v2152_v41 }
 0x62b   :  { %2996 = vrcp.f32 %v1640_v50 }
 0x633   :  { %v2993_v47 = vpop.eup %2992 }
 0x634   :  { %v2995_v48 = vpop.eup %2994  ;;  %v1644_v49 = vmul.f32 %v2993_v47, %v2991_v46  ;;  %v2155_v46 = vld [vmem:[%s3912_s2 + $0x78] sm:$0xff] }
 0x635   :  { %v1643_v51 = vmul.f32 %v2995_v48, %v3741_v55  ;;  %v2997_v53 = vpop.eup %2996  ;;  %v2140_v55 = vld [vmem:[%s3912_s2] sm:$0xff]  ;;  %v2899_v47 = vpack.c.bf16 %v2155_v46, %v2154_v45 }
 0x636   :  { %v2878_v30 = vpack.c.bf16 %v2141_v28, %v2140_v55  ;;  %v2303_v48 = vld [vmem:[%s3910_s0 + $0xe0] sm:$0xff] }
 0x637   :  { %v3791_v52 = vadd.f32 %v1644_v49, %v1643_v51 }
 0x639   :  { %2998 = vtanh.f32 %v3791_v52 }
 0x643   :  { %v2999_v54 = vpop.eup %2998 }
 0x644   :  { %v1647_v27 = vmul.f32 %v2999_v54, %v2997_v53 }
 0x646   :  { %1786 = vmatmul.mubr.f32.vlgmr.msra.gmra.mrb[12].mxu0 %v1647_v27  ;;  %1857 = vmatmul.mubr.f32.vlgmr.msra.gmra.mrb[12].mxu1 %v1647_v27 }
 0x647   :  { %2816 = vmatpush1.bf16.msra.mxu0 %v3352_v56  ;;  %2848 = vmatpush1.bf16.msra.mxu1 %v3363_v59  ;;  %v2296_v56 = vld [vmem:[%s3910_s0 + $0xc0] sm:$0xff]  ;;  %v2297_v59 = vld [vmem:[%s3910_s0 + $0xc8] sm:$0xff] }
 0x648   :  { %2818 = vmatprep.subr.bf16.mxu0 %v3354_v60  ;;  %2850 = vmatprep.subr.bf16.mxu1 %v3370_v0 }
 0x649   :  { %2028 = vmatprep.mubr.f32.mxu0 %v3038_v5  ;;  %2099 = vmatprep.mubr.f32.mxu1 %v3038_v5 }
 0x64b   :  { %2820 = vmatpush1.bf16.msra.mxu0 %v3367_v1  ;;  %2852 = vmatpush1.bf16.msra.mxu1 %v3379_v2 }
 0x64c   :  { %2822 = vmatprep.subr.bf16.mxu0 %v3373_v4  ;;  %2854 = vmatprep.subr.bf16.mxu1 %v3383_v3 }
 0x64f   :  { %2824 = vmatpush1.bf16.msra.mxu0 %v3389_v6  ;;  %2856 = vmatpush1.bf16.msra.mxu1 %v3399_v8  ;;  %v2299_v8 = vld [vmem:[%s3910_s0 + $0xd8] sm:$0xff] }
 0x650   :  { %2826 = vmatprep.subr.bf16.mxu0 %v3393_v7  ;;  %2858 = vmatprep.subr.bf16.mxu1 %v3403_v9 }
 0x653   :  { %2828 = vmatpush1.bf16.msra.mxu0 %v3408_v10  ;;  %2860 = vmatpush1.bf16.msra.mxu1 %v3417_v12  ;;  %v2298_v10 = vld [vmem:[%s3910_s0 + $0xd0] sm:$0xff] }
 0x654   :  { %2830 = vmatprep.subr.bf16.mxu0 %v3412_v11  ;;  %2862 = vmatprep.subr.bf16.mxu1 %v3421_v13 }
 0x657   :  { %2832 = vmatpush1.bf16.msra.mxu0 %v3426_v14  ;;  %2864 = vmatpush1.bf16.msra.mxu1 %v3435_v16 }
 0x658   :  { %2834 = vmatprep.subr.bf16.mxu0 %v3430_v15  ;;  %2866 = vmatprep.subr.bf16.mxu1 %v3439_v17 }
 0x65b   :  { %2836 = vmatpush1.bf16.msra.mxu0 %v3444_v18  ;;  %2868 = vmatpush1.bf16.msra.mxu1 %v3453_v20 }
 0x65c   :  { %2838 = vmatprep.subr.bf16.mxu0 %v3448_v19  ;;  %2870 = vmatprep.subr.bf16.mxu1 %v3457_v21 }
 0x65f   :  { %2840 = vmatpush1.bf16.msra.mxu0 %v3462_v22  ;;  %2872 = vmatpush1.bf16.msra.mxu1 %v3471_v24 }
 0x660   :  { %2842 = vmatprep.subr.bf16.mxu0 %v3466_v23  ;;  %2874 = vmatprep.subr.bf16.mxu1 %v3475_v26 }
 0x663   :  { %2844 = vmatpush1.bf16.msra.mxu0 %v3480_v29  ;;  %2876 = vmatpush1.bf16.msra.mxu1 %v3486_v32 }
 0x664   :  { %2877 = vmatprep.subr.bf16.mxu0 %v3039_v57 }
 0x719   :  { %v1787_v60 = vpop.f32.mrb[12].mxu0  ;;  %v1858_v1 = vpop.f32.mrb[12].mxu1 }
 0x71a   :  { %v1863_v0 = vadd.f32 %v2296_v56, %v1787_v60  ;;  %v1789_v4 = vpop.f32.mrb[13].mxu0  ;;  %v1860_v2 = vpop.f32.mrb[13].mxu1  ;;  %v1865_v12 = vadd.f32 %v2298_v10, %v1858_v1  ;;  %v2305_v1 = vld [vmem:[%s3910_s0 + $0xf0] sm:$0xff] }
 0x71b   :  { %v1864_v3 = vadd.f32 %v2297_v59, %v1789_v4  ;;  %v1866_v9 = vadd.f32 %v2299_v8, %v1860_v2  ;;  %v2306_v59 = vld [vmem:[%s3910_s0 + $0xf8] sm:$0xff] }
 0x71c   :  { %v2300_v6 = vmul.f32 -1.442695, %v1863_v0 }
 0x71d   :  { %v2301_v7 = vmul.f32 -1.442695, %v1864_v3  ;;  %v2302_v11 = vmul.f32 -1.442695, %v1866_v9 }
 0x71e   :  { %3000 = vpow2.f32 %v2300_v6 }
 0x71f   :  { %3002 = vpow2.f32 %v2301_v7 }
 0x720   :  { %3004 = vpow2.f32 %v2302_v11 }
 0x721   :  { %3006 = vtanh.f32 %v1865_v12 }
 0x728   :  { %v3001_v13 = vpop.eup %3000 }
 0x729   :  { %v3003_v14 = vpop.eup %3002  ;;  %v1870_v15 = vadd.f32 1.0, %v3001_v13 }
 0x72a   :  { %v1876_v16 = vadd.f32 1.0, %v3003_v14  ;;  %v3005_v17 = vpop.eup %3004 }
 0x72b   :  { %3008 = vrcp.f32 %v1870_v15  ;;  %v3007_v18 = vpop.eup %3006  ;;  %v1883_v22 = vadd.f32 1.0, %v3005_v17 }
 0x72c   :  { %3010 = vrcp.f32 %v1876_v16 }
 0x72d   :  { %3012 = vrcp.f32 %v1883_v22 }
 0x735   :  { %v3009_v19 = vpop.eup %3008 }
 0x736   :  { %v3011_v20 = vpop.eup %3010  ;;  %v1887_v21 = vmul.f32 %v3009_v19, %v3007_v18  ;;  %v2310_v19 = vld [vmem:[%s3913_s3] ss:$0 sm:$0xff] }
 0x737   :  { %v1886_v23 = vmul.f32 %v3011_v20, %v3791_v52  ;;  %v3013_v26 = vpop.eup %3012 }
 0x739   :  { %v3839_v24 = vadd.f32 %v1887_v21, %v1886_v23 }
 0x73b   :  { %3014 = vtanh.f32 %v3839_v24 }
 0x745   :  { %v3015_v29 = vpop.eup %3014 }
 0x746   :  { %v1890_v32 = vmul.f32 %v3015_v29, %v3013_v26 }
 0x748   :  { %2029 = vmatmul.mubr.f32.vlgmr.msra.gmra.mrb[14].mxu0 %v1890_v32  ;;  %2100 = vmatmul.mubr.f32.vlgmr.msra.gmra.mrb[14].mxu1 %v1890_v32 }
 0x749   :  { %2879 = vmatpush3.bf16.msra.mxu0 %v2878_v30  ;;  %2362 = vmatprep.mubr.msk.f32.mxu0 %vm3040_vm0, %v3038_v5  ;;  %v2304_v5 = vld [vmem:[%s3910_s0 + $0xe8] sm:$0xff] }
 0x74a   :  { %2880 = vmatprep.subr.bf16.mxu0 %v3039_v57 }
 0x74d   :  { %2882 = vmatpush3.bf16.msra.mxu0 %v2881_v25 }
 0x74e   :  { %2883 = vmatprep.subr.bf16.mxu0 %v3039_v57 }
 0x751   :  { %2885 = vmatpush3.bf16.msra.mxu0 %v2884_v34 }
 0x752   :  { %2886 = vmatprep.subr.bf16.mxu0 %v3039_v57 }
 0x755   :  { %2888 = vmatpush3.bf16.msra.mxu0 %v2887_v37 }
 0x756   :  { %2889 = vmatprep.subr.bf16.mxu0 %v3039_v57 }
 0x759   :  { %2891 = vmatpush3.bf16.msra.mxu0 %v2890_v38 }
 0x75a   :  { %2892 = vmatprep.subr.bf16.mxu0 %v3039_v57 }
 0x75d   :  { %2894 = vmatpush3.bf16.msra.mxu0 %v2893_v42 }
 0x75e   :  { %2895 = vmatprep.subr.bf16.mxu0 %v3039_v57 }
 0x761   :  { %2897 = vmatpush3.bf16.msra.mxu0 %v2896_v44 }
 0x762   :  { %2898 = vmatprep.subr.bf16.mxu0 %v3039_v57 }
 0x765   :  { %2900 = vmatpush3.bf16.msra.mxu0 %v2899_v47 }
 0x81b   :  { %v2030_v49 = vpop.f32.mrb[14].mxu0  ;;  %v2101_v50 = vpop.f32.mrb[14].mxu1 }
 0x81c   :  { %v2106_v51 = vadd.f32 %v2303_v48, %v2030_v49  ;;  %v2032_v52 = vpop.f32.mrb[15].mxu0  ;;  %v2103_v53 = vpop.f32.mrb[15].mxu1  ;;  %v2108_v4 = vadd.f32 %v2305_v1, %v2101_v50 }
 0x81d   :  { %v2107_v54 = vadd.f32 %v2304_v5, %v2032_v52  ;;  %v2109_v60 = vadd.f32 %v2306_v59, %v2103_v53 }
 0x81e   :  { %v2307_v27 = vmul.f32 -1.442695, %v2106_v51 }
 0x81f   :  { %v2308_v56 = vmul.f32 -1.442695, %v2107_v54  ;;  %v2309_v0 = vmul.f32 -1.442695, %v2109_v60 }
 0x820   :  { %3016 = vpow2.f32 %v2307_v27 }
 0x821   :  { %3018 = vpow2.f32 %v2308_v56 }
 0x822   :  { %3020 = vpow2.f32 %v2309_v0 }
 0x823   :  { %3022 = vtanh.f32 %v2108_v4 }
 0x82a   :  { %v3017_v2 = vpop.eup %3016 }
 0x82b   :  { %v3019_v3 = vpop.eup %3018  ;;  %v2113_v6 = vadd.f32 1.0, %v3017_v2 }
 0x82c   :  { %v2119_v7 = vadd.f32 1.0, %v3019_v3  ;;  %v3021_v8 = vpop.eup %3020 }
 0x82d   :  { %3024 = vrcp.f32 %v2113_v6  ;;  %v3023_v9 = vpop.eup %3022  ;;  %v2126_v13 = vadd.f32 1.0, %v3021_v8 }
 0x82e   :  { %3026 = vrcp.f32 %v2119_v7 }
 0x82f   :  { %3028 = vrcp.f32 %v2126_v13 }
 0x837   :  { %v3025_v10 = vpop.eup %3024 }
 0x838   :  { %v3027_v11 = vpop.eup %3026  ;;  %v2130_v12 = vmul.f32 %v3025_v10, %v3023_v9 }
 0x839   :  { %v2129_v14 = vmul.f32 %v3027_v11, %v3839_v24  ;;  %v3029_v16 = vpop.eup %3028 }
 0x83b   :  { %v2131_v15 = vadd.f32 %v2130_v12, %v2129_v14 }
 0x83d   :  { %3030 = vtanh.f32 %v2131_v15 }
 0x847   :  { %v3031_v17 = vpop.eup %3030 }
 0x848   :  { %v2133_v18 = vmul.f32 %v3031_v17, %v3029_v16 }
 0x84a   :  { %2363 = vmatmul.mubr.f32.vlgmr.msra.gmra.mrb[16].mxu0 %v2133_v18 }
 0x91d   :  { %v2229_v20 = vpop.f32.mrb[16].mxu0 }
 0x91e   :  { %v2230_v21 = vadd.f32 %v2310_v19, %v2229_v20  ;;  %v2364_v22 = vpop.f32.mrb[17].mxu0 }
 0x920   :  { %v2311_v23 = vmul.f32 -1.442695, %v2230_v21 }
 0x922   :  { %3032 = vpow2.f32 %v2311_v23 }
 0x92c   :  { %v3033_v26 = vpop.eup %3032 }
 0x92d   :  { %v2236_v29 = vadd.f32 1.0, %v3033_v26 }
 0x92f   :  { %3034 = vrcp.f32 %v2236_v29 }
 0x939   :  { %v3035_v24 = vpop.eup %3034 }
 0x93a   :  { %2239 = vst [vmem:[%s3914_s4] sm:$0xff] %v3035_v24 }
 0x93b   :  { %2244 = vsyncmov [#allocation5] }
 0x93e   :  { %s2245_s29 = vpop.sfrf %2244 }
 0x93f   :  { %p2312_p0 = scmp.ne.s32.totalorder %s2245_s29, 0 }
 0x941   :  { %2249 = shalt.err (%p2312_p0)  }

</bundles_post_ra>
